<compile_context>
chip_gen: v6e
topology: v6e:2x2x1
jax: 0.10.0
libtpu: 0.0.40
codegen_flags: <defaults>
</compile_context>

<pallas_src>
import functools
import math

import jax
import jax.numpy as jnp
import numpy as np
from jax.experimental import pallas as pl
from jax.experimental.pallas import tpu as pltpu


# ----------------------------------------------------------------------------
# Shared math helpers
# ----------------------------------------------------------------------------
def _layer_norm(x, gamma, beta, eps=1e-5):
    mu = jnp.mean(x, axis=-1, keepdims=True)
    var = jnp.mean(jnp.square(x - mu), axis=-1, keepdims=True)
    return (x - mu) * jax.lax.rsqrt(var + eps) * gamma + beta


def _softmax_last(s):
    m = jnp.max(s, axis=-1, keepdims=True)
    e = jnp.exp(s - m)
    return e / jnp.sum(e, axis=-1, keepdims=True)


# ----------------------------------------------------------------------------
# Fused encoder kernel: one grid step per batch element.
#   Scalar prefetch (SMEM): tok_ref (B,T) int32, vlen_ref (B,) int32
#   Inputs:
#     emb_hbm : (V, H) f32, memory_space=pl.ANY (rows gathered by manual DMA)
#     pos_ref : (T, H) f32
#     wqkv    : (L, H, 3H) bf16   [Wq|Wk|Wv]
#     wo      : (L, H, H) bf16
#     g1,be1  : (L, 1, H) f32     LayerNorm 1
#     w1,b1   : (L, H, F) bf16, (L, 1, F) f32
#     w2,b2   : (L, F, H) bf16, (L, 1, H) f32
#     g2,be2  : (L, 1, H) f32     LayerNorm 2
#   Scratch: emb_vmem (T,H) f32, head_vmem (T,H) f32, gsem DMA (T,)
# ----------------------------------------------------------------------------
def _fused_encoder_kernel(tok_ref, vlen_ref,
                          emb_hbm, pos_ref,
                          wqkv_ref, wo_ref, g1_ref, be1_ref,
                          w1_ref, b1_ref, w2_ref, b2_ref, g2_ref, be2_ref,
                          o_ref,
                          emb_vmem, head_vmem, gsem,
                          *, num_heads, num_blks, scale):
    b = pl.program_id(0)
    T, H = emb_vmem.shape
    d = H // num_heads
    inv_sqrt_d = 1.0 / math.sqrt(d)

    # ---- embedding gather: one small row DMA per token of this batch row ----
    for t in range(T):
        pltpu.make_async_copy(emb_hbm.at[tok_ref[b, t]], emb_vmem.at[t],
                              gsem.at[t]).start()
    for t in range(T):
        # wait only needs the semaphore + matching transfer size
        pltpu.make_async_copy(emb_hbm.at[0], emb_vmem.at[t], gsem.at[t]).wait()

    # ---- embedding * sqrt(H) + positional encoding (dropout = identity) ----
    x = emb_vmem[...] * scale + pos_ref[...]            # (T, H) f32

    # key-position mask, shared across all layers / heads
    vlen = vlen_ref[b]
    col = jax.lax.broadcasted_iota(jnp.int32, (T, T), 1)
    mask = col < vlen

    # ---- num_blks encoder blocks, fully resident in VMEM ----
    for l in range(num_blks):
        xb = x.astype(jnp.bfloat16)
        # Fused QKV projection: one (T,H)@(H,3H) bf16 MXU matmul, f32 accum.
        qkv = jnp.dot(xb, wqkv_ref[l], preferred_element_type=jnp.float32)
        q = qkv[:, :H] * inv_sqrt_d        # fold 1/sqrt(d) into q once
        k = qkv[:, H:2 * H]
        v = qkv[:, 2 * H:]

        # Per-head attention; head outputs written into lane slices of a
        # (T,H) scratch so Wo is applied as ONE full-K matmul afterwards.
        for h in range(num_heads):
            sl = slice(h * d, (h + 1) * d)
            s = jax.lax.dot_general(q[:, sl], k[:, sl],
                                    (((1,), (1,)), ((), ())),
                                    preferred_element_type=jnp.float32)
            s = jnp.where(mask, s, -1e6)
            m = jnp.max(s, axis=-1, keepdims=True)
            e = jnp.exp(s - m)
            p = e * pl.reciprocal(jnp.sum(e, axis=-1, keepdims=True),
                                  approx=True)
            head_vmem[:, sl] = jnp.dot(p, v[:, sl],
                                       preferred_element_type=jnp.float32)

        attn_o = jnp.dot(head_vmem[...].astype(jnp.bfloat16), wo_ref[l],
                         preferred_element_type=jnp.float32)
        # AddNorm 1 (f32)
        y = _layer_norm(attn_o + x, g1_ref[l], be1_ref[l])
        # Position-wise FFN (bf16 matmuls, f32 accumulate / bias / ReLU)
        h1 = jnp.dot(y.astype(jnp.bfloat16), w1_ref[l],
                     preferred_element_type=jnp.float32) + b1_ref[l]
        h1 = jnp.maximum(h1, 0.0)
        f = jnp.dot(h1.astype(jnp.bfloat16), w2_ref[l],
                    preferred_element_type=jnp.float32) + b2_ref[l]
        # AddNorm 2 (f32)
        x = _layer_norm(f + y, g2_ref[l], be2_ref[l])

    o_ref[0] = x.astype(o_ref.dtype)


def transformer_encoder_forward(params, X, valid_lens=None):
    """X: (batch, seq) int32 tokens. Returns (batch, seq, num_hiddens) f32."""
    H = params["num_hiddens"]
    nh = params["num_heads"]
    L = params["num_blks"]
    FF = params["w1"].shape[-1]
    B, T = X.shape
    tokens = X.astype(jnp.int32)
    pos = params["pos_encoding"][:T]
    if valid_lens is None:
        vlens = jnp.full((B,), T, dtype=jnp.int32)
    else:
        vlens = valid_lens.astype(jnp.int32)

    kernel = functools.partial(_fused_encoder_kernel, num_heads=nh,
                               num_blks=L, scale=float(math.sqrt(H)))
    const3 = lambda b, tok, vl: (0, 0, 0)   # layer-stacked weights: fetched once

    grid_spec = pltpu.PrefetchScalarGridSpec(
        num_scalar_prefetch=2,              # tokens, valid_lens -> SMEM
        grid=(B,),
        in_specs=[
            pl.BlockSpec(memory_space=pl.ANY),                     # emb table (HBM)
            pl.BlockSpec((T, H), lambda b, tok, vl: (0, 0)),       # pos enc
            pl.BlockSpec((L, H, 3 * H), const3),                   # wqkv
            pl.BlockSpec((L, H, H), const3),                       # wo
            pl.BlockSpec((L, 1, H), const3),                       # gamma1
            pl.BlockSpec((L, 1, H), const3),                       # beta1
            pl.BlockSpec((L, H, FF), const3),                      # w1
            pl.BlockSpec((L, 1, FF), const3),                      # b1
            pl.BlockSpec((L, FF, H), const3),                      # w2
            pl.BlockSpec((L, 1, H), const3),                       # b2
            pl.BlockSpec((L, 1, H), const3),                       # gamma2
            pl.BlockSpec((L, 1, H), const3),                       # beta2
        ],
        out_specs=pl.BlockSpec((1, T, H), lambda b, tok, vl: (b, 0, 0)),
        scratch_shapes=[
            pltpu.VMEM((T, H), jnp.float32),       # gathered embedding rows
            pltpu.VMEM((T, H), jnp.float32),       # packed head outputs
            pltpu.SemaphoreType.DMA((T,)),         # gather DMA semaphores
        ],
    )
    # TODO(synk): on single-TC v5e/v6e the batch could be collapsed into the
    # sublane axis (grid=() with a block-diagonal mask) for slightly better MXU
    # occupancy; kept batch-parallel here so v7x uses both TensorCores.
    return pl.pallas_call(
        kernel,
        out_shape=jax.ShapeDtypeStruct((B, T, H), jnp.float32),
        grid_spec=grid_spec,
        compiler_params=pltpu.CompilerParams(
            dimension_semantics=("parallel",)),
    )(tokens, vlens, params["embedding"], pos,
      params["wqkv"], params["wo"], params["gamma1"], params["beta1"],
      params["w1"], params["b1"], params["w2"], params["b2"],
      params["gamma2"], params["beta2"])


# ----------------------------------------------------------------------------
# Parameters
# ----------------------------------------------------------------------------
def make_positional_encoding(max_len, num_hiddens):
    P = np.zeros((max_len, num_hiddens), np.float32)
    pos = np.arange(max_len, dtype=np.float32).reshape(-1, 1)
    div = np.power(10000.0,
                   np.arange(0, num_hiddens, 2, dtype=np.float32) / num_hiddens)
    X = pos / div
    P[:, 0::2] = np.sin(X)
    P[:, 1::2] = np.cos(X)
    return jnp.asarray(P)


def _uniform(key, shape, bound):
    return jax.random.uniform(key, shape, jnp.float32, -bound, bound)


def init_transformer_encoder(key, vocab_size, num_hiddens, ffn_num_hiddens,
                             num_heads, num_blks):
    keys = jax.random.split(key, 1 + 8 * num_blks)
    emb = jax.random.normal(keys[0], (vocab_size, num_hiddens), jnp.float32)
    bH = 1.0 / math.sqrt(num_hiddens)
    bF = 1.0 / math.sqrt(ffn_num_hiddens)
    wqkv, wo, w1, b1, w2, b2 = [], [], [], [], [], []
    ki = 1
    for _ in range(num_blks):
        wq = _uniform(keys[ki], (num_hiddens, num_hiddens), bH); ki += 1
        wk = _uniform(keys[ki], (num_hiddens, num_hiddens), bH); ki += 1
        wv = _uniform(keys[ki], (num_hiddens, num_hiddens), bH); ki += 1
        wqkv.append(jnp.concatenate([wq, wk, wv], axis=1))          # (H, 3H)
        wo.append(_uniform(keys[ki], (num_hiddens, num_hiddens), bH)); ki += 1
        w1.append(_uniform(keys[ki], (num_hiddens, ffn_num_hiddens), bH)); ki += 1
        b1.append(_uniform(keys[ki], (1, ffn_num_hiddens), bH)); ki += 1
        w2.append(_uniform(keys[ki], (ffn_num_hiddens, num_hiddens), bF)); ki += 1
        b2.append(_uniform(keys[ki], (1, num_hiddens), bF)); ki += 1
    L = num_blks
    return {
        "num_hiddens": num_hiddens, "num_heads": num_heads, "num_blks": L,
        "embedding": emb,                                   # N(0,1), f32
        "pos_encoding": make_positional_encoding(1000, num_hiddens),
        # MXU weights stored in bf16 (native MXU rate, half the DMA bytes).
        "wqkv": jnp.stack(wqkv).astype(jnp.bfloat16),        # (L, H, 3H)
        "wo": jnp.stack(wo).astype(jnp.bfloat16),            # (L, H, H)
        "w1": jnp.stack(w1).astype(jnp.bfloat16),            # (L, H, F)
        "w2": jnp.stack(w2).astype(jnp.bfloat16),            # (L, F, H)
        "b1": jnp.stack(b1),                                 # (L, 1, F) f32
        "b2": jnp.stack(b2),                                 # (L, 1, H) f32
        "gamma1": jnp.ones((L, 1, num_hiddens), jnp.float32),
        "beta1": jnp.zeros((L, 1, num_hiddens), jnp.float32),
        "gamma2": jnp.ones((L, 1, num_hiddens), jnp.float32),
        "beta2": jnp.zeros((L, 1, num_hiddens), jnp.float32),
    }


# ----------------------------------------------------------------------------
# Pure-JAX reference mirroring the kernel's precision choices (bf16 operands
# for the weight matmuls, f32 softmax/LayerNorm/residuals) for the check.
# ----------------------------------------------------------------------------
def _ref_forward(params, X, valid_lens):
    H = params["num_hiddens"]; nh = params["num_heads"]; L = params["num_blks"]
    d = H // nh
    emb = jnp.take(params["embedding"], X.astype(jnp.int32), axis=0)
    B, T, _ = emb.shape
    x = emb * math.sqrt(H) + params["pos_encoding"][None, :T, :]
    vlens = (jnp.full((B,), T, jnp.int32) if valid_lens is None
             else valid_lens.astype(jnp.int32))

    def bmm(a, w):   # bf16-in, f32-accumulate weight matmul (as in the kernel)
        return jnp.matmul(a.astype(jnp.bfloat16), w,
                          preferred_element_type=jnp.float32)

    for l in range(L):
        qkv = bmm(x, params["wqkv"][l])
        q, k, v = qkv[..., :H], qkv[..., H:2 * H], qkv[..., 2 * H:]

        def split(z):
            return z.reshape(B, T, nh, d).transpose(0, 2, 1, 3)

        qh, kh, vh = split(q), split(k), split(v)
        s = jnp.einsum('bhtd,bhsd->bhts', qh, kh,
                       preferred_element_type=jnp.float32) / math.sqrt(d)
        mask = (jnp.arange(T)[None, None, None, :]
                < vlens[:, None, None, None])
        s = jnp.where(mask, s, -1e6)
        p = _softmax_last(s)
        o = jnp.einsum('bhts,bhsd->bhtd', p, vh,
                       preferred_element_type=jnp.float32)
        o = o.transpose(0, 2, 1, 3).reshape(B, T, H)
        attn_o = bmm(o, params["wo"][l])
        y = _layer_norm(attn_o + x, params["gamma1"][l], params["beta1"][l])
        h1 = jnp.maximum(bmm(y, params["w1"][l]) + params["b1"][l], 0.0)
        f = bmm(h1, params["w2"][l]) + params["b2"][l]
        x = _layer_norm(f + y, params["gamma2"][l], params["beta2"][l])
    return x


if __name__ == "__main__":
    vocab_size = 32
    num_hiddens = 128       # lane-aligned (multiple of 128)
    ffn_num_hiddens = 256   # lane-aligned
    num_heads = 4
    num_blks = 2
    batch, seq = 2, 8       # seq is sublane-aligned (multiple of 8)

    key = jax.random.PRNGKey(0)
    pkey, xkey = jax.random.split(key)
    params = init_transformer_encoder(pkey, vocab_size, num_hiddens,
                                      ffn_num_hiddens, num_heads, num_blks)
    X = jax.random.randint(xkey, (batch, seq), 0, vocab_size, dtype=jnp.int32)
    valid_lens = jnp.array([5, 8], dtype=jnp.int32)

    out = transformer_encoder_forward(params, X, valid_lens)
    out = jax.block_until_ready(out)
    assert out.shape == (batch, seq, num_hiddens)

    ref = jax.block_until_ready(_ref_forward(params, X, valid_lens))
    # bf16 MXU operands + approx reciprocal => modestly relaxed tolerance.
    np.testing.assert_allclose(np.asarray(out), np.asarray(ref),
                               rtol=1e-2, atol=1e-2)

    print("KERNEL_OK")
</pallas_src>

<mosaic_0001>
module attributes {stable_mosaic.version = 11 : i64} {
  func.func @_fused_encoder_kernel(%arg0: i32, %arg1: memref<2x8xi32, #tpu.memory_space<smem>>, %arg2: memref<2xi32, #tpu.memory_space<smem>>, %arg3: memref<32x128xf32, #tpu.memory_space<any>>, %arg4: memref<8x128xf32, #tpu.memory_space<vmem>>, %arg5: memref<2x128x384xbf16, #tpu.memory_space<vmem>>, %arg6: memref<2x128x128xbf16, #tpu.memory_space<vmem>>, %arg7: memref<2x1x128xf32, #tpu.memory_space<vmem>>, %arg8: memref<2x1x128xf32, #tpu.memory_space<vmem>>, %arg9: memref<2x128x256xbf16, #tpu.memory_space<vmem>>, %arg10: memref<2x1x256xf32, #tpu.memory_space<vmem>>, %arg11: memref<2x256x128xbf16, #tpu.memory_space<vmem>>, %arg12: memref<2x1x128xf32, #tpu.memory_space<vmem>>, %arg13: memref<2x1x128xf32, #tpu.memory_space<vmem>>, %arg14: memref<2x1x128xf32, #tpu.memory_space<vmem>>, %arg15: memref<1x8x128xf32, #tpu.memory_space<vmem>>, %arg16: memref<8x128xf32, #tpu.memory_space<vmem>>, %arg17: memref<8x128xf32, #tpu.memory_space<vmem>>, %arg18: memref<8x!tpu.dma_semaphore, #tpu.memory_space<semaphore_mem>>) attributes {dimension_semantics = [#tpu.dimension_semantics<parallel>], iteration_bounds = array<i64: 2>, scalar_prefetch = 2 : i64, scratch_operands = 3 : i64, tpu.core_type = #tpu.core_type<tc>, window_params = [{}, {pipeline_mode = #tpu.pipeline_mode<synchronous>, transform_indices = @transform_1, window_bounds = array<i64: 8, 128>}, {pipeline_mode = #tpu.pipeline_mode<synchronous>, transform_indices = @transform_2, window_bounds = array<i64: 2, 128, 384>}, {pipeline_mode = #tpu.pipeline_mode<synchronous>, transform_indices = @transform_3, window_bounds = array<i64: 2, 128, 128>}, {pipeline_mode = #tpu.pipeline_mode<synchronous>, transform_indices = @transform_4, window_bounds = array<i64: 2, 1, 128>}, {pipeline_mode = #tpu.pipeline_mode<synchronous>, transform_indices = @transform_5, window_bounds = array<i64: 2, 1, 128>}, {pipeline_mode = #tpu.pipeline_mode<synchronous>, transform_indices = @transform_6, window_bounds = array<i64: 2, 128, 256>}, {pipeline_mode = #tpu.pipeline_mode<synchronous>, transform_indices = @transform_7, window_bounds = array<i64: 2, 1, 256>}, {pipeline_mode = #tpu.pipeline_mode<synchronous>, transform_indices = @transform_8, window_bounds = array<i64: 2, 256, 128>}, {pipeline_mode = #tpu.pipeline_mode<synchronous>, transform_indices = @transform_9, window_bounds = array<i64: 2, 1, 128>}, {pipeline_mode = #tpu.pipeline_mode<synchronous>, transform_indices = @transform_10, window_bounds = array<i64: 2, 1, 128>}, {pipeline_mode = #tpu.pipeline_mode<synchronous>, transform_indices = @transform_11, window_bounds = array<i64: 2, 1, 128>}, {transform_indices = @transform_12, window_bounds = array<i64: 1, 8, 128>}]} {
    %0 = arith.index_cast %arg0 : i32 to index
    %c0 = arith.constant 0 : index
    %1 = memref.load %arg1[%0, %c0] : memref<2x8xi32, #tpu.memory_space<smem>>
    %c0_i32 = arith.constant 0 : i32
    %c0_i32_0 = arith.constant 0 : i32
    %c0_i32_1 = arith.constant 0 : i32
    %2 = tpu.memref_slice %arg3[%1, %c0_i32_1] : memref<32x128xf32, #tpu.memory_space<any>> -> memref<1x128xf32, #tpu.memory_space<any>>
    %3 = tpu.memref_squeeze %2 : memref<1x128xf32, #tpu.memory_space<any>> -> memref<128xf32, #tpu.memory_space<any>>
    %c0_i32_2 = arith.constant 0 : i32
    %4 = tpu.memref_slice %arg16[%c0_i32, %c0_i32_2] : memref<8x128xf32, #tpu.memory_space<vmem>> -> memref<1x128xf32, #tpu.memory_space<vmem>>
    %5 = tpu.memref_squeeze %4 : memref<1x128xf32, #tpu.memory_space<vmem>> -> memref<128xf32, #tpu.memory_space<vmem>>
    %6 = tpu.memref_slice %arg18[%c0_i32_0] : memref<8x!tpu.dma_semaphore, #tpu.memory_space<semaphore_mem>> -> memref<1x!tpu.dma_semaphore, #tpu.memory_space<semaphore_mem>>
    %7 = tpu.memref_squeeze %6 : memref<1x!tpu.dma_semaphore, #tpu.memory_space<semaphore_mem>> -> memref<!tpu.dma_semaphore, #tpu.memory_space<semaphore_mem>>
    tpu.enqueue_dma source(%3 : memref<128xf32, #tpu.memory_space<any>>) target(%5 : memref<128xf32, #tpu.memory_space<vmem>>) target_semaphore(%7 : memref<!tpu.dma_semaphore, #tpu.memory_space<semaphore_mem>>)
    %8 = arith.index_cast %arg0 : i32 to index
    %c1 = arith.constant 1 : index
    %9 = memref.load %arg1[%8, %c1] : memref<2x8xi32, #tpu.memory_space<smem>>
    %c1_i32 = arith.constant 1 : i32
    %c1_i32_3 = arith.constant 1 : i32
    %c0_i32_4 = arith.constant 0 : i32
    %10 = tpu.memref_slice %arg3[%9, %c0_i32_4] : memref<32x128xf32, #tpu.memory_space<any>> -> memref<1x128xf32, #tpu.memory_space<any>>
    %11 = tpu.memref_squeeze %10 : memref<1x128xf32, #tpu.memory_space<any>> -> memref<128xf32, #tpu.memory_space<any>>
    %c0_i32_5 = arith.constant 0 : i32
    %12 = tpu.memref_slice %arg16[%c1_i32, %c0_i32_5] : memref<8x128xf32, #tpu.memory_space<vmem>> -> memref<1x128xf32, #tpu.memory_space<vmem>>
    %13 = tpu.memref_squeeze %12 : memref<1x128xf32, #tpu.memory_space<vmem>> -> memref<128xf32, #tpu.memory_space<vmem>>
    %14 = tpu.memref_slice %arg18[%c1_i32_3] : memref<8x!tpu.dma_semaphore, #tpu.memory_space<semaphore_mem>> -> memref<1x!tpu.dma_semaphore, #tpu.memory_space<semaphore_mem>>
    %15 = tpu.memref_squeeze %14 : memref<1x!tpu.dma_semaphore, #tpu.memory_space<semaphore_mem>> -> memref<!tpu.dma_semaphore, #tpu.memory_space<semaphore_mem>>
    tpu.enqueue_dma source(%11 : memref<128xf32, #tpu.memory_space<any>>) target(%13 : memref<128xf32, #tpu.memory_space<vmem>>) target_semaphore(%15 : memref<!tpu.dma_semaphore, #tpu.memory_space<semaphore_mem>>)
    %16 = arith.index_cast %arg0 : i32 to index
    %c2 = arith.constant 2 : index
    %17 = memref.load %arg1[%16, %c2] : memref<2x8xi32, #tpu.memory_space<smem>>
    %c2_i32 = arith.constant 2 : i32
    %c2_i32_6 = arith.constant 2 : i32
    %c0_i32_7 = arith.constant 0 : i32
    %18 = tpu.memref_slice %arg3[%17, %c0_i32_7] : memref<32x128xf32, #tpu.memory_space<any>> -> memref<1x128xf32, #tpu.memory_space<any>>
    %19 = tpu.memref_squeeze %18 : memref<1x128xf32, #tpu.memory_space<any>> -> memref<128xf32, #tpu.memory_space<any>>
    %c0_i32_8 = arith.constant 0 : i32
    %20 = tpu.memref_slice %arg16[%c2_i32, %c0_i32_8] : memref<8x128xf32, #tpu.memory_space<vmem>> -> memref<1x128xf32, #tpu.memory_space<vmem>>
    %21 = tpu.memref_squeeze %20 : memref<1x128xf32, #tpu.memory_space<vmem>> -> memref<128xf32, #tpu.memory_space<vmem>>
    %22 = tpu.memref_slice %arg18[%c2_i32_6] : memref<8x!tpu.dma_semaphore, #tpu.memory_space<semaphore_mem>> -> memref<1x!tpu.dma_semaphore, #tpu.memory_space<semaphore_mem>>
    %23 = tpu.memref_squeeze %22 : memref<1x!tpu.dma_semaphore, #tpu.memory_space<semaphore_mem>> -> memref<!tpu.dma_semaphore, #tpu.memory_space<semaphore_mem>>
    tpu.enqueue_dma source(%19 : memref<128xf32, #tpu.memory_space<any>>) target(%21 : memref<128xf32, #tpu.memory_space<vmem>>) target_semaphore(%23 : memref<!tpu.dma_semaphore, #tpu.memory_space<semaphore_mem>>)
    %24 = arith.index_cast %arg0 : i32 to index
    %c3 = arith.constant 3 : index
    %25 = memref.load %arg1[%24, %c3] : memref<2x8xi32, #tpu.memory_space<smem>>
    %c3_i32 = arith.constant 3 : i32
    %c3_i32_9 = arith.constant 3 : i32
    %c0_i32_10 = arith.constant 0 : i32
    %26 = tpu.memref_slice %arg3[%25, %c0_i32_10] : memref<32x128xf32, #tpu.memory_space<any>> -> memref<1x128xf32, #tpu.memory_space<any>>
    %27 = tpu.memref_squeeze %26 : memref<1x128xf32, #tpu.memory_space<any>> -> memref<128xf32, #tpu.memory_space<any>>
    %c0_i32_11 = arith.constant 0 : i32
    %28 = tpu.memref_slice %arg16[%c3_i32, %c0_i32_11] : memref<8x128xf32, #tpu.memory_space<vmem>> -> memref<1x128xf32, #tpu.memory_space<vmem>>
    %29 = tpu.memref_squeeze %28 : memref<1x128xf32, #tpu.memory_space<vmem>> -> memref<128xf32, #tpu.memory_space<vmem>>
    %30 = tpu.memref_slice %arg18[%c3_i32_9] : memref<8x!tpu.dma_semaphore, #tpu.memory_space<semaphore_mem>> -> memref<1x!tpu.dma_semaphore, #tpu.memory_space<semaphore_mem>>
    %31 = tpu.memref_squeeze %30 : memref<1x!tpu.dma_semaphore, #tpu.memory_space<semaphore_mem>> -> memref<!tpu.dma_semaphore, #tpu.memory_space<semaphore_mem>>
    tpu.enqueue_dma source(%27 : memref<128xf32, #tpu.memory_space<any>>) target(%29 : memref<128xf32, #tpu.memory_space<vmem>>) target_semaphore(%31 : memref<!tpu.dma_semaphore, #tpu.memory_space<semaphore_mem>>)
    %32 = arith.index_cast %arg0 : i32 to index
    %c4 = arith.constant 4 : index
    %33 = memref.load %arg1[%32, %c4] : memref<2x8xi32, #tpu.memory_space<smem>>
    %c4_i32 = arith.constant 4 : i32
    %c4_i32_12 = arith.constant 4 : i32
    %c0_i32_13 = arith.constant 0 : i32
    %34 = tpu.memref_slice %arg3[%33, %c0_i32_13] : memref<32x128xf32, #tpu.memory_space<any>> -> memref<1x128xf32, #tpu.memory_space<any>>
    %35 = tpu.memref_squeeze %34 : memref<1x128xf32, #tpu.memory_space<any>> -> memref<128xf32, #tpu.memory_space<any>>
    %c0_i32_14 = arith.constant 0 : i32
    %36 = tpu.memref_slice %arg16[%c4_i32, %c0_i32_14] : memref<8x128xf32, #tpu.memory_space<vmem>> -> memref<1x128xf32, #tpu.memory_space<vmem>>
    %37 = tpu.memref_squeeze %36 : memref<1x128xf32, #tpu.memory_space<vmem>> -> memref<128xf32, #tpu.memory_space<vmem>>
    %38 = tpu.memref_slice %arg18[%c4_i32_12] : memref<8x!tpu.dma_semaphore, #tpu.memory_space<semaphore_mem>> -> memref<1x!tpu.dma_semaphore, #tpu.memory_space<semaphore_mem>>
    %39 = tpu.memref_squeeze %38 : memref<1x!tpu.dma_semaphore, #tpu.memory_space<semaphore_mem>> -> memref<!tpu.dma_semaphore, #tpu.memory_space<semaphore_mem>>
    tpu.enqueue_dma source(%35 : memref<128xf32, #tpu.memory_space<any>>) target(%37 : memref<128xf32, #tpu.memory_space<vmem>>) target_semaphore(%39 : memref<!tpu.dma_semaphore, #tpu.memory_space<semaphore_mem>>)
    %40 = arith.index_cast %arg0 : i32 to index
    %c5 = arith.constant 5 : index
    %41 = memref.load %arg1[%40, %c5] : memref<2x8xi32, #tpu.memory_space<smem>>
    %c5_i32 = arith.constant 5 : i32
    %c5_i32_15 = arith.constant 5 : i32
    %c0_i32_16 = arith.constant 0 : i32
    %42 = tpu.memref_slice %arg3[%41, %c0_i32_16] : memref<32x128xf32, #tpu.memory_space<any>> -> memref<1x128xf32, #tpu.memory_space<any>>
    %43 = tpu.memref_squeeze %42 : memref<1x128xf32, #tpu.memory_space<any>> -> memref<128xf32, #tpu.memory_space<any>>
    %c0_i32_17 = arith.constant 0 : i32
    %44 = tpu.memref_slice %arg16[%c5_i32, %c0_i32_17] : memref<8x128xf32, #tpu.memory_space<vmem>> -> memref<1x128xf32, #tpu.memory_space<vmem>>
    %45 = tpu.memref_squeeze %44 : memref<1x128xf32, #tpu.memory_space<vmem>> -> memref<128xf32, #tpu.memory_space<vmem>>
    %46 = tpu.memref_slice %arg18[%c5_i32_15] : memref<8x!tpu.dma_semaphore, #tpu.memory_space<semaphore_mem>> -> memref<1x!tpu.dma_semaphore, #tpu.memory_space<semaphore_mem>>
    %47 = tpu.memref_squeeze %46 : memref<1x!tpu.dma_semaphore, #tpu.memory_space<semaphore_mem>> -> memref<!tpu.dma_semaphore, #tpu.memory_space<semaphore_mem>>
    tpu.enqueue_dma source(%43 : memref<128xf32, #tpu.memory_space<any>>) target(%45 : memref<128xf32, #tpu.memory_space<vmem>>) target_semaphore(%47 : memref<!tpu.dma_semaphore, #tpu.memory_space<semaphore_mem>>)
    %48 = arith.index_cast %arg0 : i32 to index
    %c6 = arith.constant 6 : index
    %49 = memref.load %arg1[%48, %c6] : memref<2x8xi32, #tpu.memory_space<smem>>
    %c6_i32 = arith.constant 6 : i32
    %c6_i32_18 = arith.constant 6 : i32
    %c0_i32_19 = arith.constant 0 : i32
    %50 = tpu.memref_slice %arg3[%49, %c0_i32_19] : memref<32x128xf32, #tpu.memory_space<any>> -> memref<1x128xf32, #tpu.memory_space<any>>
    %51 = tpu.memref_squeeze %50 : memref<1x128xf32, #tpu.memory_space<any>> -> memref<128xf32, #tpu.memory_space<any>>
    %c0_i32_20 = arith.constant 0 : i32
    %52 = tpu.memref_slice %arg16[%c6_i32, %c0_i32_20] : memref<8x128xf32, #tpu.memory_space<vmem>> -> memref<1x128xf32, #tpu.memory_space<vmem>>
    %53 = tpu.memref_squeeze %52 : memref<1x128xf32, #tpu.memory_space<vmem>> -> memref<128xf32, #tpu.memory_space<vmem>>
    %54 = tpu.memref_slice %arg18[%c6_i32_18] : memref<8x!tpu.dma_semaphore, #tpu.memory_space<semaphore_mem>> -> memref<1x!tpu.dma_semaphore, #tpu.memory_space<semaphore_mem>>
    %55 = tpu.memref_squeeze %54 : memref<1x!tpu.dma_semaphore, #tpu.memory_space<semaphore_mem>> -> memref<!tpu.dma_semaphore, #tpu.memory_space<semaphore_mem>>
    tpu.enqueue_dma source(%51 : memref<128xf32, #tpu.memory_space<any>>) target(%53 : memref<128xf32, #tpu.memory_space<vmem>>) target_semaphore(%55 : memref<!tpu.dma_semaphore, #tpu.memory_space<semaphore_mem>>)
    %56 = arith.index_cast %arg0 : i32 to index
    %c7 = arith.constant 7 : index
    %57 = memref.load %arg1[%56, %c7] : memref<2x8xi32, #tpu.memory_space<smem>>
    %c7_i32 = arith.constant 7 : i32
    %c7_i32_21 = arith.constant 7 : i32
    %c0_i32_22 = arith.constant 0 : i32
    %58 = tpu.memref_slice %arg3[%57, %c0_i32_22] : memref<32x128xf32, #tpu.memory_space<any>> -> memref<1x128xf32, #tpu.memory_space<any>>
    %59 = tpu.memref_squeeze %58 : memref<1x128xf32, #tpu.memory_space<any>> -> memref<128xf32, #tpu.memory_space<any>>
    %c0_i32_23 = arith.constant 0 : i32
    %60 = tpu.memref_slice %arg16[%c7_i32, %c0_i32_23] : memref<8x128xf32, #tpu.memory_space<vmem>> -> memref<1x128xf32, #tpu.memory_space<vmem>>
    %61 = tpu.memref_squeeze %60 : memref<1x128xf32, #tpu.memory_space<vmem>> -> memref<128xf32, #tpu.memory_space<vmem>>
    %62 = tpu.memref_slice %arg18[%c7_i32_21] : memref<8x!tpu.dma_semaphore, #tpu.memory_space<semaphore_mem>> -> memref<1x!tpu.dma_semaphore, #tpu.memory_space<semaphore_mem>>
    %63 = tpu.memref_squeeze %62 : memref<1x!tpu.dma_semaphore, #tpu.memory_space<semaphore_mem>> -> memref<!tpu.dma_semaphore, #tpu.memory_space<semaphore_mem>>
    tpu.enqueue_dma source(%59 : memref<128xf32, #tpu.memory_space<any>>) target(%61 : memref<128xf32, #tpu.memory_space<vmem>>) target_semaphore(%63 : memref<!tpu.dma_semaphore, #tpu.memory_space<semaphore_mem>>)
    %c0_i32_24 = arith.constant 0 : i32
    %c0_i32_25 = arith.constant 0 : i32
    %c0_i32_26 = arith.constant 0 : i32
    %c0_i32_27 = arith.constant 0 : i32
    %64 = tpu.memref_slice %arg3[%c0_i32_24, %c0_i32_27] : memref<32x128xf32, #tpu.memory_space<any>> -> memref<1x128xf32, #tpu.memory_space<any>>
    %65 = tpu.memref_squeeze %64 : memref<1x128xf32, #tpu.memory_space<any>> -> memref<128xf32, #tpu.memory_space<any>>
    %c0_i32_28 = arith.constant 0 : i32
    %66 = tpu.memref_slice %arg16[%c0_i32_25, %c0_i32_28] : memref<8x128xf32, #tpu.memory_space<vmem>> -> memref<1x128xf32, #tpu.memory_space<vmem>>
    %67 = tpu.memref_squeeze %66 : memref<1x128xf32, #tpu.memory_space<vmem>> -> memref<128xf32, #tpu.memory_space<vmem>>
    %68 = tpu.memref_slice %arg18[%c0_i32_26] : memref<8x!tpu.dma_semaphore, #tpu.memory_space<semaphore_mem>> -> memref<1x!tpu.dma_semaphore, #tpu.memory_space<semaphore_mem>>
    %69 = tpu.memref_squeeze %68 : memref<1x!tpu.dma_semaphore, #tpu.memory_space<semaphore_mem>> -> memref<!tpu.dma_semaphore, #tpu.memory_space<semaphore_mem>>
    tpu.wait_dma2 semaphore(%69 : memref<!tpu.dma_semaphore, #tpu.memory_space<semaphore_mem>>) src(%65 : memref<128xf32, #tpu.memory_space<any>>) dst(%67 : memref<128xf32, #tpu.memory_space<vmem>>)
    %c0_i32_29 = arith.constant 0 : i32
    %c1_i32_30 = arith.constant 1 : i32
    %c1_i32_31 = arith.constant 1 : i32
    %c0_i32_32 = arith.constant 0 : i32
    %70 = tpu.memref_slice %arg3[%c0_i32_29, %c0_i32_32] : memref<32x128xf32, #tpu.memory_space<any>> -> memref<1x128xf32, #tpu.memory_space<any>>
    %71 = tpu.memref_squeeze %70 : memref<1x128xf32, #tpu.memory_space<any>> -> memref<128xf32, #tpu.memory_space<any>>
    %c0_i32_33 = arith.constant 0 : i32
    %72 = tpu.memref_slice %arg16[%c1_i32_30, %c0_i32_33] : memref<8x128xf32, #tpu.memory_space<vmem>> -> memref<1x128xf32, #tpu.memory_space<vmem>>
    %73 = tpu.memref_squeeze %72 : memref<1x128xf32, #tpu.memory_space<vmem>> -> memref<128xf32, #tpu.memory_space<vmem>>
    %74 = tpu.memref_slice %arg18[%c1_i32_31] : memref<8x!tpu.dma_semaphore, #tpu.memory_space<semaphore_mem>> -> memref<1x!tpu.dma_semaphore, #tpu.memory_space<semaphore_mem>>
    %75 = tpu.memref_squeeze %74 : memref<1x!tpu.dma_semaphore, #tpu.memory_space<semaphore_mem>> -> memref<!tpu.dma_semaphore, #tpu.memory_space<semaphore_mem>>
    tpu.wait_dma2 semaphore(%75 : memref<!tpu.dma_semaphore, #tpu.memory_space<semaphore_mem>>) src(%71 : memref<128xf32, #tpu.memory_space<any>>) dst(%73 : memref<128xf32, #tpu.memory_space<vmem>>)
    %c0_i32_34 = arith.constant 0 : i32
    %c2_i32_35 = arith.constant 2 : i32
    %c2_i32_36 = arith.constant 2 : i32
    %c0_i32_37 = arith.constant 0 : i32
    %76 = tpu.memref_slice %arg3[%c0_i32_34, %c0_i32_37] : memref<32x128xf32, #tpu.memory_space<any>> -> memref<1x128xf32, #tpu.memory_space<any>>
    %77 = tpu.memref_squeeze %76 : memref<1x128xf32, #tpu.memory_space<any>> -> memref<128xf32, #tpu.memory_space<any>>
    %c0_i32_38 = arith.constant 0 : i32
    %78 = tpu.memref_slice %arg16[%c2_i32_35, %c0_i32_38] : memref<8x128xf32, #tpu.memory_space<vmem>> -> memref<1x128xf32, #tpu.memory_space<vmem>>
    %79 = tpu.memref_squeeze %78 : memref<1x128xf32, #tpu.memory_space<vmem>> -> memref<128xf32, #tpu.memory_space<vmem>>
    %80 = tpu.memref_slice %arg18[%c2_i32_36] : memref<8x!tpu.dma_semaphore, #tpu.memory_space<semaphore_mem>> -> memref<1x!tpu.dma_semaphore, #tpu.memory_space<semaphore_mem>>
    %81 = tpu.memref_squeeze %80 : memref<1x!tpu.dma_semaphore, #tpu.memory_space<semaphore_mem>> -> memref<!tpu.dma_semaphore, #tpu.memory_space<semaphore_mem>>
    tpu.wait_dma2 semaphore(%81 : memref<!tpu.dma_semaphore, #tpu.memory_space<semaphore_mem>>) src(%77 : memref<128xf32, #tpu.memory_space<any>>) dst(%79 : memref<128xf32, #tpu.memory_space<vmem>>)
    %c0_i32_39 = arith.constant 0 : i32
    %c3_i32_40 = arith.constant 3 : i32
    %c3_i32_41 = arith.constant 3 : i32
    %c0_i32_42 = arith.constant 0 : i32
    %82 = tpu.memref_slice %arg3[%c0_i32_39, %c0_i32_42] : memref<32x128xf32, #tpu.memory_space<any>> -> memref<1x128xf32, #tpu.memory_space<any>>
    %83 = tpu.memref_squeeze %82 : memref<1x128xf32, #tpu.memory_space<any>> -> memref<128xf32, #tpu.memory_space<any>>
    %c0_i32_43 = arith.constant 0 : i32
    %84 = tpu.memref_slice %arg16[%c3_i32_40, %c0_i32_43] : memref<8x128xf32, #tpu.memory_space<vmem>> -> memref<1x128xf32, #tpu.memory_space<vmem>>
    %85 = tpu.memref_squeeze %84 : memref<1x128xf32, #tpu.memory_space<vmem>> -> memref<128xf32, #tpu.memory_space<vmem>>
    %86 = tpu.memref_slice %arg18[%c3_i32_41] : memref<8x!tpu.dma_semaphore, #tpu.memory_space<semaphore_mem>> -> memref<1x!tpu.dma_semaphore, #tpu.memory_space<semaphore_mem>>
    %87 = tpu.memref_squeeze %86 : memref<1x!tpu.dma_semaphore, #tpu.memory_space<semaphore_mem>> -> memref<!tpu.dma_semaphore, #tpu.memory_space<semaphore_mem>>
    tpu.wait_dma2 semaphore(%87 : memref<!tpu.dma_semaphore, #tpu.memory_space<semaphore_mem>>) src(%83 : memref<128xf32, #tpu.memory_space<any>>) dst(%85 : memref<128xf32, #tpu.memory_space<vmem>>)
    %c0_i32_44 = arith.constant 0 : i32
    %c4_i32_45 = arith.constant 4 : i32
    %c4_i32_46 = arith.constant 4 : i32
    %c0_i32_47 = arith.constant 0 : i32
    %88 = tpu.memref_slice %arg3[%c0_i32_44, %c0_i32_47] : memref<32x128xf32, #tpu.memory_space<any>> -> memref<1x128xf32, #tpu.memory_space<any>>
    %89 = tpu.memref_squeeze %88 : memref<1x128xf32, #tpu.memory_space<any>> -> memref<128xf32, #tpu.memory_space<any>>
    %c0_i32_48 = arith.constant 0 : i32
    %90 = tpu.memref_slice %arg16[%c4_i32_45, %c0_i32_48] : memref<8x128xf32, #tpu.memory_space<vmem>> -> memref<1x128xf32, #tpu.memory_space<vmem>>
    %91 = tpu.memref_squeeze %90 : memref<1x128xf32, #tpu.memory_space<vmem>> -> memref<128xf32, #tpu.memory_space<vmem>>
    %92 = tpu.memref_slice %arg18[%c4_i32_46] : memref<8x!tpu.dma_semaphore, #tpu.memory_space<semaphore_mem>> -> memref<1x!tpu.dma_semaphore, #tpu.memory_space<semaphore_mem>>
    %93 = tpu.memref_squeeze %92 : memref<1x!tpu.dma_semaphore, #tpu.memory_space<semaphore_mem>> -> memref<!tpu.dma_semaphore, #tpu.memory_space<semaphore_mem>>
    tpu.wait_dma2 semaphore(%93 : memref<!tpu.dma_semaphore, #tpu.memory_space<semaphore_mem>>) src(%89 : memref<128xf32, #tpu.memory_space<any>>) dst(%91 : memref<128xf32, #tpu.memory_space<vmem>>)
    %c0_i32_49 = arith.constant 0 : i32
    %c5_i32_50 = arith.constant 5 : i32
    %c5_i32_51 = arith.constant 5 : i32
    %c0_i32_52 = arith.constant 0 : i32
    %94 = tpu.memref_slice %arg3[%c0_i32_49, %c0_i32_52] : memref<32x128xf32, #tpu.memory_space<any>> -> memref<1x128xf32, #tpu.memory_space<any>>
    %95 = tpu.memref_squeeze %94 : memref<1x128xf32, #tpu.memory_space<any>> -> memref<128xf32, #tpu.memory_space<any>>
    %c0_i32_53 = arith.constant 0 : i32
    %96 = tpu.memref_slice %arg16[%c5_i32_50, %c0_i32_53] : memref<8x128xf32, #tpu.memory_space<vmem>> -> memref<1x128xf32, #tpu.memory_space<vmem>>
    %97 = tpu.memref_squeeze %96 : memref<1x128xf32, #tpu.memory_space<vmem>> -> memref<128xf32, #tpu.memory_space<vmem>>
    %98 = tpu.memref_slice %arg18[%c5_i32_51] : memref<8x!tpu.dma_semaphore, #tpu.memory_space<semaphore_mem>> -> memref<1x!tpu.dma_semaphore, #tpu.memory_space<semaphore_mem>>
    %99 = tpu.memref_squeeze %98 : memref<1x!tpu.dma_semaphore, #tpu.memory_space<semaphore_mem>> -> memref<!tpu.dma_semaphore, #tpu.memory_space<semaphore_mem>>
    tpu.wait_dma2 semaphore(%99 : memref<!tpu.dma_semaphore, #tpu.memory_space<semaphore_mem>>) src(%95 : memref<128xf32, #tpu.memory_space<any>>) dst(%97 : memref<128xf32, #tpu.memory_space<vmem>>)
    %c0_i32_54 = arith.constant 0 : i32
    %c6_i32_55 = arith.constant 6 : i32
    %c6_i32_56 = arith.constant 6 : i32
    %c0_i32_57 = arith.constant 0 : i32
    %100 = tpu.memref_slice %arg3[%c0_i32_54, %c0_i32_57] : memref<32x128xf32, #tpu.memory_space<any>> -> memref<1x128xf32, #tpu.memory_space<any>>
    %101 = tpu.memref_squeeze %100 : memref<1x128xf32, #tpu.memory_space<any>> -> memref<128xf32, #tpu.memory_space<any>>
    %c0_i32_58 = arith.constant 0 : i32
    %102 = tpu.memref_slice %arg16[%c6_i32_55, %c0_i32_58] : memref<8x128xf32, #tpu.memory_space<vmem>> -> memref<1x128xf32, #tpu.memory_space<vmem>>
    %103 = tpu.memref_squeeze %102 : memref<1x128xf32, #tpu.memory_space<vmem>> -> memref<128xf32, #tpu.memory_space<vmem>>
    %104 = tpu.memref_slice %arg18[%c6_i32_56] : memref<8x!tpu.dma_semaphore, #tpu.memory_space<semaphore_mem>> -> memref<1x!tpu.dma_semaphore, #tpu.memory_space<semaphore_mem>>
    %105 = tpu.memref_squeeze %104 : memref<1x!tpu.dma_semaphore, #tpu.memory_space<semaphore_mem>> -> memref<!tpu.dma_semaphore, #tpu.memory_space<semaphore_mem>>
    tpu.wait_dma2 semaphore(%105 : memref<!tpu.dma_semaphore, #tpu.memory_space<semaphore_mem>>) src(%101 : memref<128xf32, #tpu.memory_space<any>>) dst(%103 : memref<128xf32, #tpu.memory_space<vmem>>)
    %c0_i32_59 = arith.constant 0 : i32
    %c7_i32_60 = arith.constant 7 : i32
    %c7_i32_61 = arith.constant 7 : i32
    %c0_i32_62 = arith.constant 0 : i32
    %106 = tpu.memref_slice %arg3[%c0_i32_59, %c0_i32_62] : memref<32x128xf32, #tpu.memory_space<any>> -> memref<1x128xf32, #tpu.memory_space<any>>
    %107 = tpu.memref_squeeze %106 : memref<1x128xf32, #tpu.memory_space<any>> -> memref<128xf32, #tpu.memory_space<any>>
    %c0_i32_63 = arith.constant 0 : i32
    %108 = tpu.memref_slice %arg16[%c7_i32_60, %c0_i32_63] : memref<8x128xf32, #tpu.memory_space<vmem>> -> memref<1x128xf32, #tpu.memory_space<vmem>>
    %109 = tpu.memref_squeeze %108 : memref<1x128xf32, #tpu.memory_space<vmem>> -> memref<128xf32, #tpu.memory_space<vmem>>
    %110 = tpu.memref_slice %arg18[%c7_i32_61] : memref<8x!tpu.dma_semaphore, #tpu.memory_space<semaphore_mem>> -> memref<1x!tpu.dma_semaphore, #tpu.memory_space<semaphore_mem>>
    %111 = tpu.memref_squeeze %110 : memref<1x!tpu.dma_semaphore, #tpu.memory_space<semaphore_mem>> -> memref<!tpu.dma_semaphore, #tpu.memory_space<semaphore_mem>>
    tpu.wait_dma2 semaphore(%111 : memref<!tpu.dma_semaphore, #tpu.memory_space<semaphore_mem>>) src(%107 : memref<128xf32, #tpu.memory_space<any>>) dst(%109 : memref<128xf32, #tpu.memory_space<vmem>>)
    %c0_64 = arith.constant 0 : index
    %c0_65 = arith.constant 0 : index
    %112 = vector.load %arg16[%c0_64, %c0_65] : memref<8x128xf32, #tpu.memory_space<vmem>>, vector<8x128xf32>
    %cst = arith.constant 11.3137083 : f32
    %113 = vector.broadcast %cst : f32 to vector<8x128xf32>
    %114 = arith.mulf %112, %113 : vector<8x128xf32>
    %c0_66 = arith.constant 0 : index
    %c0_67 = arith.constant 0 : index
    %115 = vector.load %arg4[%c0_66, %c0_67] : memref<8x128xf32, #tpu.memory_space<vmem>>, vector<8x128xf32>
    %116 = arith.addf %114, %115 : vector<8x128xf32>
    %117 = arith.index_cast %arg0 : i32 to index
    %118 = memref.load %arg2[%117] : memref<2xi32, #tpu.memory_space<smem>>
    %119 = tpu.iota {dimensions = array<i32: 1>} : vector<8x8xi32>
    %120 = vector.broadcast %118 : i32 to vector<8x8xi32>
    %121 = arith.cmpi slt, %119, %120 : vector<8x8xi32>
    %122 = arith.truncf %116 : vector<8x128xf32> to vector<8x128xbf16>
    %c0_68 = arith.constant 0 : index
    %c0_69 = arith.constant 0 : index
    %c0_70 = arith.constant 0 : index
    %123 = vector.load %arg5[%c0_68, %c0_69, %c0_70] : memref<2x128x384xbf16, #tpu.memory_space<vmem>>, vector<1x128x384xbf16>
    %124 = vector.shape_cast %123 : vector<1x128x384xbf16> to vector<128x384xbf16>
    %cst_71 = arith.constant dense<0.000000e+00> : vector<8x384xf32>
    %125 = tpu.matmul %122, %124, %cst_71 {dimension_numbers = #tpu.dot_dimension_numbers<[1], [0], [0], [1], [0, 0, 1, 1], [], []>} : vector<8x128xbf16>, vector<128x384xbf16>, vector<8x384xf32> -> vector<8x384xf32>
    %126 = vector.extract_strided_slice %125 {offsets = [0, 0], sizes = [8, 128], strides = [1, 1]} : vector<8x384xf32> to vector<8x128xf32>
    %cst_72 = arith.constant 0.176776692 : f32
    %127 = vector.broadcast %cst_72 : f32 to vector<8x128xf32>
    %128 = arith.mulf %126, %127 : vector<8x128xf32>
    %129 = vector.extract_strided_slice %125 {offsets = [0, 128], sizes = [8, 128], strides = [1, 1]} : vector<8x384xf32> to vector<8x128xf32>
    %130 = vector.extract_strided_slice %125 {offsets = [0, 256], sizes = [8, 128], strides = [1, 1]} : vector<8x384xf32> to vector<8x128xf32>
    %131 = vector.extract_strided_slice %128 {offsets = [0, 0], sizes = [8, 32], strides = [1, 1]} : vector<8x128xf32> to vector<8x32xf32>
    %132 = vector.extract_strided_slice %129 {offsets = [0, 0], sizes = [8, 32], strides = [1, 1]} : vector<8x128xf32> to vector<8x32xf32>
    %cst_73 = arith.constant dense<0.000000e+00> : vector<8x8xf32>
    %133 = tpu.matmul %131, %132, %cst_73 {dimension_numbers = #tpu.dot_dimension_numbers<[1], [1], [0], [0], [0, 0, 1, 0], [], []>} : vector<8x32xf32>, vector<8x32xf32>, vector<8x8xf32> -> vector<8x8xf32>
    %cst_74 = arith.constant -1.000000e+06 : f32
    %134 = vector.broadcast %cst_74 : f32 to vector<8x8xf32>
    %135 = arith.select %121, %133, %134 : vector<8x8xi1>, vector<8x8xf32>
    %cst_75 = arith.constant dense<0xFF800000> : vector<8xf32>
    %136 = vector.multi_reduction <maximumf>, %135, %cst_75 [1] : vector<8x8xf32> to vector<8xf32>
    %137 = vector.shape_cast %136 : vector<8xf32> to vector<8x1xf32>
    %138 = vector.broadcast %137 : vector<8x1xf32> to vector<8x8xf32>
    %139 = arith.subf %135, %138 : vector<8x8xf32>
    %140 = math.exp %139 : vector<8x8xf32>
    %cst_76 = arith.constant dense<0.000000e+00> : vector<8xf32>
    %141 = vector.multi_reduction <add>, %140, %cst_76 [1] : vector<8x8xf32> to vector<8xf32>
    %142 = vector.shape_cast %141 : vector<8xf32> to vector<8x1xf32>
    %143 = tpu.reciprocal %142 {approx = true} : vector<8x1xf32> -> vector<8x1xf32>
    %144 = vector.broadcast %143 : vector<8x1xf32> to vector<8x8xf32>
    %145 = arith.mulf %140, %144 : vector<8x8xf32>
    %146 = vector.extract_strided_slice %130 {offsets = [0, 0], sizes = [8, 32], strides = [1, 1]} : vector<8x128xf32> to vector<8x32xf32>
    %cst_77 = arith.constant dense<0.000000e+00> : vector<8x32xf32>
    %147 = tpu.matmul %145, %146, %cst_77 {dimension_numbers = #tpu.dot_dimension_numbers<[1], [0], [0], [1], [0, 0, 1, 1], [], []>} : vector<8x8xf32>, vector<8x32xf32>, vector<8x32xf32> -> vector<8x32xf32>
    %c0_78 = arith.constant 0 : index
    %c0_79 = arith.constant 0 : index
    %148 = vector.load %arg17[%c0_78, %c0_79] : memref<8x128xf32, #tpu.memory_space<vmem>>, vector<8x32xf32>
    tpu.vector_store %arg17[%c0_78, %c0_79], %147 {strides = array<i32>} : memref<8x128xf32, #tpu.memory_space<vmem>>, vector<8x32xf32>,
    %149 = vector.extract_strided_slice %128 {offsets = [0, 32], sizes = [8, 32], strides = [1, 1]} : vector<8x128xf32> to vector<8x32xf32>
    %150 = vector.extract_strided_slice %129 {offsets = [0, 32], sizes = [8, 32], strides = [1, 1]} : vector<8x128xf32> to vector<8x32xf32>
    %cst_80 = arith.constant dense<0.000000e+00> : vector<8x8xf32>
    %151 = tpu.matmul %149, %150, %cst_80 {dimension_numbers = #tpu.dot_dimension_numbers<[1], [1], [0], [0], [0, 0, 1, 0], [], []>} : vector<8x32xf32>, vector<8x32xf32>, vector<8x8xf32> -> vector<8x8xf32>
    %cst_81 = arith.constant -1.000000e+06 : f32
    %152 = vector.broadcast %cst_81 : f32 to vector<8x8xf32>
    %153 = arith.select %121, %151, %152 : vector<8x8xi1>, vector<8x8xf32>
    %cst_82 = arith.constant dense<0xFF800000> : vector<8xf32>
    %154 = vector.multi_reduction <maximumf>, %153, %cst_82 [1] : vector<8x8xf32> to vector<8xf32>
    %155 = vector.shape_cast %154 : vector<8xf32> to vector<8x1xf32>
    %156 = vector.broadcast %155 : vector<8x1xf32> to vector<8x8xf32>
    %157 = arith.subf %153, %156 : vector<8x8xf32>
    %158 = math.exp %157 : vector<8x8xf32>
    %cst_83 = arith.constant dense<0.000000e+00> : vector<8xf32>
    %159 = vector.multi_reduction <add>, %158, %cst_83 [1] : vector<8x8xf32> to vector<8xf32>
    %160 = vector.shape_cast %159 : vector<8xf32> to vector<8x1xf32>
    %161 = tpu.reciprocal %160 {approx = true} : vector<8x1xf32> -> vector<8x1xf32>
    %162 = vector.broadcast %161 : vector<8x1xf32> to vector<8x8xf32>
    %163 = arith.mulf %158, %162 : vector<8x8xf32>
    %164 = vector.extract_strided_slice %130 {offsets = [0, 32], sizes = [8, 32], strides = [1, 1]} : vector<8x128xf32> to vector<8x32xf32>
    %cst_84 = arith.constant dense<0.000000e+00> : vector<8x32xf32>
    %165 = tpu.matmul %163, %164, %cst_84 {dimension_numbers = #tpu.dot_dimension_numbers<[1], [0], [0], [1], [0, 0, 1, 1], [], []>} : vector<8x8xf32>, vector<8x32xf32>, vector<8x32xf32> -> vector<8x32xf32>
    %c0_85 = arith.constant 0 : index
    %c32 = arith.constant 32 : index
    %166 = vector.load %arg17[%c0_85, %c32] : memref<8x128xf32, #tpu.memory_space<vmem>>, vector<8x32xf32>
    tpu.vector_store %arg17[%c0_85, %c32], %165 {strides = array<i32>} : memref<8x128xf32, #tpu.memory_space<vmem>>, vector<8x32xf32>,
    %167 = vector.extract_strided_slice %128 {offsets = [0, 64], sizes = [8, 32], strides = [1, 1]} : vector<8x128xf32> to vector<8x32xf32>
    %168 = vector.extract_strided_slice %129 {offsets = [0, 64], sizes = [8, 32], strides = [1, 1]} : vector<8x128xf32> to vector<8x32xf32>
    %cst_86 = arith.constant dense<0.000000e+00> : vector<8x8xf32>
    %169 = tpu.matmul %167, %168, %cst_86 {dimension_numbers = #tpu.dot_dimension_numbers<[1], [1], [0], [0], [0, 0, 1, 0], [], []>} : vector<8x32xf32>, vector<8x32xf32>, vector<8x8xf32> -> vector<8x8xf32>
    %cst_87 = arith.constant -1.000000e+06 : f32
    %170 = vector.broadcast %cst_87 : f32 to vector<8x8xf32>
    %171 = arith.select %121, %169, %170 : vector<8x8xi1>, vector<8x8xf32>
    %cst_88 = arith.constant dense<0xFF800000> : vector<8xf32>
    %172 = vector.multi_reduction <maximumf>, %171, %cst_88 [1] : vector<8x8xf32> to vector<8xf32>
    %173 = vector.shape_cast %172 : vector<8xf32> to vector<8x1xf32>
    %174 = vector.broadcast %173 : vector<8x1xf32> to vector<8x8xf32>
    %175 = arith.subf %171, %174 : vector<8x8xf32>
    %176 = math.exp %175 : vector<8x8xf32>
    %cst_89 = arith.constant dense<0.000000e+00> : vector<8xf32>
    %177 = vector.multi_reduction <add>, %176, %cst_89 [1] : vector<8x8xf32> to vector<8xf32>
    %178 = vector.shape_cast %177 : vector<8xf32> to vector<8x1xf32>
    %179 = tpu.reciprocal %178 {approx = true} : vector<8x1xf32> -> vector<8x1xf32>
    %180 = vector.broadcast %179 : vector<8x1xf32> to vector<8x8xf32>
    %181 = arith.mulf %176, %180 : vector<8x8xf32>
    %182 = vector.extract_strided_slice %130 {offsets = [0, 64], sizes = [8, 32], strides = [1, 1]} : vector<8x128xf32> to vector<8x32xf32>
    %cst_90 = arith.constant dense<0.000000e+00> : vector<8x32xf32>
    %183 = tpu.matmul %181, %182, %cst_90 {dimension_numbers = #tpu.dot_dimension_numbers<[1], [0], [0], [1], [0, 0, 1, 1], [], []>} : vector<8x8xf32>, vector<8x32xf32>, vector<8x32xf32> -> vector<8x32xf32>
    %c0_91 = arith.constant 0 : index
    %c64 = arith.constant 64 : index
    %184 = vector.load %arg17[%c0_91, %c64] : memref<8x128xf32, #tpu.memory_space<vmem>>, vector<8x32xf32>
    tpu.vector_store %arg17[%c0_91, %c64], %183 {strides = array<i32>} : memref<8x128xf32, #tpu.memory_space<vmem>>, vector<8x32xf32>,
    %185 = vector.extract_strided_slice %128 {offsets = [0, 96], sizes = [8, 32], strides = [1, 1]} : vector<8x128xf32> to vector<8x32xf32>
    %186 = vector.extract_strided_slice %129 {offsets = [0, 96], sizes = [8, 32], strides = [1, 1]} : vector<8x128xf32> to vector<8x32xf32>
    %cst_92 = arith.constant dense<0.000000e+00> : vector<8x8xf32>
    %187 = tpu.matmul %185, %186, %cst_92 {dimension_numbers = #tpu.dot_dimension_numbers<[1], [1], [0], [0], [0, 0, 1, 0], [], []>} : vector<8x32xf32>, vector<8x32xf32>, vector<8x8xf32> -> vector<8x8xf32>
    %cst_93 = arith.constant -1.000000e+06 : f32
    %188 = vector.broadcast %cst_93 : f32 to vector<8x8xf32>
    %189 = arith.select %121, %187, %188 : vector<8x8xi1>, vector<8x8xf32>
    %cst_94 = arith.constant dense<0xFF800000> : vector<8xf32>
    %190 = vector.multi_reduction <maximumf>, %189, %cst_94 [1] : vector<8x8xf32> to vector<8xf32>
    %191 = vector.shape_cast %190 : vector<8xf32> to vector<8x1xf32>
    %192 = vector.broadcast %191 : vector<8x1xf32> to vector<8x8xf32>
    %193 = arith.subf %189, %192 : vector<8x8xf32>
    %194 = math.exp %193 : vector<8x8xf32>
    %cst_95 = arith.constant dense<0.000000e+00> : vector<8xf32>
    %195 = vector.multi_reduction <add>, %194, %cst_95 [1] : vector<8x8xf32> to vector<8xf32>
    %196 = vector.shape_cast %195 : vector<8xf32> to vector<8x1xf32>
    %197 = tpu.reciprocal %196 {approx = true} : vector<8x1xf32> -> vector<8x1xf32>
    %198 = vector.broadcast %197 : vector<8x1xf32> to vector<8x8xf32>
    %199 = arith.mulf %194, %198 : vector<8x8xf32>
    %200 = vector.extract_strided_slice %130 {offsets = [0, 96], sizes = [8, 32], strides = [1, 1]} : vector<8x128xf32> to vector<8x32xf32>
    %cst_96 = arith.constant dense<0.000000e+00> : vector<8x32xf32>
    %201 = tpu.matmul %199, %200, %cst_96 {dimension_numbers = #tpu.dot_dimension_numbers<[1], [0], [0], [1], [0, 0, 1, 1], [], []>} : vector<8x8xf32>, vector<8x32xf32>, vector<8x32xf32> -> vector<8x32xf32>
    %c0_97 = arith.constant 0 : index
    %c96 = arith.constant 96 : index
    %202 = vector.load %arg17[%c0_97, %c96] : memref<8x128xf32, #tpu.memory_space<vmem>>, vector<8x32xf32>
    tpu.vector_store %arg17[%c0_97, %c96], %201 {strides = array<i32>} : memref<8x128xf32, #tpu.memory_space<vmem>>, vector<8x32xf32>,
    %c0_98 = arith.constant 0 : index
    %c0_99 = arith.constant 0 : index
    %203 = vector.load %arg17[%c0_98, %c0_99] : memref<8x128xf32, #tpu.memory_space<vmem>>, vector<8x128xf32>
    %204 = arith.truncf %203 : vector<8x128xf32> to vector<8x128xbf16>
    %c0_100 = arith.constant 0 : index
    %c0_101 = arith.constant 0 : index
    %c0_102 = arith.constant 0 : index
    %205 = vector.load %arg6[%c0_100, %c0_101, %c0_102] : memref<2x128x128xbf16, #tpu.memory_space<vmem>>, vector<1x128x128xbf16>
    %206 = vector.shape_cast %205 : vector<1x128x128xbf16> to vector<128x128xbf16>
    %cst_103 = arith.constant dense<0.000000e+00> : vector<8x128xf32>
    %207 = tpu.matmul %204, %206, %cst_103 {dimension_numbers = #tpu.dot_dimension_numbers<[1], [0], [0], [1], [0, 0, 1, 1], [], []>} : vector<8x128xbf16>, vector<128x128xbf16>, vector<8x128xf32> -> vector<8x128xf32>
    %208 = arith.addf %207, %116 : vector<8x128xf32>
    %c0_104 = arith.constant 0 : index
    %c0_105 = arith.constant 0 : index
    %c0_106 = arith.constant 0 : index
    %209 = vector.load %arg7[%c0_104, %c0_105, %c0_106] : memref<2x1x128xf32, #tpu.memory_space<vmem>>, vector<1x1x128xf32>
    %210 = vector.shape_cast %209 : vector<1x1x128xf32> to vector<1x128xf32>
    %c0_107 = arith.constant 0 : index
    %c0_108 = arith.constant 0 : index
    %c0_109 = arith.constant 0 : index
    %211 = vector.load %arg8[%c0_107, %c0_108, %c0_109] : memref<2x1x128xf32, #tpu.memory_space<vmem>>, vector<1x1x128xf32>
    %212 = vector.shape_cast %211 : vector<1x1x128xf32> to vector<1x128xf32>
    %cst_110 = arith.constant dense<0.000000e+00> : vector<8xf32>
    %213 = vector.multi_reduction <add>, %208, %cst_110 [1] : vector<8x128xf32> to vector<8xf32>
    %214 = vector.shape_cast %213 : vector<8xf32> to vector<8x1xf32>
    %cst_111 = arith.constant 1.280000e+02 : f32
    %215 = vector.broadcast %cst_111 : f32 to vector<8x1xf32>
    %216 = arith.divf %214, %215 : vector<8x1xf32>
    %217 = vector.broadcast %216 : vector<8x1xf32> to vector<8x128xf32>
    %218 = arith.subf %208, %217 : vector<8x128xf32>
    %219 = arith.mulf %218, %218 : vector<8x128xf32>
    %cst_112 = arith.constant dense<0.000000e+00> : vector<8xf32>
    %220 = vector.multi_reduction <add>, %219, %cst_112 [1] : vector<8x128xf32> to vector<8xf32>
    %221 = vector.shape_cast %220 : vector<8xf32> to vector<8x1xf32>
    %cst_113 = arith.constant 1.280000e+02 : f32
    %222 = vector.broadcast %cst_113 : f32 to vector<8x1xf32>
    %223 = arith.divf %221, %222 : vector<8x1xf32>
    %224 = vector.broadcast %216 : vector<8x1xf32> to vector<8x128xf32>
    %225 = arith.subf %208, %224 : vector<8x128xf32>
    %cst_114 = arith.constant 9.99999974E-6 : f32
    %226 = vector.broadcast %cst_114 : f32 to vector<8x1xf32>
    %227 = arith.addf %223, %226 : vector<8x1xf32>
    %228 = math.rsqrt %227 : vector<8x1xf32>
    %229 = vector.broadcast %228 : vector<8x1xf32> to vector<8x128xf32>
    %230 = arith.mulf %225, %229 : vector<8x128xf32>
    %231 = vector.broadcast %210 : vector<1x128xf32> to vector<8x128xf32>
    %232 = arith.mulf %230, %231 : vector<8x128xf32>
    %233 = vector.broadcast %212 : vector<1x128xf32> to vector<8x128xf32>
    %234 = arith.addf %232, %233 : vector<8x128xf32>
    %235 = arith.truncf %234 : vector<8x128xf32> to vector<8x128xbf16>
    %c0_115 = arith.constant 0 : index
    %c0_116 = arith.constant 0 : index
    %c0_117 = arith.constant 0 : index
    %236 = vector.load %arg9[%c0_115, %c0_116, %c0_117] : memref<2x128x256xbf16, #tpu.memory_space<vmem>>, vector<1x128x256xbf16>
    %237 = vector.shape_cast %236 : vector<1x128x256xbf16> to vector<128x256xbf16>
    %cst_118 = arith.constant dense<0.000000e+00> : vector<8x256xf32>
    %238 = tpu.matmul %235, %237, %cst_118 {dimension_numbers = #tpu.dot_dimension_numbers<[1], [0], [0], [1], [0, 0, 1, 1], [], []>} : vector<8x128xbf16>, vector<128x256xbf16>, vector<8x256xf32> -> vector<8x256xf32>
    %c0_119 = arith.constant 0 : index
    %c0_120 = arith.constant 0 : index
    %c0_121 = arith.constant 0 : index
    %239 = vector.load %arg10[%c0_119, %c0_120, %c0_121] : memref<2x1x256xf32, #tpu.memory_space<vmem>>, vector<1x1x256xf32>
    %240 = vector.shape_cast %239 : vector<1x1x256xf32> to vector<1x256xf32>
    %241 = vector.broadcast %240 : vector<1x256xf32> to vector<8x256xf32>
    %242 = arith.addf %238, %241 : vector<8x256xf32>
    %cst_122 = arith.constant 0.000000e+00 : f32
    %243 = vector.broadcast %cst_122 : f32 to vector<8x256xf32>
    %244 = arith.maximumf %242, %243 : vector<8x256xf32>
    %245 = arith.truncf %244 : vector<8x256xf32> to vector<8x256xbf16>
    %c0_123 = arith.constant 0 : index
    %c0_124 = arith.constant 0 : index
    %c0_125 = arith.constant 0 : index
    %246 = vector.load %arg11[%c0_123, %c0_124, %c0_125] : memref<2x256x128xbf16, #tpu.memory_space<vmem>>, vector<1x256x128xbf16>
    %247 = vector.shape_cast %246 : vector<1x256x128xbf16> to vector<256x128xbf16>
    %cst_126 = arith.constant dense<0.000000e+00> : vector<8x128xf32>
    %248 = tpu.matmul %245, %247, %cst_126 {dimension_numbers = #tpu.dot_dimension_numbers<[1], [0], [0], [1], [0, 0, 1, 1], [], []>} : vector<8x256xbf16>, vector<256x128xbf16>, vector<8x128xf32> -> vector<8x128xf32>
    %c0_127 = arith.constant 0 : index
    %c0_128 = arith.constant 0 : index
    %c0_129 = arith.constant 0 : index
    %249 = vector.load %arg12[%c0_127, %c0_128, %c0_129] : memref<2x1x128xf32, #tpu.memory_space<vmem>>, vector<1x1x128xf32>
    %250 = vector.shape_cast %249 : vector<1x1x128xf32> to vector<1x128xf32>
    %251 = vector.broadcast %250 : vector<1x128xf32> to vector<8x128xf32>
    %252 = arith.addf %248, %251 : vector<8x128xf32>
    %253 = arith.addf %252, %234 : vector<8x128xf32>
    %c0_130 = arith.constant 0 : index
    %c0_131 = arith.constant 0 : index
    %c0_132 = arith.constant 0 : index
    %254 = vector.load %arg13[%c0_130, %c0_131, %c0_132] : memref<2x1x128xf32, #tpu.memory_space<vmem>>, vector<1x1x128xf32>
    %255 = vector.shape_cast %254 : vector<1x1x128xf32> to vector<1x128xf32>
    %c0_133 = arith.constant 0 : index
    %c0_134 = arith.constant 0 : index
    %c0_135 = arith.constant 0 : index
    %256 = vector.load %arg14[%c0_133, %c0_134, %c0_135] : memref<2x1x128xf32, #tpu.memory_space<vmem>>, vector<1x1x128xf32>
    %257 = vector.shape_cast %256 : vector<1x1x128xf32> to vector<1x128xf32>
    %cst_136 = arith.constant dense<0.000000e+00> : vector<8xf32>
    %258 = vector.multi_reduction <add>, %253, %cst_136 [1] : vector<8x128xf32> to vector<8xf32>
    %259 = vector.shape_cast %258 : vector<8xf32> to vector<8x1xf32>
    %cst_137 = arith.constant 1.280000e+02 : f32
    %260 = vector.broadcast %cst_137 : f32 to vector<8x1xf32>
    %261 = arith.divf %259, %260 : vector<8x1xf32>
    %262 = vector.broadcast %261 : vector<8x1xf32> to vector<8x128xf32>
    %263 = arith.subf %253, %262 : vector<8x128xf32>
    %264 = arith.mulf %263, %263 : vector<8x128xf32>
    %cst_138 = arith.constant dense<0.000000e+00> : vector<8xf32>
    %265 = vector.multi_reduction <add>, %264, %cst_138 [1] : vector<8x128xf32> to vector<8xf32>
    %266 = vector.shape_cast %265 : vector<8xf32> to vector<8x1xf32>
    %cst_139 = arith.constant 1.280000e+02 : f32
    %267 = vector.broadcast %cst_139 : f32 to vector<8x1xf32>
    %268 = arith.divf %266, %267 : vector<8x1xf32>
    %269 = vector.broadcast %261 : vector<8x1xf32> to vector<8x128xf32>
    %270 = arith.subf %253, %269 : vector<8x128xf32>
    %cst_140 = arith.constant 9.99999974E-6 : f32
    %271 = vector.broadcast %cst_140 : f32 to vector<8x1xf32>
    %272 = arith.addf %268, %271 : vector<8x1xf32>
    %273 = math.rsqrt %272 : vector<8x1xf32>
    %274 = vector.broadcast %273 : vector<8x1xf32> to vector<8x128xf32>
    %275 = arith.mulf %270, %274 : vector<8x128xf32>
    %276 = vector.broadcast %255 : vector<1x128xf32> to vector<8x128xf32>
    %277 = arith.mulf %275, %276 : vector<8x128xf32>
    %278 = vector.broadcast %257 : vector<1x128xf32> to vector<8x128xf32>
    %279 = arith.addf %277, %278 : vector<8x128xf32>
    %280 = arith.truncf %279 : vector<8x128xf32> to vector<8x128xbf16>
    %c1_141 = arith.constant 1 : index
    %c0_142 = arith.constant 0 : index
    %c0_143 = arith.constant 0 : index
    %281 = vector.load %arg5[%c1_141, %c0_142, %c0_143] : memref<2x128x384xbf16, #tpu.memory_space<vmem>>, vector<1x128x384xbf16>
    %282 = vector.shape_cast %281 : vector<1x128x384xbf16> to vector<128x384xbf16>
    %cst_144 = arith.constant dense<0.000000e+00> : vector<8x384xf32>
    %283 = tpu.matmul %280, %282, %cst_144 {dimension_numbers = #tpu.dot_dimension_numbers<[1], [0], [0], [1], [0, 0, 1, 1], [], []>} : vector<8x128xbf16>, vector<128x384xbf16>, vector<8x384xf32> -> vector<8x384xf32>
    %284 = vector.extract_strided_slice %283 {offsets = [0, 0], sizes = [8, 128], strides = [1, 1]} : vector<8x384xf32> to vector<8x128xf32>
    %cst_145 = arith.constant 0.176776692 : f32
    %285 = vector.broadcast %cst_145 : f32 to vector<8x128xf32>
    %286 = arith.mulf %284, %285 : vector<8x128xf32>
    %287 = vector.extract_strided_slice %283 {offsets = [0, 128], sizes = [8, 128], strides = [1, 1]} : vector<8x384xf32> to vector<8x128xf32>
    %288 = vector.extract_strided_slice %283 {offsets = [0, 256], sizes = [8, 128], strides = [1, 1]} : vector<8x384xf32> to vector<8x128xf32>
    %289 = vector.extract_strided_slice %286 {offsets = [0, 0], sizes = [8, 32], strides = [1, 1]} : vector<8x128xf32> to vector<8x32xf32>
    %290 = vector.extract_strided_slice %287 {offsets = [0, 0], sizes = [8, 32], strides = [1, 1]} : vector<8x128xf32> to vector<8x32xf32>
    %cst_146 = arith.constant dense<0.000000e+00> : vector<8x8xf32>
    %291 = tpu.matmul %289, %290, %cst_146 {dimension_numbers = #tpu.dot_dimension_numbers<[1], [1], [0], [0], [0, 0, 1, 0], [], []>} : vector<8x32xf32>, vector<8x32xf32>, vector<8x8xf32> -> vector<8x8xf32>
    %cst_147 = arith.constant -1.000000e+06 : f32
    %292 = vector.broadcast %cst_147 : f32 to vector<8x8xf32>
    %293 = arith.select %121, %291, %292 : vector<8x8xi1>, vector<8x8xf32>
    %cst_148 = arith.constant dense<0xFF800000> : vector<8xf32>
    %294 = vector.multi_reduction <maximumf>, %293, %cst_148 [1] : vector<8x8xf32> to vector<8xf32>
    %295 = vector.shape_cast %294 : vector<8xf32> to vector<8x1xf32>
    %296 = vector.broadcast %295 : vector<8x1xf32> to vector<8x8xf32>
    %297 = arith.subf %293, %296 : vector<8x8xf32>
    %298 = math.exp %297 : vector<8x8xf32>
    %cst_149 = arith.constant dense<0.000000e+00> : vector<8xf32>
    %299 = vector.multi_reduction <add>, %298, %cst_149 [1] : vector<8x8xf32> to vector<8xf32>
    %300 = vector.shape_cast %299 : vector<8xf32> to vector<8x1xf32>
    %301 = tpu.reciprocal %300 {approx = true} : vector<8x1xf32> -> vector<8x1xf32>
    %302 = vector.broadcast %301 : vector<8x1xf32> to vector<8x8xf32>
    %303 = arith.mulf %298, %302 : vector<8x8xf32>
    %304 = vector.extract_strided_slice %288 {offsets = [0, 0], sizes = [8, 32], strides = [1, 1]} : vector<8x128xf32> to vector<8x32xf32>
    %cst_150 = arith.constant dense<0.000000e+00> : vector<8x32xf32>
    %305 = tpu.matmul %303, %304, %cst_150 {dimension_numbers = #tpu.dot_dimension_numbers<[1], [0], [0], [1], [0, 0, 1, 1], [], []>} : vector<8x8xf32>, vector<8x32xf32>, vector<8x32xf32> -> vector<8x32xf32>
    %c0_151 = arith.constant 0 : index
    %c0_152 = arith.constant 0 : index
    %306 = vector.load %arg17[%c0_151, %c0_152] : memref<8x128xf32, #tpu.memory_space<vmem>>, vector<8x32xf32>
    tpu.vector_store %arg17[%c0_151, %c0_152], %305 {strides = array<i32>} : memref<8x128xf32, #tpu.memory_space<vmem>>, vector<8x32xf32>,
    %307 = vector.extract_strided_slice %286 {offsets = [0, 32], sizes = [8, 32], strides = [1, 1]} : vector<8x128xf32> to vector<8x32xf32>
    %308 = vector.extract_strided_slice %287 {offsets = [0, 32], sizes = [8, 32], strides = [1, 1]} : vector<8x128xf32> to vector<8x32xf32>
    %cst_153 = arith.constant dense<0.000000e+00> : vector<8x8xf32>
    %309 = tpu.matmul %307, %308, %cst_153 {dimension_numbers = #tpu.dot_dimension_numbers<[1], [1], [0], [0], [0, 0, 1, 0], [], []>} : vector<8x32xf32>, vector<8x32xf32>, vector<8x8xf32> -> vector<8x8xf32>
    %cst_154 = arith.constant -1.000000e+06 : f32
    %310 = vector.broadcast %cst_154 : f32 to vector<8x8xf32>
    %311 = arith.select %121, %309, %310 : vector<8x8xi1>, vector<8x8xf32>
    %cst_155 = arith.constant dense<0xFF800000> : vector<8xf32>
    %312 = vector.multi_reduction <maximumf>, %311, %cst_155 [1] : vector<8x8xf32> to vector<8xf32>
    %313 = vector.shape_cast %312 : vector<8xf32> to vector<8x1xf32>
    %314 = vector.broadcast %313 : vector<8x1xf32> to vector<8x8xf32>
    %315 = arith.subf %311, %314 : vector<8x8xf32>
    %316 = math.exp %315 : vector<8x8xf32>
    %cst_156 = arith.constant dense<0.000000e+00> : vector<8xf32>
    %317 = vector.multi_reduction <add>, %316, %cst_156 [1] : vector<8x8xf32> to vector<8xf32>
    %318 = vector.shape_cast %317 : vector<8xf32> to vector<8x1xf32>
    %319 = tpu.reciprocal %318 {approx = true} : vector<8x1xf32> -> vector<8x1xf32>
    %320 = vector.broadcast %319 : vector<8x1xf32> to vector<8x8xf32>
    %321 = arith.mulf %316, %320 : vector<8x8xf32>
    %322 = vector.extract_strided_slice %288 {offsets = [0, 32], sizes = [8, 32], strides = [1, 1]} : vector<8x128xf32> to vector<8x32xf32>
    %cst_157 = arith.constant dense<0.000000e+00> : vector<8x32xf32>
    %323 = tpu.matmul %321, %322, %cst_157 {dimension_numbers = #tpu.dot_dimension_numbers<[1], [0], [0], [1], [0, 0, 1, 1], [], []>} : vector<8x8xf32>, vector<8x32xf32>, vector<8x32xf32> -> vector<8x32xf32>
    %c0_158 = arith.constant 0 : index
    %c32_159 = arith.constant 32 : index
    %324 = vector.load %arg17[%c0_158, %c32_159] : memref<8x128xf32, #tpu.memory_space<vmem>>, vector<8x32xf32>
    tpu.vector_store %arg17[%c0_158, %c32_159], %323 {strides = array<i32>} : memref<8x128xf32, #tpu.memory_space<vmem>>, vector<8x32xf32>,
    %325 = vector.extract_strided_slice %286 {offsets = [0, 64], sizes = [8, 32], strides = [1, 1]} : vector<8x128xf32> to vector<8x32xf32>
    %326 = vector.extract_strided_slice %287 {offsets = [0, 64], sizes = [8, 32], strides = [1, 1]} : vector<8x128xf32> to vector<8x32xf32>
    %cst_160 = arith.constant dense<0.000000e+00> : vector<8x8xf32>
    %327 = tpu.matmul %325, %326, %cst_160 {dimension_numbers = #tpu.dot_dimension_numbers<[1], [1], [0], [0], [0, 0, 1, 0], [], []>} : vector<8x32xf32>, vector<8x32xf32>, vector<8x8xf32> -> vector<8x8xf32>
    %cst_161 = arith.constant -1.000000e+06 : f32
    %328 = vector.broadcast %cst_161 : f32 to vector<8x8xf32>
    %329 = arith.select %121, %327, %328 : vector<8x8xi1>, vector<8x8xf32>
    %cst_162 = arith.constant dense<0xFF800000> : vector<8xf32>
    %330 = vector.multi_reduction <maximumf>, %329, %cst_162 [1] : vector<8x8xf32> to vector<8xf32>
    %331 = vector.shape_cast %330 : vector<8xf32> to vector<8x1xf32>
    %332 = vector.broadcast %331 : vector<8x1xf32> to vector<8x8xf32>
    %333 = arith.subf %329, %332 : vector<8x8xf32>
    %334 = math.exp %333 : vector<8x8xf32>
    %cst_163 = arith.constant dense<0.000000e+00> : vector<8xf32>
    %335 = vector.multi_reduction <add>, %334, %cst_163 [1] : vector<8x8xf32> to vector<8xf32>
    %336 = vector.shape_cast %335 : vector<8xf32> to vector<8x1xf32>
    %337 = tpu.reciprocal %336 {approx = true} : vector<8x1xf32> -> vector<8x1xf32>
    %338 = vector.broadcast %337 : vector<8x1xf32> to vector<8x8xf32>
    %339 = arith.mulf %334, %338 : vector<8x8xf32>
    %340 = vector.extract_strided_slice %288 {offsets = [0, 64], sizes = [8, 32], strides = [1, 1]} : vector<8x128xf32> to vector<8x32xf32>
    %cst_164 = arith.constant dense<0.000000e+00> : vector<8x32xf32>
    %341 = tpu.matmul %339, %340, %cst_164 {dimension_numbers = #tpu.dot_dimension_numbers<[1], [0], [0], [1], [0, 0, 1, 1], [], []>} : vector<8x8xf32>, vector<8x32xf32>, vector<8x32xf32> -> vector<8x32xf32>
    %c0_165 = arith.constant 0 : index
    %c64_166 = arith.constant 64 : index
    %342 = vector.load %arg17[%c0_165, %c64_166] : memref<8x128xf32, #tpu.memory_space<vmem>>, vector<8x32xf32>
    tpu.vector_store %arg17[%c0_165, %c64_166], %341 {strides = array<i32>} : memref<8x128xf32, #tpu.memory_space<vmem>>, vector<8x32xf32>,
    %343 = vector.extract_strided_slice %286 {offsets = [0, 96], sizes = [8, 32], strides = [1, 1]} : vector<8x128xf32> to vector<8x32xf32>
    %344 = vector.extract_strided_slice %287 {offsets = [0, 96], sizes = [8, 32], strides = [1, 1]} : vector<8x128xf32> to vector<8x32xf32>
    %cst_167 = arith.constant dense<0.000000e+00> : vector<8x8xf32>
    %345 = tpu.matmul %343, %344, %cst_167 {dimension_numbers = #tpu.dot_dimension_numbers<[1], [1], [0], [0], [0, 0, 1, 0], [], []>} : vector<8x32xf32>, vector<8x32xf32>, vector<8x8xf32> -> vector<8x8xf32>
    %cst_168 = arith.constant -1.000000e+06 : f32
    %346 = vector.broadcast %cst_168 : f32 to vector<8x8xf32>
    %347 = arith.select %121, %345, %346 : vector<8x8xi1>, vector<8x8xf32>
    %cst_169 = arith.constant dense<0xFF800000> : vector<8xf32>
    %348 = vector.multi_reduction <maximumf>, %347, %cst_169 [1] : vector<8x8xf32> to vector<8xf32>
    %349 = vector.shape_cast %348 : vector<8xf32> to vector<8x1xf32>
    %350 = vector.broadcast %349 : vector<8x1xf32> to vector<8x8xf32>
    %351 = arith.subf %347, %350 : vector<8x8xf32>
    %352 = math.exp %351 : vector<8x8xf32>
    %cst_170 = arith.constant dense<0.000000e+00> : vector<8xf32>
    %353 = vector.multi_reduction <add>, %352, %cst_170 [1] : vector<8x8xf32> to vector<8xf32>
    %354 = vector.shape_cast %353 : vector<8xf32> to vector<8x1xf32>
    %355 = tpu.reciprocal %354 {approx = true} : vector<8x1xf32> -> vector<8x1xf32>
    %356 = vector.broadcast %355 : vector<8x1xf32> to vector<8x8xf32>
    %357 = arith.mulf %352, %356 : vector<8x8xf32>
    %358 = vector.extract_strided_slice %288 {offsets = [0, 96], sizes = [8, 32], strides = [1, 1]} : vector<8x128xf32> to vector<8x32xf32>
    %cst_171 = arith.constant dense<0.000000e+00> : vector<8x32xf32>
    %359 = tpu.matmul %357, %358, %cst_171 {dimension_numbers = #tpu.dot_dimension_numbers<[1], [0], [0], [1], [0, 0, 1, 1], [], []>} : vector<8x8xf32>, vector<8x32xf32>, vector<8x32xf32> -> vector<8x32xf32>
    %c0_172 = arith.constant 0 : index
    %c96_173 = arith.constant 96 : index
    %360 = vector.load %arg17[%c0_172, %c96_173] : memref<8x128xf32, #tpu.memory_space<vmem>>, vector<8x32xf32>
    tpu.vector_store %arg17[%c0_172, %c96_173], %359 {strides = array<i32>} : memref<8x128xf32, #tpu.memory_space<vmem>>, vector<8x32xf32>,
    %c0_174 = arith.constant 0 : index
    %c0_175 = arith.constant 0 : index
    %361 = vector.load %arg17[%c0_174, %c0_175] : memref<8x128xf32, #tpu.memory_space<vmem>>, vector<8x128xf32>
    %362 = arith.truncf %361 : vector<8x128xf32> to vector<8x128xbf16>
    %c1_176 = arith.constant 1 : index
    %c0_177 = arith.constant 0 : index
    %c0_178 = arith.constant 0 : index
    %363 = vector.load %arg6[%c1_176, %c0_177, %c0_178] : memref<2x128x128xbf16, #tpu.memory_space<vmem>>, vector<1x128x128xbf16>
    %364 = vector.shape_cast %363 : vector<1x128x128xbf16> to vector<128x128xbf16>
    %cst_179 = arith.constant dense<0.000000e+00> : vector<8x128xf32>
    %365 = tpu.matmul %362, %364, %cst_179 {dimension_numbers = #tpu.dot_dimension_numbers<[1], [0], [0], [1], [0, 0, 1, 1], [], []>} : vector<8x128xbf16>, vector<128x128xbf16>, vector<8x128xf32> -> vector<8x128xf32>
    %366 = arith.addf %365, %279 : vector<8x128xf32>
    %c1_180 = arith.constant 1 : index
    %c0_181 = arith.constant 0 : index
    %c0_182 = arith.constant 0 : index
    %367 = vector.load %arg7[%c1_180, %c0_181, %c0_182] : memref<2x1x128xf32, #tpu.memory_space<vmem>>, vector<1x1x128xf32>
    %368 = vector.shape_cast %367 : vector<1x1x128xf32> to vector<1x128xf32>
    %c1_183 = arith.constant 1 : index
    %c0_184 = arith.constant 0 : index
    %c0_185 = arith.constant 0 : index
    %369 = vector.load %arg8[%c1_183, %c0_184, %c0_185] : memref<2x1x128xf32, #tpu.memory_space<vmem>>, vector<1x1x128xf32>
    %370 = vector.shape_cast %369 : vector<1x1x128xf32> to vector<1x128xf32>
    %cst_186 = arith.constant dense<0.000000e+00> : vector<8xf32>
    %371 = vector.multi_reduction <add>, %366, %cst_186 [1] : vector<8x128xf32> to vector<8xf32>
    %372 = vector.shape_cast %371 : vector<8xf32> to vector<8x1xf32>
    %cst_187 = arith.constant 1.280000e+02 : f32
    %373 = vector.broadcast %cst_187 : f32 to vector<8x1xf32>
    %374 = arith.divf %372, %373 : vector<8x1xf32>
    %375 = vector.broadcast %374 : vector<8x1xf32> to vector<8x128xf32>
    %376 = arith.subf %366, %375 : vector<8x128xf32>
    %377 = arith.mulf %376, %376 : vector<8x128xf32>
    %cst_188 = arith.constant dense<0.000000e+00> : vector<8xf32>
    %378 = vector.multi_reduction <add>, %377, %cst_188 [1] : vector<8x128xf32> to vector<8xf32>
    %379 = vector.shape_cast %378 : vector<8xf32> to vector<8x1xf32>
    %cst_189 = arith.constant 1.280000e+02 : f32
    %380 = vector.broadcast %cst_189 : f32 to vector<8x1xf32>
    %381 = arith.divf %379, %380 : vector<8x1xf32>
    %382 = vector.broadcast %374 : vector<8x1xf32> to vector<8x128xf32>
    %383 = arith.subf %366, %382 : vector<8x128xf32>
    %cst_190 = arith.constant 9.99999974E-6 : f32
    %384 = vector.broadcast %cst_190 : f32 to vector<8x1xf32>
    %385 = arith.addf %381, %384 : vector<8x1xf32>
    %386 = math.rsqrt %385 : vector<8x1xf32>
    %387 = vector.broadcast %386 : vector<8x1xf32> to vector<8x128xf32>
    %388 = arith.mulf %383, %387 : vector<8x128xf32>
    %389 = vector.broadcast %368 : vector<1x128xf32> to vector<8x128xf32>
    %390 = arith.mulf %388, %389 : vector<8x128xf32>
    %391 = vector.broadcast %370 : vector<1x128xf32> to vector<8x128xf32>
    %392 = arith.addf %390, %391 : vector<8x128xf32>
    %393 = arith.truncf %392 : vector<8x128xf32> to vector<8x128xbf16>
    %c1_191 = arith.constant 1 : index
    %c0_192 = arith.constant 0 : index
    %c0_193 = arith.constant 0 : index
    %394 = vector.load %arg9[%c1_191, %c0_192, %c0_193] : memref<2x128x256xbf16, #tpu.memory_space<vmem>>, vector<1x128x256xbf16>
    %395 = vector.shape_cast %394 : vector<1x128x256xbf16> to vector<128x256xbf16>
    %cst_194 = arith.constant dense<0.000000e+00> : vector<8x256xf32>
    %396 = tpu.matmul %393, %395, %cst_194 {dimension_numbers = #tpu.dot_dimension_numbers<[1], [0], [0], [1], [0, 0, 1, 1], [], []>} : vector<8x128xbf16>, vector<128x256xbf16>, vector<8x256xf32> -> vector<8x256xf32>
    %c1_195 = arith.constant 1 : index
    %c0_196 = arith.constant 0 : index
    %c0_197 = arith.constant 0 : index
    %397 = vector.load %arg10[%c1_195, %c0_196, %c0_197] : memref<2x1x256xf32, #tpu.memory_space<vmem>>, vector<1x1x256xf32>
    %398 = vector.shape_cast %397 : vector<1x1x256xf32> to vector<1x256xf32>
    %399 = vector.broadcast %398 : vector<1x256xf32> to vector<8x256xf32>
    %400 = arith.addf %396, %399 : vector<8x256xf32>
    %cst_198 = arith.constant 0.000000e+00 : f32
    %401 = vector.broadcast %cst_198 : f32 to vector<8x256xf32>
    %402 = arith.maximumf %400, %401 : vector<8x256xf32>
    %403 = arith.truncf %402 : vector<8x256xf32> to vector<8x256xbf16>
    %c1_199 = arith.constant 1 : index
    %c0_200 = arith.constant 0 : index
    %c0_201 = arith.constant 0 : index
    %404 = vector.load %arg11[%c1_199, %c0_200, %c0_201] : memref<2x256x128xbf16, #tpu.memory_space<vmem>>, vector<1x256x128xbf16>
    %405 = vector.shape_cast %404 : vector<1x256x128xbf16> to vector<256x128xbf16>
    %cst_202 = arith.constant dense<0.000000e+00> : vector<8x128xf32>
    %406 = tpu.matmul %403, %405, %cst_202 {dimension_numbers = #tpu.dot_dimension_numbers<[1], [0], [0], [1], [0, 0, 1, 1], [], []>} : vector<8x256xbf16>, vector<256x128xbf16>, vector<8x128xf32> -> vector<8x128xf32>
    %c1_203 = arith.constant 1 : index
    %c0_204 = arith.constant 0 : index
    %c0_205 = arith.constant 0 : index
    %407 = vector.load %arg12[%c1_203, %c0_204, %c0_205] : memref<2x1x128xf32, #tpu.memory_space<vmem>>, vector<1x1x128xf32>
    %408 = vector.shape_cast %407 : vector<1x1x128xf32> to vector<1x128xf32>
    %409 = vector.broadcast %408 : vector<1x128xf32> to vector<8x128xf32>
    %410 = arith.addf %406, %409 : vector<8x128xf32>
    %411 = arith.addf %410, %392 : vector<8x128xf32>
    %c1_206 = arith.constant 1 : index
    %c0_207 = arith.constant 0 : index
    %c0_208 = arith.constant 0 : index
    %412 = vector.load %arg13[%c1_206, %c0_207, %c0_208] : memref<2x1x128xf32, #tpu.memory_space<vmem>>, vector<1x1x128xf32>
    %413 = vector.shape_cast %412 : vector<1x1x128xf32> to vector<1x128xf32>
    %c1_209 = arith.constant 1 : index
    %c0_210 = arith.constant 0 : index
    %c0_211 = arith.constant 0 : index
    %414 = vector.load %arg14[%c1_209, %c0_210, %c0_211] : memref<2x1x128xf32, #tpu.memory_space<vmem>>, vector<1x1x128xf32>
    %415 = vector.shape_cast %414 : vector<1x1x128xf32> to vector<1x128xf32>
    %cst_212 = arith.constant dense<0.000000e+00> : vector<8xf32>
    %416 = vector.multi_reduction <add>, %411, %cst_212 [1] : vector<8x128xf32> to vector<8xf32>
    %417 = vector.shape_cast %416 : vector<8xf32> to vector<8x1xf32>
    %cst_213 = arith.constant 1.280000e+02 : f32
    %418 = vector.broadcast %cst_213 : f32 to vector<8x1xf32>
    %419 = arith.divf %417, %418 : vector<8x1xf32>
    %420 = vector.broadcast %419 : vector<8x1xf32> to vector<8x128xf32>
    %421 = arith.subf %411, %420 : vector<8x128xf32>
    %422 = arith.mulf %421, %421 : vector<8x128xf32>
    %cst_214 = arith.constant dense<0.000000e+00> : vector<8xf32>
    %423 = vector.multi_reduction <add>, %422, %cst_214 [1] : vector<8x128xf32> to vector<8xf32>
    %424 = vector.shape_cast %423 : vector<8xf32> to vector<8x1xf32>
    %cst_215 = arith.constant 1.280000e+02 : f32
    %425 = vector.broadcast %cst_215 : f32 to vector<8x1xf32>
    %426 = arith.divf %424, %425 : vector<8x1xf32>
    %427 = vector.broadcast %419 : vector<8x1xf32> to vector<8x128xf32>
    %428 = arith.subf %411, %427 : vector<8x128xf32>
    %cst_216 = arith.constant 9.99999974E-6 : f32
    %429 = vector.broadcast %cst_216 : f32 to vector<8x1xf32>
    %430 = arith.addf %426, %429 : vector<8x1xf32>
    %431 = math.rsqrt %430 : vector<8x1xf32>
    %432 = vector.broadcast %431 : vector<8x1xf32> to vector<8x128xf32>
    %433 = arith.mulf %428, %432 : vector<8x128xf32>
    %434 = vector.broadcast %413 : vector<1x128xf32> to vector<8x128xf32>
    %435 = arith.mulf %433, %434 : vector<8x128xf32>
    %436 = vector.broadcast %415 : vector<1x128xf32> to vector<8x128xf32>
    %437 = arith.addf %435, %436 : vector<8x128xf32>
    %c0_217 = arith.constant 0 : index
    %c0_218 = arith.constant 0 : index
    %c0_219 = arith.constant 0 : index
    %438 = vector.load %arg15[%c0_217, %c0_218, %c0_219] : memref<1x8x128xf32, #tpu.memory_space<vmem>>, vector<1x8x128xf32>
    %439 = vector.shape_cast %438 : vector<1x8x128xf32> to vector<8x128xf32>
    %440 = vector.shape_cast %437 : vector<8x128xf32> to vector<1x8x128xf32>
    tpu.vector_store %arg15[%c0_217, %c0_218, %c0_219], %440 {strides = array<i32>} : memref<1x8x128xf32, #tpu.memory_space<vmem>>, vector<1x8x128xf32>,
    return
  }
  func.func @transform_1(%arg0: i32, %arg1: memref<2x8xi32, #tpu.memory_space<smem>>, %arg2: memref<2xi32, #tpu.memory_space<smem>>) -> (i32, i32) {
    %c0_i32 = arith.constant 0 : i32
    %c0_i32_0 = arith.constant 0 : i32
    %c0_i32_1 = arith.constant 0 : i32
    return %c0_i32, %c0_i32_0 : i32, i32
  }
  func.func @transform_2(%arg0: i32, %arg1: memref<2x8xi32, #tpu.memory_space<smem>>, %arg2: memref<2xi32, #tpu.memory_space<smem>>) -> (i32, i32, i32) {
    %c0_i32 = arith.constant 0 : i32
    %c0_i32_0 = arith.constant 0 : i32
    %c0_i32_1 = arith.constant 0 : i32
    %c0_i32_2 = arith.constant 0 : i32
    return %c0_i32, %c0_i32_0, %c0_i32_1 : i32, i32, i32
  }
  func.func @transform_3(%arg0: i32, %arg1: memref<2x8xi32, #tpu.memory_space<smem>>, %arg2: memref<2xi32, #tpu.memory_space<smem>>) -> (i32, i32, i32) {
    %c0_i32 = arith.constant 0 : i32
    %c0_i32_0 = arith.constant 0 : i32
    %c0_i32_1 = arith.constant 0 : i32
    %c0_i32_2 = arith.constant 0 : i32
    return %c0_i32, %c0_i32_0, %c0_i32_1 : i32, i32, i32
  }
  func.func @transform_4(%arg0: i32, %arg1: memref<2x8xi32, #tpu.memory_space<smem>>, %arg2: memref<2xi32, #tpu.memory_space<smem>>) -> (i32, i32, i32) {
    %c0_i32 = arith.constant 0 : i32
    %c0_i32_0 = arith.constant 0 : i32
    %c0_i32_1 = arith.constant 0 : i32
    %c0_i32_2 = arith.constant 0 : i32
    return %c0_i32, %c0_i32_0, %c0_i32_1 : i32, i32, i32
  }
  func.func @transform_5(%arg0: i32, %arg1: memref<2x8xi32, #tpu.memory_space<smem>>, %arg2: memref<2xi32, #tpu.memory_space<smem>>) -> (i32, i32, i32) {
    %c0_i32 = arith.constant 0 : i32
    %c0_i32_0 = arith.constant 0 : i32
    %c0_i32_1 = arith.constant 0 : i32
    %c0_i32_2 = arith.constant 0 : i32
    return %c0_i32, %c0_i32_0, %c0_i32_1 : i32, i32, i32
  }
  func.func @transform_6(%arg0: i32, %arg1: memref<2x8xi32, #tpu.memory_space<smem>>, %arg2: memref<2xi32, #tpu.memory_space<smem>>) -> (i32, i32, i32) {
    %c0_i32 = arith.constant 0 : i32
    %c0_i32_0 = arith.constant 0 : i32
    %c0_i32_1 = arith.constant 0 : i32
    %c0_i32_2 = arith.constant 0 : i32
    return %c0_i32, %c0_i32_0, %c0_i32_1 : i32, i32, i32
  }
  func.func @transform_7(%arg0: i32, %arg1: memref<2x8xi32, #tpu.memory_space<smem>>, %arg2: memref<2xi32, #tpu.memory_space<smem>>) -> (i32, i32, i32) {
    %c0_i32 = arith.constant 0 : i32
    %c0_i32_0 = arith.constant 0 : i32
    %c0_i32_1 = arith.constant 0 : i32
    %c0_i32_2 = arith.constant 0 : i32
    return %c0_i32, %c0_i32_0, %c0_i32_1 : i32, i32, i32
  }
  func.func @transform_8(%arg0: i32, %arg1: memref<2x8xi32, #tpu.memory_space<smem>>, %arg2: memref<2xi32, #tpu.memory_space<smem>>) -> (i32, i32, i32) {
    %c0_i32 = arith.constant 0 : i32
    %c0_i32_0 = arith.constant 0 : i32
    %c0_i32_1 = arith.constant 0 : i32
    %c0_i32_2 = arith.constant 0 : i32
    return %c0_i32, %c0_i32_0, %c0_i32_1 : i32, i32, i32
  }
  func.func @transform_9(%arg0: i32, %arg1: memref<2x8xi32, #tpu.memory_space<smem>>, %arg2: memref<2xi32, #tpu.memory_space<smem>>) -> (i32, i32, i32) {
    %c0_i32 = arith.constant 0 : i32
    %c0_i32_0 = arith.constant 0 : i32
    %c0_i32_1 = arith.constant 0 : i32
    %c0_i32_2 = arith.constant 0 : i32
    return %c0_i32, %c0_i32_0, %c0_i32_1 : i32, i32, i32
  }
  func.func @transform_10(%arg0: i32, %arg1: memref<2x8xi32, #tpu.memory_space<smem>>, %arg2: memref<2xi32, #tpu.memory_space<smem>>) -> (i32, i32, i32) {
    %c0_i32 = arith.constant 0 : i32
    %c0_i32_0 = arith.constant 0 : i32
    %c0_i32_1 = arith.constant 0 : i32
    %c0_i32_2 = arith.constant 0 : i32
    return %c0_i32, %c0_i32_0, %c0_i32_1 : i32, i32, i32
  }
  func.func @transform_11(%arg0: i32, %arg1: memref<2x8xi32, #tpu.memory_space<smem>>, %arg2: memref<2xi32, #tpu.memory_space<smem>>) -> (i32, i32, i32) {
    %c0_i32 = arith.constant 0 : i32
    %c0_i32_0 = arith.constant 0 : i32
    %c0_i32_1 = arith.constant 0 : i32
    %c0_i32_2 = arith.constant 0 : i32
    return %c0_i32, %c0_i32_0, %c0_i32_1 : i32, i32, i32
  }
  func.func @transform_12(%arg0: i32, %arg1: memref<2x8xi32, #tpu.memory_space<smem>>, %arg2: memref<2xi32, #tpu.memory_space<smem>>) -> (i32, i32, i32) {
    %c0_i32 = arith.constant 0 : i32
    %c0_i32_0 = arith.constant 0 : i32
    %c0_i32_1 = arith.constant 0 : i32
    return %arg0, %c0_i32, %c0_i32_0 : i32, i32, i32
  }
}

</mosaic_0001>

<bundles_post_ra>
// kernel: tpu_custom_call.1
= control target key start
LH: loop header
LB: loop body
LE: loop exit
PB: predicated region body
PF: predicated region fallthrough
CT: control target
= control target key end

     0   :  { %s4823_s29 = smov [#allocation6]   ;;  %s4824_s16 = smov [#allocation7]   ;;  %s5492_s0 = inlined_call_operand.hbm [shape: s32[2,8], index: 0, kind: input, shape index: {}]   ;;  %s5493_s2 = inlined_call_operand.hbm [shape: f32[32,128], index: 2, kind: input, shape index: {}]   ;;  %s5494_s3 = inlined_call_operand.hbm [shape: f32[8,128], index: 3, kind: input, shape index: {}]   ;;  %s5495_s4 = inlined_call_operand.hbm [shape: bf16[2,128,384], index: 4, kind: input, shape index: {}]   ;;  %s5496_s5 = inlined_call_operand.hbm [shape: bf16[2,128,128], index: 5, kind: input, shape index: {}]   ;;  %s5497_s6 = inlined_call_operand.vmem [shape: f32[2,1,128], index: 6, kind: input, shape index: {}]   ;;  %s5498_s7 = inlined_call_operand.vmem [shape: f32[2,1,128], index: 7, kind: input, shape index: {}]   ;;  %s5499_s8 = inlined_call_operand.hbm [shape: bf16[2,128,256], index: 8, kind: input, shape index: {}]   ;;  %s5500_s9 = inlined_call_operand.vmem [shape: f32[2,1,256], index: 9, kind: input, shape index: {}]   ;;  %s5501_s10 = inlined_call_operand.hbm [shape: bf16[2,256,128], index: 10, kind: input, shape index: {}]   ;;  %s5502_s11 = inlined_call_operand.vmem [shape: f32[2,1,128], index: 11, kind: input, shape index: {}]   ;;  %s5503_s12 = inlined_call_operand.vmem [shape: f32[2,1,128], index: 12, kind: input, shape index: {}]   ;;  %s5504_s13 = inlined_call_operand.vmem [shape: f32[2,1,128], index: 13, kind: input, shape index: {}]   ;;  %s5505_s14 = inlined_call_operand.hbm [shape: f32[2,8,128], index: 14, kind: output, shape index: {}]   ;;  %s5506_s1 = inlined_call_operand.hbm [shape: s32[2], index: 1, kind: input, shape index: {}]  }
   0x1   :  { %5518 = sst [smem:[#allocation55_spill]] %s5494_s3 }
   0x2   :  { %5519 = sst [smem:[#allocation56_spill]] %s5495_s4 }
   0x3   :  { %5520 = sst [smem:[#allocation57_spill]] %s5496_s5 }
   0x4   :  { %5521 = sst [smem:[#allocation58_spill]] %s5499_s8 }
   0x5   :  { %5522 = sst [smem:[#allocation59_spill]] %s5501_s10 }
   0x6   :  { %5523 = sst [smem:[#allocation60_spill]] %s5505_s14 }
   0x7   :  { %20 = dma.hbm_to_smem %s5492_s0, 32, %s4823_s29, [#allocation5] }
   0x8   :  { %22 = dma.hbm_to_smem %s5506_s1, 16, %s4824_s16, [#allocation5] }
   0x9   :  { %4773 = dma.done.wait [#allocation5], 48 }
   0xa   :  { %4774 = vsyncadd [#allocation5], 4294967248 }
   0xb   :  { %24 = sfence }
   0xc   :  { %25 = vsyncpa [#allocation9], 0 }
   0xd   :  { %26 = vsyncpa [#allocation12], 0 }
   0xe   :  { %27 = vsyncpa [#allocation15], 0 }
   0xf   :  { %28 = vsyncpa [#allocation10], 0 }
  0x10   :  { %30 = vsyncpa [#allocation10 + $0x1], 0  ;;  %s4932_s19 = smov 0   ;;  %s4934_s20 = smov 0  }
  0x11   :  { %s4936_s21 = smov 0   ;;  %s4938_s0 = smov 0  }
  0x12 LB: > { %5524 = sst [smem:[#allocation49_spill]] %s4809_s19  ;;  %s4953_s1 = sadd.s32 4294967295, %s4821_s0   ;;  %s4821_s0 = sphi %s4938_s0, %s5557_s0   ;;  %s4817_s21 = sphi %s4936_s21, %s5559_s21   ;;  %s4813_s20 = sphi %s4934_s20, %s5561_s20   ;;  %s4809_s19 = sphi %s4932_s19, %s5560_s19  }
  0x13   : > { %5525 = sst [smem:[#allocation50_spill]] %s4817_s21  ;;  %s3622_s22 = sadd.s32 4294967294, %s4821_s0  }
  0x14   : > { %5526 = sst [smem:[#allocation51_spill]] %s4821_s0  ;;  %s4957_s23 = sadd.s32 1, %s4821_s0  }
  0x15   : > { %5527 = sst [smem:[#allocation52_spill]] %s4957_s23  ;;  %s274_s24 = sadd.s32 1, %s4817_s21 }
  0x16   : > { %s271_s25 = ssub.s32 %s4821_s0, %s4957_s23  ;;  %p284_p0 = scmp.ne.s32.totalorder %s4817_s21, %s4813_s20 }
  0x17   : > { %p272_p1 = scmp.eq.s32.totalorder %s271_s25, 0  ;;  %p285_p2 = scmp.eq.s32.totalorder %s4953_s1, 1 }
  0x18   : > { %p290_p3 = scmp.ne.s32.totalorder %s4813_s20, %s4809_s19  ;;  %p291_p4 = scmp.eq.s32.totalorder %s3622_s22, 1 }
  0x19   : > { %s4968_s26 = scalar_select %p272_p1, %s4817_s21, %s274_s24  }
  0x1a   : > { %p4970_p5 = por %p285_p2, %p284_p0  ;;  %p4974_p6 = por %p291_p4, %p290_p3 }
  0x1b   : > { %5528 = sst [smem:[#allocation53_spill]] %s4968_s26  ;;  %p3623_p7 = scmp.ge.s32.totalorder %s4821_s0, 1 }
  0x1c   : > { %s5529_s27 = scalar_select %p4970_p5, 1, 0 }
  0x1d   : > { %s5530_s28 = scalar_select %p4974_p6, 1, 0 }
  0x1e   : > { %p298_p8 = scmp.lt.s32.totalorder %s4821_s0, 3  ;;  %p5508_p9 = scmp.eq.s32.totalorder %s4953_s1, 0 }
  0x1f   : > { %5531 = sst [smem:[#allocation54_spill]] %s5530_s28  ;;  %s4825_s30 = smov [#allocation11]  }
  0x20   : > { %p4981_p10 = pnand %p3623_p7, %p298_p8  ;;  %s321_s15 = sshll.u32 %s4825_s30, 4  ;;  %s322_s15 = int_to_ptr.vmem [resolvable:$true] %s321_s15 }
  0x21   : > { %s4826_s17 = smov [#allocation14]   ;;  %s4436_s24 = scalar_lea.vmem %s322_s15, 6144 }
  0x22   : > { %s5532_s29 = scalar_select %p4981_p10, 1, 0 }
  0x23   : > { %p4119_p11 = pneg %p4981_p10  ;;  %s353_s18 = sshll.u32 %s4826_s17, 4  ;;  %s354_s18 = int_to_ptr.vmem [resolvable:$true] %s353_s18 }
  0x24   : > { %p4437_p0 = scmp.ne.s32.totalorder %s322_s15, %s4436_s24  ;;  %p4444_p3 = scmp.lt.s32.totalorder %s322_s15, %s322_s15 }
  0x25   : > { %p4989_p12 = pnand %p5508_p9, %p4119_p11  ;;  %p4445_p4 = scmp.lt.s32.totalorder %s4436_s24, %s4436_s24 }
  0x27   : > { %p4995_p13 = pneg %p4989_p12  ;;  %p4446_p7 = por %p4445_p4, %p4444_p3 }
  0x29   : > { %p4439_p1 = pnand %p4437_p0, %p4995_p13 }
  0x2b   : > { %p4440_p2 = pneg %p4439_p1 }
  0x2d   : > { %p4447_p8 = pnand %p4446_p7, %p4440_p2 }
  0x2f   : > { %4450 = shalt.err (!%p4447_p8)
}
  0x30   : > { %s4827_s25 = smov 192   ;;  %s4828_s30 = smov 12  }
  0x31   : > { %s5535_s4 = sld [smem:[#allocation56_spill]]  ;;  %s4462_s21 = scalar_lea.vmem %s354_s18, 4096 }
  0x32   : > { %p4463_p11 = scmp.ne.s32.totalorder %s354_s18, %s4462_s21  ;;  %p4470_p1 = scmp.lt.s32.totalorder %s354_s18, %s354_s18 }
  0x33   : > { %p4471_p6 = scmp.lt.s32.totalorder %s4462_s21, %s4462_s21 }
  0x34   : > { %p4465_p9 = pnand %p4463_p11, %p4995_p13 }
  0x35   : > { %p4472_p5 = por %p4471_p6, %p4470_p1 }
  0x36   : > { %p4466_p0 = pneg %p4465_p9 }
  0x37   : > { %4125 = dma.hbm_to_vmem [thread:$0]  (!%p4989_p12), %s5535_s4, 6144, %s322_s15, [#allocation12], %s4827_s25, %s4827_s25, %s4828_s30  }
  0x38   : > { %p4473_p3 = pnand %p4472_p5, %p4466_p0 }
  0x3a   : > { %4476 = shalt.err (!%p4473_p3)
}
  0x3b   : > { %s4829_s24 = smov 128   ;;  %s4830_s23 = smov 8  }
  0x3c   : > { %s5536_s8 = sld [smem:[#allocation58_spill]]  ;;  %s4831_s26 = smov [#allocation8]  }
  0x3d   : > { %s311_s15 = sshll.u32 %s4831_s26, 4  ;;  %s4832_s25 = smov [#allocation13]   ;;  %s312_s15 = int_to_ptr.vmem [resolvable:$true] %s311_s15 }
  0x3e   : > { %s334_s30 = sshll.u32 %s4832_s25, 4  ;;  %s4488_s17 = scalar_lea.vmem %s312_s15, 128  ;;  %s335_s30 = int_to_ptr.vmem [resolvable:$true] %s334_s30 }
  0x3f   : > { %p4489_p9 = scmp.ne.s32.totalorder %s312_s15, %s4488_s17  ;;  %p4496_p2 = scmp.lt.s32.totalorder %s312_s15, %s312_s15 }
  0x40   : > { %p4497_p4 = scmp.lt.s32.totalorder %s4488_s17, %s4488_s17 }
  0x41   : > { %p4491_p5 = pnand %p4489_p9, %p4995_p13 }
  0x42   : > { %4131 = dma.hbm_to_vmem [thread:$0]  (!%p4989_p12), %s5536_s8, 4096, %s354_s18, [#allocation15], %s4829_s24, %s4829_s24, %s4830_s23  }
  0x43   : > { %p4492_p6 = pneg %p4491_p5  ;;  %p4498_p7 = por %p4497_p4, %p4496_p2 }
  0x45   : > { %p4499_p8 = pnand %p4498_p7, %p4492_p6 }
  0x47   : > { %4502 = shalt.err (!%p4499_p8)
}
  0x48   : > { %s5537_s3 = sld [smem:[#allocation55_spill]]  ;;  %s4514_s23 = scalar_lea.vmem %s335_s30, 2048 }
  0x49   : > { %p4515_p11 = scmp.ne.s32.totalorder %s335_s30, %s4514_s23  ;;  %p4522_p3 = scmp.lt.s32.totalorder %s335_s30, %s335_s30 }
  0x4a   : > { %p4523_p9 = scmp.lt.s32.totalorder %s4514_s23, %s4514_s23 }
  0x4b   : > { %p4517_p0 = pnand %p4515_p11, %p4995_p13 }
  0x4c   : > { %p4524_p5 = por %p4523_p9, %p4522_p3 }
  0x4d   : > { %p4518_p1 = pneg %p4517_p0 }
  0x4e   : > { %4122 = dma.hbm_to_vmem [thread:$0]  (!%p4989_p12), %s5537_s3, 128, %s312_s15, [#allocation9]  }
  0x4f   : > { %p4525_p10 = pnand %p4524_p5, %p4518_p1 }
  0x51   : > { %4528 = shalt.err (!%p4525_p10)
}
  0x52   : > { %s4833_s28 = smov 64   ;;  %s4834_s18 = smov 4  }
  0x53   : > { %s5538_s5 = sld [smem:[#allocation57_spill]]  ;;  %s4835_s15 = smov [#allocation16]  }
  0x54   : > { %s369_s25 = sshll.u32 %s4835_s15, 4  ;;  %s370_s25 = int_to_ptr.vmem [resolvable:$true] %s369_s25 }
  0x55   : > { %s4540_s17 = scalar_lea.vmem %s370_s25, 4096  ;;  %p4548_p7 = scmp.lt.s32.totalorder %s370_s25, %s370_s25 }
  0x56   : > { %p4541_p6 = scmp.ne.s32.totalorder %s370_s25, %s4540_s17  ;;  %p4549_p8 = scmp.lt.s32.totalorder %s4540_s17, %s4540_s17 }
  0x58   : > { %p4543_p2 = pnand %p4541_p6, %p4995_p13  ;;  %p4550_p10 = por %p4549_p8, %p4548_p7 }
  0x59   : > { %4128 = dma.hbm_to_vmem [thread:$0]  (!%p4989_p12), %s5538_s5, 2048, %s335_s30, [#allocation12], %s4833_s28, %s4833_s28, %s4834_s18  }
  0x5a   : > { %p4544_p4 = pneg %p4543_p2 }
  0x5c   : > { %p4551_p11 = pnand %p4550_p10, %p4544_p4 }
  0x5e   : > { %4554 = shalt.err (!%p4551_p11)
}
  0x5f   : > { %s5539_s10 = sld [smem:[#allocation59_spill]]  ;;  %p5540_p0 = scmp.ne.s32.totalorder %s5532_s29, 0 }
  0x60   : > { %p5541_p1 = scmp.eq.s32.totalorder (!%p5540_p0), %s4953_s1, 0 }
  0x61   : > { %394 = sbr.rel (%p5540_p0) target bundleno = 7361 (0x1cc1), region = 64 }
  0x65   : > { %4134 = dma.hbm_to_vmem [thread:$0]  (!%p4989_p12), %s5539_s10, 4096, %s370_s25, [#allocation15], %s4833_s28, %s4833_s28, %s4834_s18  }
  0x66   : > { %4776 = dma.done.wait (%p5541_p1), [#allocation9], 128   ;;  %p5542_p13 = pmov %p5541_p1 }
  0x67   : > { %p5543_p3 = pmov %p5541_p1 }
  0x68   : > { %4778 = vsyncadd (%p5542_p13), [#allocation9], 4294967168 }
  0x69   : > { %4780 = dma.done.wait (%p5543_p3), [#allocation12], 8192   ;;  %p5544_p9 = pmov %p5541_p1 }
  0x6a   : > { %p5545_p5 = pmov %p5541_p1 }
  0x6b   : > { %4782 = vsyncadd (%p5544_p9), [#allocation12], 4294959104 }
  0x6c   : > { %4784 = dma.done.wait (%p5545_p5), [#allocation15], 8192   ;;  %p5546_p12 = pmov %p5541_p1 }
  0x6d   : > { %s5515_s29 = sand.u32 1, %s4813_s20   ;;  %s5050_s16 = sshll.u32 %s4953_s1, 7 }
  0x6e   : > { %4786 = vsyncadd (%p5546_p12), [#allocation15], 4294959104  ;;  %s5054_s22 = sshll.u32 %s5515_s29, 3  ;;  %s447_s30 = sld [smem:[#allocation6 + %s5050_s16]] }
  0x6f   : > { %s4836_s23 = smov [#allocation2]   ;;  %s461_s18 = sadd.s32 1, %s5050_s16 }
  0x70   : > { %s457_s28 = sshll.u32 %s4836_s23, 4  ;;  %s5060_s24 = sld [smem:[#allocation6 + %s461_s18]]  ;;  %s5058_s28 = int_to_ptr.vmem [resolvable:$true] %s457_s28 }
  0x71   : > { %s478_s26 = sadd.s32 2, %s5050_s16  ;;  %s4837_s15 = smov [#allocation2 + $0x1]  }
  0x72   : > { %s474_s25 = sshll.u32 %s4837_s15, 4  ;;  %s5063_s17 = sld [smem:[#allocation6 + %s478_s26]]  ;;  %s5065_s25 = int_to_ptr.vmem [resolvable:$true] %s474_s25 }
  0x73   : > { %s5073_s8 = scalar_lea.hbm %s5493_s2, 512 }
  0x74   : > { %s3637_s19 = sshll.u32 %s447_s30, 4 }
  0x75   : > { %s449_s29 = scalar_lea.hbm %s5493_s2, %s3637_s19 }
  0x76   : > { %s4555_s4 = scalar_lea.hbm %s449_s29, 16  ;;  %p4558_p2 = scmp.lt.s32.totalorder %s449_s29, %s5493_s2 }
  0x77   : > { %p4556_p6 = scmp.ne.s32.totalorder %s449_s29, %s4555_s4  ;;  %p4559_p4 = scmp.lt.s32.totalorder %s5073_s8, %s4555_s4 }
  0x79   : > { %p4560_p7 = por %p4559_p4, %p4558_p2 }
  0x7b   : > { %p4561_p8 = pnand %p4560_p7, %p4556_p6 }
  0x7d   : > { %4564 = shalt.err (!%p4561_p8)  }
  0x7e   : > { %s4565_s3 = scalar_lea.vmem %s5058_s28, 16  ;;  %s5082_s30 = scalar_lea.vmem %s5058_s28, 128 }
  0x7f   : > { %p4566_p10 = scmp.ne.s32.totalorder %s5058_s28, %s4565_s3  ;;  %p4570_p11 = scmp.lt.s32.totalorder %s5058_s28, %s5058_s28 }
  0x80   : > { %p4571_p0 = scmp.lt.s32.totalorder %s5082_s30, %s4565_s3 }
  0x82   : > { %p4572_p1 = por %p4571_p0, %p4570_p11 }
  0x84   : > { %p4573_p13 = pnand %p4572_p1, %p4566_p10 }
  0x86   : > { %4576 = shalt.err (!%p4573_p13)  }
  0x87   : > { %460 = dma.hbm_to_vmem [thread:$0]  %s449_s29, 16, %s5058_s28, [#allocation4] }
  0x88   : > { %s3638_s4 = sshll.u32 %s5060_s24, 4  ;;  %s4838_s5 = smov [#allocation2 + $0x2]  }
  0x89   : > { %s491_s10 = sshll.u32 %s4838_s5, 4  ;;  %s464_s19 = scalar_lea.hbm %s5493_s2, %s3638_s4  ;;  %s5092_s10 = int_to_ptr.vmem [resolvable:$true] %s491_s10 }
  0x8a   : > { %s4577_s21 = scalar_lea.hbm %s464_s19, 16  ;;  %p4580_p9 = scmp.lt.s32.totalorder %s464_s19, %s5493_s2 }
  0x8b   : > { %p4578_p3 = scmp.ne.s32.totalorder %s464_s19, %s4577_s21  ;;  %p4581_p5 = scmp.lt.s32.totalorder %s5073_s8, %s4577_s21 }
  0x8d   : > { %p4582_p12 = por %p4581_p5, %p4580_p9 }
  0x8f   : > { %p4583_p6 = pnand %p4582_p12, %p4578_p3 }
  0x91   : > { %4586 = shalt.err (!%p4583_p6)  }
  0x92   : > { %s4587_s29 = scalar_lea.vmem %s5065_s25, 16  ;;  %p4592_p4 = scmp.lt.s32.totalorder %s5065_s25, %s5058_s28 }
  0x93   : > { %p4588_p2 = scmp.ne.s32.totalorder %s5065_s25, %s4587_s29  ;;  %p4593_p7 = scmp.lt.s32.totalorder %s5082_s30, %s4587_s29 }
  0x95   : > { %p4594_p8 = por %p4593_p7, %p4592_p4 }
  0x97   : > { %p4595_p10 = pnand %p4594_p8, %p4588_p2 }
  0x99   : > { %4598 = shalt.err (!%p4595_p10)  }
  0x9a   : > { %477 = dma.hbm_to_vmem [thread:$0]  %s464_s19, 16, %s5065_s25, [#allocation4 + $0x1] }
  0x9b   : > { %s3639_s24 = sshll.u32 %s5063_s17, 4  ;;  %s495_s3 = sadd.s32 3, %s5050_s16 }
  0x9c   : > { %s481_s26 = scalar_lea.hbm %s5493_s2, %s3639_s24  ;;  %s496_s15 = sld [smem:[#allocation6 + %s495_s3]] }
  0x9d   : > { %s4599_s21 = scalar_lea.hbm %s481_s26, 16  ;;  %p4602_p0 = scmp.lt.s32.totalorder %s481_s26, %s5493_s2 }
  0x9e   : > { %p4600_p11 = scmp.ne.s32.totalorder %s481_s26, %s4599_s21  ;;  %p4603_p1 = scmp.lt.s32.totalorder %s5073_s8, %s4599_s21 }
  0xa0   : > { %p4604_p13 = por %p4603_p1, %p4602_p0 }
  0xa2   : > { %p4605_p3 = pnand %p4604_p13, %p4600_p11 }
  0xa4   : > { %4608 = shalt.err (!%p4605_p3)  }
  0xa5   : > { %s4609_s25 = scalar_lea.vmem %s5092_s10, 16  ;;  %p4614_p5 = scmp.lt.s32.totalorder %s5092_s10, %s5058_s28 }
  0xa6   : > { %p4610_p9 = scmp.ne.s32.totalorder %s5092_s10, %s4609_s25  ;;  %p4615_p12 = scmp.lt.s32.totalorder %s5082_s30, %s4609_s25 }
  0xa8   : > { %p4616_p6 = por %p4615_p12, %p4614_p5 }
  0xaa   : > { %p4617_p2 = pnand %p4616_p6, %p4610_p9 }
  0xac   : > { %4620 = shalt.err (!%p4617_p2)  }
  0xad   : > { %494 = dma.hbm_to_vmem [thread:$0]  %s481_s26, 16, %s5092_s10, [#allocation4 + $0x2] }
  0xae   : > { %s512_s17 = sadd.s32 4, %s5050_s16  ;;  %s4839_s19 = smov [#allocation2 + $0x3]  }
  0xaf   : > { %s508_s29 = sshll.u32 %s4839_s19, 4  ;;  %s513_s24 = sld [smem:[#allocation6 + %s512_s17]]  ;;  %s509_s29 = int_to_ptr.vmem [resolvable:$true] %s508_s29 }
  0xb0   : > { %s4840_s3 = smov [#allocation2 + $0x4]   ;;  %s529_s5 = sadd.s32 5, %s5050_s16 }
  0xb1   : > { %s525_s4 = sshll.u32 %s4840_s3, 4  ;;  %s3640_s21 = sshll.u32 %s496_s15, 4  ;;  %s5121_s4 = int_to_ptr.vmem [resolvable:$true] %s525_s4 }
  0xb2   : > { %s498_s25 = scalar_lea.hbm %s5493_s2, %s3640_s21  ;;  %s5126_s0 = sld [smem:[#allocation6 + %s529_s5]] }
  0xb3   : > { %s4621_s14 = scalar_lea.hbm %s498_s25, 16  ;;  %p4624_p7 = scmp.lt.s32.totalorder %s498_s25, %s5493_s2 }
  0xb4   : > { %p4622_p4 = scmp.ne.s32.totalorder %s498_s25, %s4621_s14  ;;  %p4625_p8 = scmp.lt.s32.totalorder %s5073_s8, %s4621_s14 }
  0xb6   : > { %p4626_p10 = por %p4625_p8, %p4624_p7 }
  0xb8   : > { %p4627_p11 = pnand %p4626_p10, %p4622_p4 }
  0xba   : > { %4630 = shalt.err (!%p4627_p11)  }
  0xbb   : > { %s4631_s17 = scalar_lea.vmem %s509_s29, 16  ;;  %p4636_p1 = scmp.lt.s32.totalorder %s509_s29, %s5058_s28 }
  0xbc   : > { %p4632_p0 = scmp.ne.s32.totalorder %s509_s29, %s4631_s17  ;;  %p4637_p13 = scmp.lt.s32.totalorder %s5082_s30, %s4631_s17 }
  0xbe   : > { %p4638_p3 = por %p4637_p13, %p4636_p1 }
  0xc0   : > { %p4639_p9 = pnand %p4638_p3, %p4632_p0 }
  0xc2   : > { %4642 = shalt.err (!%p4639_p9)  }
  0xc3   : > { %511 = dma.hbm_to_vmem [thread:$0]  %s498_s25, 16, %s509_s29, [#allocation4 + $0x3] }
  0xc4   : > { %s3641_s15 = sshll.u32 %s513_s24, 4  ;;  %s4841_s14 = smov [#allocation2 + $0x5]  }
  0xc5   : > { %s515_s5 = scalar_lea.hbm %s5493_s2, %s3641_s15  ;;  %s542_s21 = sshll.u32 %s4841_s14, 4  ;;  %s543_s21 = int_to_ptr.vmem [resolvable:$true] %s542_s21 }
  0xc6   : > { %s4643_s23 = scalar_lea.hbm %s515_s5, 16  ;;  %p4646_p12 = scmp.lt.s32.totalorder %s515_s5, %s5493_s2 }
  0xc7   : > { %p4644_p5 = scmp.ne.s32.totalorder %s515_s5, %s4643_s23  ;;  %p4647_p6 = scmp.lt.s32.totalorder %s5073_s8, %s4643_s23 }
  0xc9   : > { %p4648_p2 = por %p4647_p6, %p4646_p12 }
  0xcb   : > { %p4649_p4 = pnand %p4648_p2, %p4644_p5 }
  0xcd   : > { %4652 = shalt.err (!%p4649_p4)  }
  0xce   : > { %s4653_s29 = scalar_lea.vmem %s5121_s4, 16  ;;  %p4658_p8 = scmp.lt.s32.totalorder %s5121_s4, %s5058_s28 }
  0xcf   : > { %p4654_p7 = scmp.ne.s32.totalorder %s5121_s4, %s4653_s29  ;;  %p4659_p10 = scmp.lt.s32.totalorder %s5082_s30, %s4653_s29 }
  0xd1   : > { %p4660_p11 = por %p4659_p10, %p4658_p8 }
  0xd3   : > { %p4661_p0 = pnand %p4660_p11, %p4654_p7 }
  0xd5   : > { %4664 = shalt.err (!%p4661_p0)  }
  0xd6   : > { %528 = dma.hbm_to_vmem [thread:$0]  %s515_s5, 16, %s5121_s4, [#allocation4 + $0x4] }
  0xd7   : > { %s546_s24 = sadd.s32 6, %s5050_s16  ;;  %s3642_s25 = sshll.u32 %s5126_s0, 4 }
  0xd8   : > { %s547_s26 = sld [smem:[#allocation6 + %s546_s24]]  ;;  %s532_s19 = scalar_lea.hbm %s5493_s2, %s3642_s25 }
  0xd9   : > { %s4665_s3 = scalar_lea.hbm %s532_s19, 16  ;;  %p4668_p13 = scmp.lt.s32.totalorder %s532_s19, %s5493_s2 }
  0xda   : > { %p4666_p1 = scmp.ne.s32.totalorder %s532_s19, %s4665_s3  ;;  %p4669_p3 = scmp.lt.s32.totalorder %s5073_s8, %s4665_s3 }
  0xdc   : > { %p4670_p9 = por %p4669_p3, %p4668_p13 }
  0xde   : > { %p4671_p5 = pnand %p4670_p9, %p4666_p1 }
  0xe0   : > { %4674 = shalt.err (!%p4671_p5)  }
  0xe1   : > { %s4675_s18 = scalar_lea.vmem %s543_s21, 16  ;;  %p4680_p6 = scmp.lt.s32.totalorder %s543_s21, %s5058_s28 }
  0xe2   : > { %p4676_p12 = scmp.ne.s32.totalorder %s543_s21, %s4675_s18  ;;  %p4681_p2 = scmp.lt.s32.totalorder %s5082_s30, %s4675_s18 }
  0xe4   : > { %p4682_p4 = por %p4681_p2, %p4680_p6 }
  0xe6   : > { %p4683_p7 = pnand %p4682_p4, %p4676_p12 }
  0xe8   : > { %4686 = shalt.err (!%p4683_p7)  }
  0xe9   : > { %545 = dma.hbm_to_vmem [thread:$0]  %s532_s19, 16, %s543_s21, [#allocation4 + $0x5] }
  0xea   : > { %s4842_s0 = smov [#allocation2 + $0x6]   ;;  %s563_s5 = sadd.s32 7, %s5050_s16 }
  0xeb   : > { %s559_s4 = sshll.u32 %s4842_s0, 4  ;;  %s564_s10 = sld [smem:[#allocation6 + %s563_s5]]  ;;  %s560_s4 = int_to_ptr.vmem [resolvable:$true] %s559_s4 }
  0xec   : > { %s3643_s29 = sshll.u32 %s547_s26, 4  ;;  %s4843_s24 = smov [#allocation2 + $0x7]  }
  0xed   : > { %s576_s25 = sshll.u32 %s4843_s24, 4  ;;  %s549_s3 = scalar_lea.hbm %s5493_s2, %s3643_s29  ;;  %s577_s25 = int_to_ptr.vmem [resolvable:$true] %s576_s25 }
  0xee   : > { %s4687_s14 = scalar_lea.hbm %s549_s3, 16  ;;  %p4690_p10 = scmp.lt.s32.totalorder %s549_s3, %s5493_s2 }
  0xef   : > { %p4688_p8 = scmp.ne.s32.totalorder %s549_s3, %s4687_s14  ;;  %p4691_p11 = scmp.lt.s32.totalorder %s5073_s8, %s4687_s14 }
  0xf1   : > { %p4692_p0 = por %p4691_p11, %p4690_p10 }
  0xf3   : > { %p4693_p1 = pnand %p4692_p0, %p4688_p8 }
  0xf5   : > { %4696 = shalt.err (!%p4693_p1)  }
  0xf6   : > { %s4697_s21 = scalar_lea.vmem %s560_s4, 16  ;;  %p4702_p3 = scmp.lt.s32.totalorder %s560_s4, %s5058_s28 }
  0xf7   : > { %p4698_p13 = scmp.ne.s32.totalorder %s560_s4, %s4697_s21  ;;  %p4703_p9 = scmp.lt.s32.totalorder %s5082_s30, %s4697_s21 }
  0xf9   : > { %p4704_p5 = por %p4703_p9, %p4702_p3 }
  0xfb   : > { %p4705_p12 = pnand %p4704_p5, %p4698_p13 }
  0xfd   : > { %4708 = shalt.err (!%p4705_p12)  }
  0xfe   : > { %562 = dma.hbm_to_vmem [thread:$0]  %s549_s3, 16, %s560_s4, [#allocation4 + $0x6] }
  0xff   : > { %s3644_s26 = sshll.u32 %s564_s10, 4 }
 0x100   : > { %s566_s5 = scalar_lea.hbm %s5493_s2, %s3644_s26 }
 0x101   : > { %s4709_s29 = scalar_lea.hbm %s566_s5, 16  ;;  %p4712_p2 = scmp.lt.s32.totalorder %s566_s5, %s5493_s2 }
 0x102   : > { %p4710_p6 = scmp.ne.s32.totalorder %s566_s5, %s4709_s29  ;;  %p4713_p4 = scmp.lt.s32.totalorder %s5073_s8, %s4709_s29 }
 0x104   : > { %p4714_p7 = por %p4713_p4, %p4712_p2 }
 0x106   : > { %p4715_p8 = pnand %p4714_p7, %p4710_p6 }
 0x108   : > { %4718 = shalt.err (!%p4715_p8)  }
 0x109   : > { %s4719_s15 = scalar_lea.vmem %s577_s25, 16  ;;  %p4724_p11 = scmp.lt.s32.totalorder %s577_s25, %s5058_s28 }
 0x10a   : > { %p4720_p10 = scmp.ne.s32.totalorder %s577_s25, %s4719_s15  ;;  %p4725_p0 = scmp.lt.s32.totalorder %s5082_s30, %s4719_s15 }
 0x10c   : > { %p4726_p1 = por %p4725_p0, %p4724_p11 }
 0x10e   : > { %p4727_p13 = pnand %p4726_p1, %p4720_p10 }
 0x110   : > { %4730 = shalt.err (!%p4727_p13)  }
 0x111   : > { %579 = dma.hbm_to_vmem [thread:$0]  %s566_s5, 16, %s577_s25, [#allocation4 + $0x7] }
 0x112   : > { %s444_s4 = scalar_lea.vmem [#allocation17], %s5054_s22 }
 0x113   : > { %4787 = dma.done.wait [#allocation4], 16 }
 0x114   : > { %4788 = vsyncadd [#allocation4], 4294967280 }
 0x115   : > { %4789 = dma.done.wait [#allocation4 + $0x1], 16 }
 0x116   : > { %4790 = vsyncadd [#allocation4 + $0x1], 4294967280 }
 0x117   : > { %4791 = dma.done.wait [#allocation4 + $0x2], 16 }
 0x118   : > { %4792 = vsyncadd [#allocation4 + $0x2], 4294967280 }
 0x119   : > { %4793 = dma.done.wait [#allocation4 + $0x3], 16 }
 0x11a   : > { %4794 = vsyncadd [#allocation4 + $0x3], 4294967280 }
 0x11b   : > { %4795 = dma.done.wait [#allocation4 + $0x4], 16 }
 0x11c   : > { %4796 = vsyncadd [#allocation4 + $0x4], 4294967280 }
 0x11d   : > { %4797 = dma.done.wait [#allocation4 + $0x5], 16 }
 0x11e   : > { %4798 = vsyncadd [#allocation4 + $0x5], 4294967280 }
 0x11f   : > { %4799 = dma.done.wait [#allocation4 + $0x6], 16 }
 0x120   : > { %4800 = vsyncadd [#allocation4 + $0x6], 4294967280 }
 0x121   : > { %4801 = dma.done.wait [#allocation4 + $0x7], 16 }
 0x122   : > { %4802 = vsyncadd [#allocation4 + $0x7], 4294967280  ;;  %v4844_v0 = vmov 0   ;;  %v4845_v1 = vmov 0.0   ;;  %vm4846_vm0 = vmmov 0   ;;  %v596_v15 = vld [vmem:[#allocation2] sm:$0xff]  ;;  %v601_v40 = vlaneseq }
 0x123   : > { %798 = vmatprep.mubr.bf16.mxu0 %v4844_v0  ;;  %3937 = vmatprep.subr.bf16.mxu1 %v4845_v1  ;;  %v4209_v2 = vld [vmem:[#allocation11 + $0xac] ss:$12 sps:$4 sm:$0xff]   ;;  %v4211_v3 = vld [vmem:[#allocation11 + $0xa8] ss:$12 sps:$4 sm:$0xff]   ;;  %v4214_v5 = vld [vmem:[#allocation11 + $0x90] ss:$12 sps:$4 sm:$0xff]  }
 0x124   : > { %3953 = vmatprep.mubr.msk.bf16.mxu1 %vm4846_vm0, %v4845_v1  ;;  %766 = vmatprep.subr.bf16.mxu0 %v4209_v2  ;;  %v4212_v4 = vld [vmem:[#allocation11 + $0x94] ss:$12 sps:$4 sm:$0xff]   ;;  %v4215_v6 = vld [vmem:[#allocation11 + $0x7c] ss:$12 sps:$4 sm:$0xff]   ;;  %v4217_v7 = vld [vmem:[#allocation11 + $0x78] ss:$12 sps:$4 sm:$0xff]  }
 0x125   : > { %767 = vmatpush1.bf16.msra.mxu0 %v4211_v3  ;;  %v4218_v8 = vld [vmem:[#allocation11 + $0x64] ss:$12 sps:$4 sm:$0xff]   ;;  %v4220_v9 = vld [vmem:[#allocation11 + $0x60] ss:$12 sps:$4 sm:$0xff]   ;;  %v4223_v12 = vld [vmem:[#allocation11 + $0x48] ss:$12 sps:$4 sm:$0xff]  }
 0x126   : > { %768 = vmatprep.subr.bf16.mxu0 %v4212_v4  ;;  %v4221_v10 = vld [vmem:[#allocation11 + $0x4c] ss:$12 sps:$4 sm:$0xff]   ;;  %v4233_v11 = vld [vmem:[#allocation11 + $0xb0] ss:$12 sps:$4 sm:$0xff]   ;;  %v4224_v14 = vld [vmem:[#allocation11 + $0x34] ss:$12 sps:$4 sm:$0xff]  }
 0x127   : > { %3938 = vmatpush3.bf16.msra.mxu1 %v4233_v11  ;;  %v4234_v13 = vld [vmem:[#allocation11 + $0x98] ss:$12 sps:$4 sm:$0xff]   ;;  %v4226_v16 = vld [vmem:[#allocation11 + $0x30] ss:$12 sps:$4 sm:$0xff]   ;;  %v4235_v18 = vld [vmem:[#allocation11 + $0x80] ss:$12 sps:$4 sm:$0xff]  }
 0x128   : > { %3939 = vmatprep.subr.bf16.mxu1 %v4845_v1  ;;  %v4227_v17 = vld [vmem:[#allocation11 + $0x1c] ss:$12 sps:$4 sm:$0xff]   ;;  %v597_v19 = vmul.f32 11.313708, %v596_v15  ;;  %v4229_v21 = vld [vmem:[#allocation11 + $0x18] ss:$12 sps:$4 sm:$0xff]  }
 0x129   : > { %769 = vmatpush1.bf16.msra.mxu0 %v4214_v5  ;;  %v4236_v20 = vld [vmem:[#allocation11 + $0x68] ss:$12 sps:$4 sm:$0xff]   ;;  %v598_v22 = vld [vmem:[#allocation8] sm:$0xff]  ;;  %v4230_v23 = vld [vmem:[#allocation11 + $0x4] ss:$12 sps:$4 sm:$0xff]   ;;  %vm848_vm1 = vcmask 261120  }
 0x12a   : > { %770 = vmatprep.subr.bf16.mxu0 %v4215_v6  ;;  %v4237_v24 = vld [vmem:[#allocation11 + $0x50] ss:$12 sps:$4 sm:$0xff]   ;;  %v4232_v25 = vld [vmem:[#allocation11] ss:$12 sps:$4 sm:$0xff]   ;;  %v5185_v26 = vadd.f32 %v598_v22, %v597_v19  ;;  %v4238_v27 = vld [vmem:[#allocation11 + $0x38] ss:$12 sps:$4 sm:$0xff]  }
 0x12b   : > { %3940 = vmatpush3.bf16.msra.mxu1 %v4234_v13  ;;  %v4239_v29 = vld [vmem:[#allocation11 + $0x20] ss:$12 sps:$4 sm:$0xff]   ;;  %v4240_v30 = vld [vmem:[#allocation11 + $0x8] ss:$12 sps:$4 sm:$0xff]   ;;  %s4847_s8 = smov 96   ;;  %s600_s28 = sld [smem:[#allocation7 + %s4953_s1]] }
 0x12c   : > { %3941 = vmatprep.subr.bf16.mxu1 %v4845_v1  ;;  %v605_v28 = vpack.c.bf16 %v5185_v26, %v5185_v26  ;;  %v602_v41 = vand.u32 127, %v601_v40  ;;  %vm926_vm3 = vcmask 64512   ;;  %s4848_s1 = smov 64   ;;  %s4849_s30 = smov 32   ;;  %vm1183_vm4 = vcmask 523520  }
 0x12d   : > { %771 = vmatpush1.bf16.msra.mxu0 %v4217_v7  ;;  %vm1355_vm5 = vcmask 785920   ;;  %vm1527_vm6 = vcmask 1048320   ;;  %s3454_s18 = sshll.u32 %s444_s4, 4  ;;  %s5549_s19 = sld [smem:[#allocation60_spill]]  ;;  %s3455_s18 = int_to_ptr.vmem [resolvable:$true] %s3454_s18 }
 0x12e   : > { %772 = vmatprep.subr.bf16.mxu0 %v4218_v8  ;;  %s5551_s29 = sand.u32 1, %s4813_s20   ;;  %s4731_s17 = scalar_lea.vmem %s3455_s18, 128 }
 0x12f   : > { %3942 = vmatpush3.bf16.msra.mxu1 %v4235_v18  ;;  %s3441_s24 = scalar_lea.sflag [#allocation10], %s5551_s29  ;;  %p4732_p3 = scmp.ne.s32.totalorder %s3455_s18, %s4731_s17 }
 0x130   : > { %3943 = vmatprep.subr.bf16.mxu1 %v4845_v1  ;;  %p5552_p9 = scmp.ne.s32.totalorder %s5529_s27, 0  ;;  %s4850_s15 = smov [#allocation17]  }
 0x131   : > { %773 = vmatpush1.bf16.msra.mxu0 %v4220_v9  ;;  %v603_v42 = vstv %s600_s28 }
 0x132   : > { %774 = vmatprep.subr.bf16.mxu0 %v4221_v10  ;;  %vm5216_vm2 = vcmp.lt.s32.totalorder %v602_v41, %v603_v42  ;;  %p4733_p5 = pnand %p4732_p3, %p5552_p9 }
 0x133   : > { %3944 = vmatpush3.bf16.msra.mxu1 %v4236_v20  ;;  %s5550_s5 = smov %s5549_s19  ;;  %s3452_s0 = scalar_lea.hbm %s5549_s19, %s5050_s16 }
 0x134   : > { %3945 = vmatprep.subr.bf16.mxu1 %v4845_v1  ;;  %p4734_p12 = pneg %p4733_p5 }
 0x135   : > { %775 = vmatpush1.bf16.msra.mxu0 %v4223_v12 }
 0x136   : > { %776 = vmatprep.subr.bf16.mxu0 %v4224_v14 }
 0x137   : > { %3946 = vmatpush3.bf16.msra.mxu1 %v4237_v24 }
 0x138   : > { %3947 = vmatprep.subr.bf16.mxu1 %v4845_v1 }
 0x139   : > { %777 = vmatpush1.bf16.msra.mxu0 %v4226_v16 }
 0x13a   : > { %778 = vmatprep.subr.bf16.mxu0 %v4227_v17 }
 0x13b   : > { %3948 = vmatpush3.bf16.msra.mxu1 %v4238_v27 }
 0x13c   : > { %3949 = vmatprep.subr.bf16.mxu1 %v4845_v1 }
 0x13d   : > { %779 = vmatpush1.bf16.msra.mxu0 %v4229_v21 }
 0x13e   : > { %780 = vmatprep.subr.bf16.mxu0 %v4230_v23 }
 0x13f   : > { %3950 = vmatpush3.bf16.msra.mxu1 %v4239_v29 }
 0x140   : > { %3951 = vmatprep.subr.bf16.mxu1 %v4845_v1 }
 0x141   : > { %781 = vmatpush1.bf16.msra.mxu0 %v4232_v25 }
 0x142   : > { %3987 = vmatprep.subr.mxu0 %v4845_v1 }
 0x143   : > { %3952 = vmatpush3.bf16.msra.mxu1 %v4240_v30 }
 0x144   : > { %799 = vmatmul.mubr.bf16.vlgmr.msra.gmra.mxu0 %v605_v28  ;;  %3957 = vmatprep.subr.mxu1 %v4845_v1 }
 0x145   : > { %3989 = vmatprep.mubr.msk.f32.mxu0 %vm4846_vm0, %v4845_v1 }
 0x146   : > { %3954 = vmatmul.mubr.bf16.vlgmr.msra.gmra.mxu1 %v605_v28 }
 0x147   : > { %3959 = vmatprep.mubr.msk.f32.mxu1 %vm4846_vm0, %v4845_v1 }
 0x204   : > { %v800_v31 = vpop.f32.mrf.mxu0 }
 0x205   : > { %v5201_v33 = vmul.f32 0.17677669, %v800_v31 }
 0x206   : > { %v802_v32 = vpop.f32.mrf.mxu0  ;;  %v5210_v36 = vpop.f32.mrf.mxu1 }
 0x207   : > { %1014 = vrot.lane.b32.xlu1 %v802_v32, %s4847_s8  ;;  %3958 = vmatpush3.xpose.msk.msra.mxu1 %vm848_vm1, %v802_v32 }
 0x208   : > { %v804_v34 = vpop.f32.mrf.mxu0  ;;  %3962 = vmatprep.subr.mxu1 %v4845_v1  ;;  %v3955_v37 = vpop.f32.mrf.mxu1 }
 0x20a   : > { %v805_v35 = vpop.f32.mrf.mxu0  ;;  %3960 = vmatmul.mubr.msk.f32.vlgmr.msra.gmra.mxu1 %vm848_vm1, %v5201_v33  ;;  %v844_v38 = vpop.f32.mrf.mxu1 }
 0x20b   : > { %1012 = vrot.lane.b32.xlu1 %v5201_v33, %s4847_s8  ;;  %3964 = vmatprep.mubr.msk.f32.mxu1 %vm4846_vm0, %v4845_v1 }
 0x20c   : > { %3963 = vmatpush3.msra.mxu1 %v5210_v36  ;;  %v3956_v39 = vpop.f32.mrf.mxu1 }
 0x20d   : > { %3967 = vmatprep.subr.mxu1 %v4845_v1 }
 0x279   : > { %v1015_v55 = vpop.permute.xlu1 %1014 }
 0x27d   : > { %v1013_v57 = vpop.permute.xlu1 %1012 }
 0x2ca   : > { %v921_v44 = vpop.f32.mrf.mxu1 }
 0x2cb   : > { %v925_v45 = vsel %vm5216_vm2, %v921_v44, -1000000.0 }
 0x2cc   : > { %v3961_v46 = vpop.f32.mrf.mxu1  ;;  %v927_v47 = vsel %vm926_vm3, %v925_v45, -inf }
 0x2cd   : > { %928 = vmax.xlane.f32.xlu0 %v927_v47  ;;  %v4241_v47 = vld [vmem:[#allocation13 + $0x38] sm:$0xff]  }
 0x356   : > { %v929_v48 = vpop.xlane.xlu0 %928 }
 0x357   : > { %v930_v49 = vsub.f32 %v925_v45, %v929_v48  ;;  %v4242_v48 = vld [vmem:[#allocation13 + $0x30] sm:$0xff]  }
 0x359   : > { %v931_v50 = vmul.f32 1.442695, %v930_v49  ;;  %v4243_v49 = vld [vmem:[#allocation13 + $0x28] sm:$0xff]  }
 0x35b   : > { %4369 = vpow2.f32 %v931_v50  ;;  %v4244_v50 = vld [vmem:[#allocation13 + $0x20] sm:$0xff]  }
 0x368   : > { %v4370_v51 = vpop.eup %4369 }
 0x369   : > { %v933_v52 = vsel %vm926_vm3, %v4370_v51, 0.0 }
 0x36a   : > { %934 = vadd.xlane.f32.xlu0 %v933_v52  ;;  %v4246_v52 = vld [vmem:[#allocation13 + $0x10] sm:$0xff]  }
 0x3f3   : > { %v935_v53 = vpop.xlane.xlu0 %934 }
 0x3f4   : > { %4371 = vrcp.f32 %v935_v53  ;;  %v4247_v53 = vld [vmem:[#allocation13 + $0x8] sm:$0xff]  }
 0x401   : > { %v4372_v54 = vpop.eup %4371 }
 0x402   : > { %v937_v56 = vmul.f32 %v4372_v54, %v4370_v51  ;;  %v4245_v51 = vld [vmem:[#allocation13 + $0x18] sm:$0xff]   ;;  %v4248_v54 = vld [vmem:[#allocation13] sm:$0xff]  }
 0x404   : > { %3965 = vmatmul.mubr.msk.f32.vlgmr.msra.gmra.mxu1 %vm926_vm3, %v937_v56 }
 0x405   : > { %3968 = vmatpush3.xpose.msk.msra.mxu1 %vm848_vm1, %v1015_v55  ;;  %3969 = vmatprep.mubr.msk.f32.mxu1 %vm4846_vm0, %v4845_v1 }
 0x406   : > { %3972 = vmatprep.subr.mxu1 %v4845_v1 }
 0x408   : > { %3970 = vmatmul.mubr.msk.f32.vlgmr.msra.gmra.mxu1 %vm848_vm1, %v1013_v57 }
 0x409   : > { %3974 = vmatprep.mubr.msk.f32.mxu1 %vm4846_vm0, %v4845_v1 }
 0x4c4   : > { %v1007_v58 = vpop.f32.mrf.mxu1 }
 0x4c5   : > { %1011 = vst.msk [vmem:[#allocation3] sm:$0xff] %vm848_vm1, %v1007_v58 }
 0x4c6   : > { %v3966_v59 = vpop.f32.mrf.mxu1 }
 0x4c8   : > { %v1086_v60 = vpop.f32.mrf.mxu1 }
 0x4c9   : > { %v1090_v61 = vsel %vm5216_vm2, %v1086_v60, -1000000.0 }
 0x4ca   : > { %v3971_v62 = vpop.f32.mrf.mxu1  ;;  %v1091_v63 = vsel %vm926_vm3, %v1090_v61, -inf }
 0x4cb   : > { %1092 = vmax.xlane.f32.xlu0 %v1091_v63 }
 0x4e1   : > { %1103 = vrot.lane.b32.xlu0 %v5210_v36, %s4847_s8 }
 0x4e5   : > { %1187 = vrot.lane.b32.xlu0 %v802_v32, %s4848_s1 }
 0x4e9   : > { %1185 = vrot.lane.b32.xlu0 %v5201_v33, %s4848_s1 }
 0x4ed   : > { %1359 = vrot.lane.b32.xlu0 %v802_v32, %s4849_s30 }
 0x554   : > { %v1093_v2 = vpop.xlane.xlu0 %1092 }
 0x555   : > { %v1094_v3 = vsub.f32 %v1090_v61, %v1093_v2 }
 0x557   : > { %v1095_v4 = vmul.f32 1.442695, %v1094_v3 }
 0x558   : > { %v1104_v5 = vpop.permute.xlu0 %1103 }
 0x559   : > { %4373 = vpow2.f32 %v1095_v4  ;;  %3973 = vmatpush3.msra.mxu1 %v1104_v5 }
 0x55a   : > { %3977 = vmatprep.subr.mxu1 %v4845_v1 }
 0x55c   : > { %v1188_v6 = vpop.permute.xlu0 %1187 }
 0x560   : > { %v1186_v7 = vpop.permute.xlu0 %1185 }
 0x564   : > { %v1360_v8 = vpop.permute.xlu0 %1359 }
 0x565   : > { %3988 = vmatpush3.xpose.msk.msra.mxu0 %vm848_vm1, %v1360_v8  ;;  %v4254_v8 = vld [vmem:[#allocation14 + $0x64] ss:$8 sps:$4 sm:$0xff]  }
 0x566   : > { %v4374_v9 = vpop.eup %4373  ;;  %3997 = vmatprep.subr.bf16.mxu0 %v4845_v1 }
 0x567   : > { %v1097_v10 = vsel %vm926_vm3, %v4374_v9, 0.0 }
 0x568   : > { %1098 = vadd.xlane.f32.xlu1 %v1097_v10 }
 0x579   : > { %1357 = vrot.lane.b32.xlu1 %v5201_v33, %s4849_s30 }
 0x5f1   : > { %v1099_v11 = vpop.xlane.xlu1 %1098 }
 0x5f2   : > { %4375 = vrcp.f32 %v1099_v11 }
 0x5f5   : > { %v1358_v12 = vpop.permute.xlu1 %1357 }
 0x5f6   : > { %3990 = vmatmul.mubr.msk.f32.vlgmr.msra.gmra.mxu0 %vm848_vm1, %v1358_v12 }
 0x5f7   : > { %4013 = vmatprep.mubr.msk.bf16.mxu0 %vm4846_vm0, %v4845_v1  ;;  %3998 = vmatpush3.bf16.msra.mxu0 %v4241_v47 }
 0x5f8   : > { %3999 = vmatprep.subr.bf16.mxu0 %v4845_v1 }
 0x5fb   : > { %4000 = vmatpush3.bf16.msra.mxu0 %v4242_v48 }
 0x5fc   : > { %4001 = vmatprep.subr.bf16.mxu0 %v4845_v1 }
 0x5ff   : > { %v4376_v13 = vpop.eup %4375  ;;  %4002 = vmatpush3.bf16.msra.mxu0 %v4243_v49 }
 0x600   : > { %v1101_v14 = vmul.f32 %v4376_v13, %v4374_v9  ;;  %4003 = vmatprep.subr.bf16.mxu0 %v4845_v1  ;;  %v4252_v9 = vld [vmem:[#allocation14 + $0x60] ss:$8 sps:$4 sm:$0xff]  }
 0x602   : > { %3975 = vmatmul.mubr.msk.f32.vlgmr.msra.gmra.mxu1 %vm926_vm3, %v1101_v14  ;;  %v4257_v14 = vld [vmem:[#allocation14 + $0x54] ss:$8 sps:$4 sm:$0xff]  }
 0x603   : > { %3978 = vmatpush3.xpose.msk.msra.mxu1 %vm848_vm1, %v1188_v6  ;;  %3979 = vmatprep.mubr.msk.f32.mxu1 %vm4846_vm0, %v4845_v1  ;;  %v4249_v6 = vld [vmem:[#allocation14 + $0x70] ss:$8 sps:$4 sm:$0xff]  }
 0x604   : > { %3982 = vmatprep.subr.mxu1 %v4845_v1  ;;  %4004 = vmatpush3.bf16.msra.mxu0 %v4244_v50  ;;  %v4285_v50 = vld [vmem:[#allocation16 + $0x48] sm:$0xff]  }
 0x605   : > { %4005 = vmatprep.subr.bf16.mxu0 %v4845_v1 }
 0x606   : > { %3980 = vmatmul.mubr.msk.f32.vlgmr.msra.gmra.mxu1 %vm848_vm1, %v1186_v7  ;;  %v4251_v7 = vld [vmem:[#allocation14 + $0x74] ss:$8 sps:$4 sm:$0xff]  }
 0x607   : > { %3984 = vmatprep.mubr.msk.f32.mxu1 %vm4846_vm0, %v4845_v1 }
 0x608   : > { %4006 = vmatpush3.bf16.msra.mxu0 %v4245_v51  ;;  %v4286_v51 = vld [vmem:[#allocation16 + $0x8] sm:$0xff]  }
 0x609   : > { %4007 = vmatprep.subr.bf16.mxu0 %v4845_v1 }
 0x60c   : > { %4008 = vmatpush3.bf16.msra.mxu0 %v4246_v52  ;;  %v4287_v52 = vld [vmem:[#allocation16 + $0x40] sm:$0xff]  }
 0x60d   : > { %4009 = vmatprep.subr.bf16.mxu0 %v4845_v1 }
 0x610   : > { %4010 = vmatpush3.bf16.msra.mxu0 %v4247_v53  ;;  %v4288_v53 = vld [vmem:[#allocation16] sm:$0xff]  }
 0x611   : > { %4011 = vmatprep.subr.bf16.mxu0 %v4845_v1 }
 0x614   : > { %4012 = vmatpush3.bf16.msra.mxu0 %v4248_v54  ;;  %v5300_v54 = vshrl.u32 %v601_v40, 7 }
 0x6b6   : > { %v1431_v15 = vpop.f32.mrf.mxu0 }
 0x6b7   : > { %v1435_v16 = vsel %vm5216_vm2, %v1431_v15, -1000000.0  ;;  %v4255_v15 = vld [vmem:[#allocation14 + $0x50] ss:$8 sps:$4 sm:$0xff]  }
 0x6b8   : > { %v3991_v17 = vpop.f32.mrf.mxu0  ;;  %v1436_v18 = vsel %vm926_vm3, %v1435_v16, -inf }
 0x6b9   : > { %1437 = vmax.xlane.f32.xlu1 %v1436_v18  ;;  %v4263_v17 = vld [vmem:[#allocation14 + $0x34] ss:$8 sps:$4 sm:$0xff]   ;;  %v4261_v18 = vld [vmem:[#allocation14 + $0x30] ss:$8 sps:$4 sm:$0xff]  }
 0x6c2   : > { %v1175_v19 = vpop.f32.mrf.mxu1 }
 0x6c4   : > { %v3976_v20 = vpop.f32.mrf.mxu1 }
 0x6c5   : > { %v4264_v20 = vld [vmem:[#allocation14 + $0x20] ss:$8 sps:$4 sm:$0xff]  }
 0x6c6   : > { %v1259_v21 = vpop.f32.mrf.mxu1 }
 0x6c7   : > { %v1263_v22 = vsel %vm5216_vm2, %v1259_v21, -1000000.0  ;;  %v4269_v21 = vld [vmem:[#allocation14 + $0x14] ss:$8 sps:$4 sm:$0xff]  }
 0x6c8   : > { %v3981_v23 = vpop.f32.mrf.mxu1  ;;  %v1264_v24 = vsel %vm926_vm3, %v1263_v22, -inf }
 0x6c9   : > { %1265 = vmax.xlane.f32.xlu0 %v1264_v24  ;;  %v4272_v23 = vld [vmem:[#allocation14 + $0x4] ss:$8 sps:$4 sm:$0xff]   ;;  %v4270_v24 = vld [vmem:[#allocation14] ss:$8 sps:$4 sm:$0xff]  }
 0x6ca   : > { %1447 = vrot.lane.b32.xlu1 %v5210_v36, %s4849_s30 }
 0x742   : > { %v1438_v25 = vpop.xlane.xlu1 %1437 }
 0x743   : > { %v1439_v27 = vsub.f32 %v1435_v16, %v1438_v25  ;;  %v4260_v16 = vld [vmem:[#allocation14 + $0x44] ss:$8 sps:$4 sm:$0xff]   ;;  %v4273_v25 = vld [vmem:[#allocation16 + $0x78] sm:$0xff]  }
 0x744   : > { %3859 = vmatprep.subr.bf16.mxu0 %v4273_v25  ;;  %v4297_v25 = vld [vmem:[#allocation11 + $0x138] ss:$12 sps:$4 sm:$0xff]  }
 0x745   : > { %v1440_v28 = vmul.f32 1.442695, %v1439_v27  ;;  %v4274_v27 = vld [vmem:[#allocation16 + $0x38] sm:$0xff]  }
 0x746   : > { %v1448_v46 = vpop.permute.xlu1 %1447 }
 0x747   : > { %4377 = vpow2.f32 %v1440_v28  ;;  %v4275_v28 = vld [vmem:[#allocation16 + $0x70] sm:$0xff]  }
 0x752   : > { %v1266_v29 = vpop.xlane.xlu0 %1265 }
 0x753   : > { %v1267_v30 = vsub.f32 %v1263_v22, %v1266_v29  ;;  %v4267_v22 = vld [vmem:[#allocation14 + $0x10] ss:$8 sps:$4 sm:$0xff]  }
 0x754   : > { %v4378_v31 = vpop.eup %4377  ;;  %v4276_v29 = vld [vmem:[#allocation16 + $0x30] sm:$0xff]  }
 0x755   : > { %v1268_v32 = vmul.f32 1.442695, %v1267_v30  ;;  %v1442_v33 = vsel %vm926_vm3, %v4378_v31, 0.0  ;;  %v4277_v30 = vld [vmem:[#allocation16 + $0x68] sm:$0xff]  }
 0x756   : > { %1443 = vadd.xlane.f32.xlu0 %v1442_v33  ;;  %v4280_v33 = vld [vmem:[#allocation16 + $0x20] sm:$0xff]  }
 0x757   : > { %4379 = vpow2.f32 %v1268_v32  ;;  %v4279_v32 = vld [vmem:[#allocation16 + $0x60] sm:$0xff]  }
 0x764   : > { %v4380_v34 = vpop.eup %4379 }
 0x765   : > { %v1270_v35 = vsel %vm926_vm3, %v4380_v34, 0.0 }
 0x766   : > { %1271 = vadd.xlane.f32.xlu0 %v1270_v35  ;;  %v4282_v35 = vld [vmem:[#allocation16 + $0x18] sm:$0xff]  }
 0x77c   : > { %1275 = vrot.lane.b32.xlu0 %v5210_v36, %s4848_s1 }
 0x780   : > { %1180 = vrot.lane.b32.xlu0 %v1175_v19, %s4849_s30  ;;  %v4266_v19 = vld [vmem:[#allocation14 + $0x24] ss:$8 sps:$4 sm:$0xff]  }
 0x7df   : > { %v1444_v37 = vpop.xlane.xlu0 %1443 }
 0x7ef   : > { %v1272_v38 = vpop.xlane.xlu0 %1271 }
 0x7f0   : > { %4381 = vrcp.f32 %v1272_v38  ;;  %v4284_v38 = vld [vmem:[#allocation16 + $0x10] sm:$0xff]  }
 0x7f1   : > { %4383 = vrcp.f32 %v1444_v37  ;;  %v4283_v37 = vld [vmem:[#allocation16 + $0x50] sm:$0xff]  }
 0x7f3   : > { %v1276_v39 = vpop.permute.xlu0 %1275 }
 0x7f4   : > { %3983 = vmatpush3.msra.mxu1 %v1276_v39 }
 0x7f5   : > { %3992 = vmatprep.subr.mxu1 %v4845_v1 }
 0x7f7   : > { %v1181_v41 = vpop.permute.xlu0 %1180 }
 0x7f8   : > { %1184 = vst.msk [vmem:[#allocation3] sm:$0xff] %vm1183_vm4, %v1181_v41 }
 0x7fd   : > { %v4382_v42 = vpop.eup %4381 }
 0x7fe   : > { %v1274_v44 = vmul.f32 %v4382_v42, %v4380_v34  ;;  %v4384_v45 = vpop.eup %4383  ;;  %v4281_v34 = vld [vmem:[#allocation16 + $0x58] sm:$0xff]  }
 0x7ff   : > { %v1446_v36 = vmul.f32 %v4384_v45, %v4378_v31  ;;  %v4278_v31 = vld [vmem:[#allocation16 + $0x28] sm:$0xff]  }
 0x800   : > { %3985 = vmatmul.mubr.msk.f32.vlgmr.msra.gmra.mxu1 %vm926_vm3, %v1274_v44  ;;  %v3689_v45 = vld [vmem:[%s5497_s6] ss:$0 sm:$0xff] }
 0x801   : > { %3993 = vmatpush3.msra.mxu1 %v1448_v46  ;;  %3994 = vmatprep.mubr.msk.f32.mxu1 %vm4846_vm0, %v4845_v1 }
 0x802   : > { %1772 = vmatprep.subr.bf16.mxu1 %v4251_v7 }
 0x804   : > { %3995 = vmatmul.mubr.msk.f32.vlgmr.msra.gmra.mxu1 %vm926_vm3, %v1446_v36  ;;  %v3690_v36 = vld [vmem:[%s5498_s7] ss:$0 sm:$0xff] }
 0x805   : > { %1804 = vmatprep.mubr.bf16.mxu1 %v4844_v0  ;;  %1773 = vmatpush1.bf16.msra.mxu1 %v4249_v6 }
 0x806   : > { %1774 = vmatprep.subr.bf16.mxu1 %v4254_v8  ;;  %v3707_v8 = vld [vmem:[%s5502_s11] ss:$0 sm:$0xff] }
 0x809   : > { %1775 = vmatpush1.bf16.msra.mxu1 %v4252_v9 }
 0x80a   : > { %1776 = vmatprep.subr.bf16.mxu1 %v4257_v14 }
 0x80d   : > { %1777 = vmatpush1.bf16.msra.mxu1 %v4255_v15  ;;  %v4289_v15 = vld [vmem:[#allocation11 + $0x168] ss:$12 sps:$4 sm:$0xff]  }
 0x80e   : > { %1778 = vmatprep.subr.bf16.mxu1 %v4260_v16  ;;  %v4292_v16 = vld [vmem:[#allocation11 + $0x170] ss:$12 sps:$4 sm:$0xff]  }
 0x8c0   : > { %v1347_v55 = vpop.f32.mrf.mxu1 }
 0x8c1   : > { %1352 = vrot.lane.b32.xlu0 %v1347_v55, %s4848_s1  ;;  %v1684_v55 = vsub.s32 0, %v5300_v54 }
 0x8c2   : > { %v3986_v56 = vpop.f32.mrf.mxu1 }
 0x8c3   : > { %v1680_v56 = vld [vmem:[%s5500_s9] sm:$0x3] }
 0x8c4   : > { %v1519_v57 = vpop.f32.mrf.mxu1 }
 0x8c5   : > { %1524 = vrot.lane.b32.xlu1 %v1519_v57, %s4847_s8  ;;  %v1688_v57 = vsub.s32 1, %v5300_v54 }
 0x8c6   : > { %v3996_v58 = vpop.f32.mrf.mxu1 }
 0x8c7   : > { %v1685_v58 = vrot.slane %v1680_v56, %v1684_v55 }
 0x933   : > { %v1353_v59 = vpop.permute.xlu0 %1352 }
 0x934   : > { %1356 = vst.msk [vmem:[#allocation3] sm:$0xff] %vm1355_vm5, %v1353_v59  ;;  %v1689_v59 = vrot.slane %v1680_v56, %v1688_v57 }
 0x937   : > { %v1525_v60 = vpop.permute.xlu1 %1524 }
 0x938   : > { %1528 = vst.msk [vmem:[#allocation3] sm:$0xff] %vm1527_vm6, %v1525_v60 }
 0x93f   : > { %v1529_v61 = vld [vmem:[#allocation3] sm:$0xff] }
 0x940   : > { %v1530_v62 = vpack.c.bf16 %v1529_v61, %v1529_v61 }
 0x942   : > { %4014 = vmatmul.mubr.bf16.vlgmr.msra.gmra.mxu0 %v1530_v62 }
 0x943   : > { %3860 = vmatpush3.bf16.msra.mxu0 %v4274_v27  ;;  %v4300_v27 = vld [vmem:[#allocation11 + $0x140] ss:$12 sps:$4 sm:$0xff]  }
 0x944   : > { %3861 = vmatprep.subr.bf16.mxu0 %v4275_v28  ;;  %v4301_v28 = vld [vmem:[#allocation11 + $0x120] ss:$12 sps:$4 sm:$0xff]  }
 0x947   : > { %3862 = vmatpush3.bf16.msra.mxu0 %v4276_v29  ;;  %v4303_v29 = vld [vmem:[#allocation11 + $0x124] ss:$12 sps:$4 sm:$0xff]  }
 0x948   : > { %3863 = vmatprep.subr.bf16.mxu0 %v4277_v30  ;;  %v4304_v30 = vld [vmem:[#allocation11 + $0x128] ss:$12 sps:$4 sm:$0xff]  }
 0x94b   : > { %3864 = vmatpush3.bf16.msra.mxu0 %v4278_v31  ;;  %v4307_v31 = vld [vmem:[#allocation11 + $0x10c] ss:$12 sps:$4 sm:$0xff]  }
 0x94c   : > { %3865 = vmatprep.subr.bf16.mxu0 %v4279_v32  ;;  %v4305_v32 = vld [vmem:[#allocation11 + $0x108] ss:$12 sps:$4 sm:$0xff]  }
 0x94f   : > { %3866 = vmatpush3.bf16.msra.mxu0 %v4280_v33  ;;  %v4308_v33 = vld [vmem:[#allocation11 + $0x110] ss:$12 sps:$4 sm:$0xff]  }
 0x950   : > { %3867 = vmatprep.subr.bf16.mxu0 %v4281_v34  ;;  %v4311_v34 = vld [vmem:[#allocation11 + $0xf4] ss:$12 sps:$4 sm:$0xff]  }
 0x953   : > { %3868 = vmatpush3.bf16.msra.mxu0 %v4282_v35  ;;  %v4309_v35 = vld [vmem:[#allocation11 + $0xf0] ss:$12 sps:$4 sm:$0xff]  }
 0x954   : > { %3869 = vmatprep.subr.bf16.mxu0 %v4283_v37  ;;  %v4312_v37 = vld [vmem:[#allocation11 + $0xf8] ss:$12 sps:$4 sm:$0xff]  }
 0x957   : > { %3870 = vmatpush3.bf16.msra.mxu0 %v4284_v38  ;;  %v4315_v38 = vld [vmem:[#allocation11 + $0xdc] ss:$12 sps:$4 sm:$0xff]  }
 0x958   : > { %3871 = vmatprep.subr.bf16.mxu0 %v4285_v50 }
 0x95b   : > { %3872 = vmatpush3.bf16.msra.mxu0 %v4286_v51  ;;  %v3725_v51 = vld [vmem:[%s5504_s13] ss:$0 sm:$0xff] }
 0x95c   : > { %3873 = vmatprep.subr.bf16.mxu0 %v4287_v52 }
 0x95f   : > { %3874 = vmatpush3.bf16.msra.mxu0 %v4288_v53 }
 0x960   : > { %4017 = vmatprep.subr.bf16.mxu0 %v4845_v1 }
 0xa02   : > { %v1629_v63 = vpop.f32.mrf.mxu0 }
 0xa03   : > { %v1630_v2 = vadd.f32 %v1629_v63, %v5185_v26  ;;  %v4258_v26 = vld [vmem:[#allocation14 + $0x40] ss:$8 sps:$4 sm:$0xff]  }
 0xa04   : > { %v4015_v3 = vpop.f32.mrf.mxu0  ;;  %1779 = vmatpush1.bf16.msra.mxu1 %v4258_v26  ;;  %v4291_v26 = vld [vmem:[#allocation11 + $0x16c] ss:$12 sps:$4 sm:$0xff]  }
 0xa05   : > { %1637 = vadd.xlane.f32.xlu0 %v1630_v2  ;;  %1780 = vmatprep.subr.bf16.mxu1 %v4263_v17  ;;  %v4295_v17 = vld [vmem:[#allocation11 + $0x154] ss:$12 sps:$4 sm:$0xff]  }
 0xa06   : > { %v1632_v4 = vpop.f32.mrf.mxu0 }
 0xa08   : > { %v4016_v5 = vpop.f32.mrf.mxu0  ;;  %1781 = vmatpush1.bf16.msra.mxu1 %v4261_v18  ;;  %v4296_v18 = vld [vmem:[#allocation11 + $0x158] ss:$12 sps:$4 sm:$0xff]  }
 0xa09   : > { %1782 = vmatprep.subr.bf16.mxu1 %v4266_v19  ;;  %v4293_v19 = vld [vmem:[#allocation11 + $0x150] ss:$12 sps:$4 sm:$0xff]  }
 0xa0c   : > { %1783 = vmatpush1.bf16.msra.mxu1 %v4264_v20 }
 0xa0d   : > { %1784 = vmatprep.subr.bf16.mxu1 %v4269_v21 }
 0xa10   : > { %1785 = vmatpush1.bf16.msra.mxu1 %v4267_v22 }
 0xa11   : > { %1786 = vmatprep.subr.bf16.mxu1 %v4272_v23 }
 0xa14   : > { %1787 = vmatpush1.bf16.msra.mxu1 %v4270_v24  ;;  %v4299_v24 = vld [vmem:[#allocation11 + $0x13c] ss:$12 sps:$4 sm:$0xff]  }
 0xa15   : > { %2182 = vmatprep.subr.bf16.mxu1 %v4291_v26 }
 0xa8e   : > { %v1638_v10 = vpop.xlane.xlu0 %1637 }
 0xa8f   : > { %v1640_v11 = vmul.f32 0.0078125, %v1638_v10 }
 0xa91   : > { %v1641_v12 = vsub.f32 %v1630_v2, %v1640_v11 }
 0xa93   : > { %v1642_v13 = vmul.f32 %v1641_v12, %v1641_v12 }
 0xa95   : > { %1643 = vadd.xlane.f32.xlu1 %v1642_v13 }
 0xb1e   : > { %v1644_v39 = vpop.xlane.xlu1 %1643 }
 0xb1f   : > { %v1645_v41 = vmul.f32 0.0078125, %v1644_v39  ;;  %v4313_v39 = vld [vmem:[#allocation11 + $0xd8] ss:$12 sps:$4 sm:$0xff]  }
 0xb21   : > { %v1646_v42 = vadd.f32 1e-05, %v1645_v41  ;;  %v4316_v41 = vld [vmem:[#allocation11 + $0xe0] ss:$12 sps:$4 sm:$0xff]  }
 0xb23   : > { %4385 = vrsqrt.f32 %v1646_v42  ;;  %v4319_v42 = vld [vmem:[#allocation11 + $0xc4] ss:$12 sps:$4 sm:$0xff]  }
 0xb30   : > { %v4386_v44 = vpop.eup %4385 }
 0xb31   : > { %v1648_v46 = vmul.f32 %v4386_v44, %v1641_v12  ;;  %v4317_v44 = vld [vmem:[#allocation11 + $0xc0] ss:$12 sps:$4 sm:$0xff]  }
 0xb33   : > { %v1655_v47 = vmul.f32 %v3689_v45, %v1648_v46  ;;  %v4320_v45 = vld [vmem:[#allocation11 + $0xc8] ss:$12 sps:$4 sm:$0xff]  }
 0xb35   : > { %v1662_v48 = vadd.f32 %v3690_v36, %v1655_v47 }
 0xb37   : > { %v1663_v49 = vpack.c.bf16 %v1662_v48, %v1662_v48 }
 0xb39   : > { %1805 = vmatmul.mubr.bf16.vlgmr.msra.gmra.mxu1 %v1663_v49  ;;  %v3724_v49 = vld [vmem:[%s5503_s12] ss:$0 sm:$0xff] }
 0xb3a   : > { %2214 = vmatprep.mubr.bf16.mxu1 %v4844_v0  ;;  %2183 = vmatpush1.bf16.msra.mxu1 %v4289_v15 }
 0xb3b   : > { %2184 = vmatprep.subr.bf16.mxu1 %v4295_v17 }
 0xb3e   : > { %2185 = vmatpush1.bf16.msra.mxu1 %v4293_v19 }
 0xb3f   : > { %2186 = vmatprep.subr.bf16.mxu1 %v4299_v24 }
 0xb42   : > { %2187 = vmatpush1.bf16.msra.mxu1 %v4297_v25 }
 0xb43   : > { %2188 = vmatprep.subr.bf16.mxu1 %v4303_v29 }
 0xb46   : > { %2189 = vmatpush1.bf16.msra.mxu1 %v4301_v28 }
 0xb47   : > { %2190 = vmatprep.subr.bf16.mxu1 %v4307_v31 }
 0xb4a   : > { %2191 = vmatpush1.bf16.msra.mxu1 %v4305_v32 }
 0xb4b   : > { %2192 = vmatprep.subr.bf16.mxu1 %v4311_v34 }
 0xb4e   : > { %2193 = vmatpush1.bf16.msra.mxu1 %v4309_v35 }
 0xb4f   : > { %2194 = vmatprep.subr.bf16.mxu1 %v4315_v38 }
 0xb52   : > { %2195 = vmatpush1.bf16.msra.mxu1 %v4313_v39 }
 0xb53   : > { %2196 = vmatprep.subr.bf16.mxu1 %v4319_v42 }
 0xb56   : > { %2197 = vmatpush1.bf16.msra.mxu1 %v4317_v44 }
 0xb57   : > { %4037 = vmatprep.subr.mxu1 %v4845_v1 }
 0xbf9   : > { %v1806_v60 = vpop.f32.mrf.mxu1 }
 0xbfa   : > { %v1807_v61 = vadd.f32 %v1806_v60, %v1685_v58 }
 0xbfb   : > { %v1808_v62 = vpop.f32.mrf.mxu1 }
 0xbfc   : > { %v1809_v63 = vadd.f32 %v1808_v62, %v1689_v59  ;;  %v1813_v40 = vmax.f32 %v1807_v61, 0.0 }
 0xbfd   : > { %v1810_v2 = vpop.f32.mrf.mxu1 }
 0xbfe   : > { %v1814_v3 = vmax.f32 %v1809_v63, 0.0  ;;  %v1815_v6 = vpack.c.bf16 %v1813_v40, %v1813_v40 }
 0xbff   : > { %v1811_v4 = vpop.f32.mrf.mxu1 }
 0xc00   : > { %v1816_v5 = vpack.c.bf16 %v1814_v3, %v1814_v3 }
 0xc02   : > { %1984 = vmatprep.mubr.bf16.mxu0 %v1816_v5 }
 0xc03   : > { %1985 = vmatmul.mubr.bf16.vlgmr.msra.gmra.mxu0 %v1815_v6 }
 0xc04   : > { %4033 = vmatprep.mubr.msk.bf16.mxu0 %vm4846_vm0, %v4845_v1  ;;  %4018 = vmatpush3.bf16.msra.mxu0 %v4292_v16 }
 0xc05   : > { %4019 = vmatprep.subr.bf16.mxu0 %v4845_v1 }
 0xc08   : > { %4020 = vmatpush3.bf16.msra.mxu0 %v4296_v18 }
 0xc09   : > { %4021 = vmatprep.subr.bf16.mxu0 %v4845_v1 }
 0xc0c   : > { %4022 = vmatpush3.bf16.msra.mxu0 %v4300_v27 }
 0xc0d   : > { %4023 = vmatprep.subr.bf16.mxu0 %v4845_v1 }
 0xc10   : > { %4024 = vmatpush3.bf16.msra.mxu0 %v4304_v30 }
 0xc11   : > { %4025 = vmatprep.subr.bf16.mxu0 %v4845_v1 }
 0xc14   : > { %4026 = vmatpush3.bf16.msra.mxu0 %v4308_v33 }
 0xc15   : > { %4027 = vmatprep.subr.bf16.mxu0 %v4845_v1 }
 0xc18   : > { %4028 = vmatpush3.bf16.msra.mxu0 %v4312_v37 }
 0xc19   : > { %4029 = vmatprep.subr.bf16.mxu0 %v4845_v1 }
 0xc1c   : > { %4030 = vmatpush3.bf16.msra.mxu0 %v4316_v41 }
 0xc1d   : > { %4031 = vmatprep.subr.bf16.mxu0 %v4845_v1 }
 0xc20   : > { %4032 = vmatpush3.bf16.msra.mxu0 %v4320_v45 }
 0xc21   : > { %4077 = vmatprep.subr.bf16.mxu0 %v4845_v1 }
 0xcc3   : > { %v3875_v7 = vpop.f32.mrf.mxu0 }
 0xcc5   : > { %v3876_v9 = vpop.f32.mrf.mxu0 }
 0xcc6   : > { %v3877_v10 = vadd.f32 %v3876_v9, %v3875_v7 }
 0xcc7   : > { %v3878_v11 = vpop.f32.mrf.mxu0 }
 0xcc8   : > { %v1987_v12 = vadd.f32 %v3877_v10, %v3707_v8 }
 0xcc9   : > { %v3879_v13 = vpop.f32.mrf.mxu0 }
 0xcca   : > { %v1992_v14 = vadd.f32 %v1987_v12, %v1662_v48 }
 0xccc   : > { %1995 = vadd.xlane.f32.xlu0 %v1992_v14 }
 0xd55   : > { %v1996_v20 = vpop.xlane.xlu0 %1995 }
 0xd56   : > { %v1997_v21 = vmul.f32 0.0078125, %v1996_v20 }
 0xd58   : > { %v1998_v22 = vsub.f32 %v1992_v14, %v1997_v21 }
 0xd5a   : > { %v1999_v23 = vmul.f32 %v1998_v22, %v1998_v22 }
 0xd5c   : > { %2000 = vadd.xlane.f32.xlu0 %v1999_v23 }
 0xde5   : > { %v2001_v46 = vpop.xlane.xlu0 %2000 }
 0xde6   : > { %v2002_v36 = vmul.f32 0.0078125, %v2001_v46 }
 0xde8   : > { %v2003_v47 = vadd.f32 1e-05, %v2002_v36 }
 0xdea   : > { %4387 = vrsqrt.f32 %v2003_v47 }
 0xdf7   : > { %v4388_v48 = vpop.eup %4387 }
 0xdf8   : > { %v2005_v50 = vmul.f32 %v4388_v48, %v1998_v22 }
 0xdfa   : > { %v2012_v52 = vmul.f32 %v3724_v49, %v2005_v50 }
 0xdfc   : > { %v5331_v53 = vadd.f32 %v3725_v51, %v2012_v52 }
 0xdfe   : > { %v2020_v56 = vpack.c.bf16 %v5331_v53, %v5331_v53 }
 0xe00   : > { %2215 = vmatmul.mubr.bf16.vlgmr.msra.gmra.mxu1 %v2020_v56  ;;  %4034 = vmatmul.mubr.bf16.vlgmr.msra.gmra.mxu0 %v2020_v56 }
 0xe01   : > { %4039 = vmatprep.mubr.msk.f32.mxu1 %vm4846_vm0, %v4845_v1  ;;  %4093 = vmatprep.mubr.msk.bf16.mxu0 %vm4846_vm0, %v4845_v1 }
 0xec0   : > { %v2216_v58 = vpop.f32.mrf.mxu1  ;;  %v5339_v59 = vpop.f32.mrf.mxu0 }
 0xec1   : > { %v5345_v62 = vmul.f32 0.17677669, %v2216_v58 }
 0xec2   : > { %v5341_v60 = vpop.f32.mrf.mxu1  ;;  %v4035_v61 = vpop.f32.mrf.mxu0 }
 0xec3   : > { %4038 = vmatpush3.xpose.msk.msra.mxu1 %vm848_vm1, %v5341_v60 }
 0xec4   : > { %v2220_v63 = vpop.f32.mrf.mxu1  ;;  %v2260_v40 = vpop.f32.mrf.mxu0  ;;  %4042 = vmatprep.subr.mxu1 %v4845_v1 }
 0xec6   : > { %v2221_v2 = vpop.f32.mrf.mxu1  ;;  %v4036_v3 = vpop.f32.mrf.mxu0  ;;  %4040 = vmatmul.mubr.msk.f32.vlgmr.msra.gmra.mxu1 %vm848_vm1, %v5345_v62 }
 0xec7   : > { %4043 = vmatpush3.msra.mxu1 %v5339_v59  ;;  %4044 = vmatprep.mubr.msk.f32.mxu1 %vm4846_vm0, %v4845_v1 }
 0xec8   : > { %4047 = vmatprep.subr.mxu1 %v4845_v1 }
 0xf86   : > { %v2336_v4 = vpop.f32.mrf.mxu1 }
 0xf87   : > { %v2340_v5 = vsel %vm5216_vm2, %v2336_v4, -1000000.0 }
 0xf88   : > { %v4041_v6 = vpop.f32.mrf.mxu1  ;;  %v2341_v7 = vsel %vm926_vm3, %v2340_v5, -inf }
 0xf89   : > { %2342 = vmax.xlane.f32.xlu0 %v2341_v7 }
 0xf9f   : > { %2428 = vrot.lane.b32.xlu0 %v5341_v60, %s4847_s8 }
0x1012   : > { %v2343_v8 = vpop.xlane.xlu0 %2342 }
0x1013   : > { %v2344_v9 = vsub.f32 %v2340_v5, %v2343_v8 }
0x1015   : > { %v2345_v10 = vmul.f32 1.442695, %v2344_v9 }
0x1016   : > { %v2429_v26 = vpop.permute.xlu0 %2428 }
0x1017   : > { %4389 = vpow2.f32 %v2345_v10 }
0x1024   : > { %v4390_v11 = vpop.eup %4389 }
0x1025   : > { %v2347_v12 = vsel %vm926_vm3, %v4390_v11, 0.0 }
0x1026   : > { %2348 = vadd.xlane.f32.xlu1 %v2347_v12  ;;  %v4322_v12 = vld [vmem:[#allocation13 + $0x70] sm:$0xff]  }
0x1037   : > { %2426 = vrot.lane.b32.xlu1 %v5345_v62, %s4847_s8 }
0x10af   : > { %v2349_v13 = vpop.xlane.xlu1 %2348 }
0x10b0   : > { %4391 = vrcp.f32 %v2349_v13  ;;  %v4323_v13 = vld [vmem:[#allocation13 + $0x68] sm:$0xff]  }
0x10b3   : > { %v2427_v16 = vpop.permute.xlu1 %2426 }
0x10bd   : > { %v4392_v14 = vpop.eup %4391 }
0x10be   : > { %v2351_v15 = vmul.f32 %v4392_v14, %v4390_v11  ;;  %v4321_v11 = vld [vmem:[#allocation13 + $0x78] sm:$0xff]   ;;  %v4324_v14 = vld [vmem:[#allocation13 + $0x60] sm:$0xff]  }
0x10bf   : > { %4078 = vmatpush3.bf16.msra.mxu0 %v4321_v11  ;;  %v4366_v11 = vld [vmem:[#allocation16 + $0x88] sm:$0xff]  }
0x10c0   : > { %4045 = vmatmul.mubr.msk.f32.vlgmr.msra.gmra.mxu1 %vm926_vm3, %v2351_v15  ;;  %4079 = vmatprep.subr.bf16.mxu0 %v4845_v1  ;;  %v4325_v15 = vld [vmem:[#allocation13 + $0x58] sm:$0xff]  }
0x10c1   : > { %4048 = vmatpush3.xpose.msk.msra.mxu1 %vm848_vm1, %v2429_v26  ;;  %4049 = vmatprep.mubr.msk.f32.mxu1 %vm4846_vm0, %v4845_v1  ;;  %v4326_v26 = vld [vmem:[#allocation13 + $0x50] sm:$0xff]  }
0x10c2   : > { %4052 = vmatprep.subr.mxu1 %v4845_v1 }
0x10c3   : > { %4080 = vmatpush3.bf16.msra.mxu0 %v4322_v12  ;;  %v4367_v12 = vld [vmem:[#allocation16 + $0xc0] sm:$0xff]  }
0x10c4   : > { %4050 = vmatmul.mubr.msk.f32.vlgmr.msra.gmra.mxu1 %vm848_vm1, %v2427_v16  ;;  %4081 = vmatprep.subr.bf16.mxu0 %v4845_v1  ;;  %v4328_v16 = vld [vmem:[#allocation13 + $0x40] sm:$0xff]  }
0x10c5   : > { %4054 = vmatprep.mubr.msk.f32.mxu1 %vm4846_vm0, %v4845_v1 }
0x10c7   : > { %4082 = vmatpush3.bf16.msra.mxu0 %v4323_v13  ;;  %v4368_v13 = vld [vmem:[#allocation16 + $0x80] sm:$0xff]  }
0x10c8   : > { %4083 = vmatprep.subr.bf16.mxu0 %v4845_v1 }
0x10cb   : > { %4084 = vmatpush3.bf16.msra.mxu0 %v4324_v14  ;;  %v3774_v14 = vld [vmem:[%s5500_s9 + $0x2] sm:$0x3] }
0x10cc   : > { %4085 = vmatprep.subr.bf16.mxu0 %v4845_v1 }
0x10cf   : > { %4086 = vmatpush3.bf16.msra.mxu0 %v4325_v15  ;;  %v3100_v15 = vrot.slane %v3774_v14, %v1684_v55  ;;  %v3792_v55 = vld [vmem:[%s5502_s11 + $0x1] ss:$0 sm:$0xff] }
0x10d0   : > { %4087 = vmatprep.subr.bf16.mxu0 %v4845_v1 }
0x10d3   : > { %4088 = vmatpush3.bf16.msra.mxu0 %v4326_v26  ;;  %v3104_v26 = vrot.slane %v3774_v14, %v1688_v57 }
0x10d4   : > { %4089 = vmatprep.subr.bf16.mxu0 %v4845_v1 }
0x1180   : > { %v2421_v17 = vpop.f32.mrf.mxu1 }
0x1181   : > { %2425 = vst.msk [vmem:[#allocation3] sm:$0xff] %vm848_vm1, %v2421_v17 }
0x1182   : > { %v4046_v18 = vpop.f32.mrf.mxu1 }
0x1184   : > { %v2500_v19 = vpop.f32.mrf.mxu1 }
0x1185   : > { %v2504_v20 = vsel %vm5216_vm2, %v2500_v19, -1000000.0 }
0x1186   : > { %v4051_v21 = vpop.f32.mrf.mxu1  ;;  %v2505_v22 = vsel %vm926_vm3, %v2504_v20, -inf }
0x1187   : > { %2506 = vmax.xlane.f32.xlu1 %v2505_v22 }
0x1198   : > { %2600 = vrot.lane.b32.xlu1 %v5341_v60, %s4848_s1 }
0x119c   : > { %2598 = vrot.lane.b32.xlu1 %v5345_v62, %s4848_s1 }
0x1210   : > { %v2507_v23 = vpop.xlane.xlu1 %2506 }
0x1211   : > { %v2508_v24 = vsub.f32 %v2504_v20, %v2507_v23 }
0x1213   : > { %v2509_v25 = vmul.f32 1.442695, %v2508_v24 }
0x1214   : > { %v2601_v32 = vpop.permute.xlu1 %2600 }
0x1215   : > { %4393 = vpow2.f32 %v2509_v25 }
0x1218   : > { %v2599_v34 = vpop.permute.xlu1 %2598 }
0x1222   : > { %v4394_v27 = vpop.eup %4393 }
0x1223   : > { %v2511_v28 = vsel %vm926_vm3, %v4394_v27, 0.0 }
0x1224   : > { %2512 = vadd.xlane.f32.xlu0 %v2511_v28  ;;  %v4329_v28 = vld [vmem:[#allocation14 + $0xf0] ss:$8 sps:$4 sm:$0xff]  }
0x123a   : > { %2517 = vrot.lane.b32.xlu0 %v5339_v59, %s4847_s8 }
0x12ad   : > { %v2513_v29 = vpop.xlane.xlu0 %2512 }
0x12ae   : > { %4395 = vrcp.f32 %v2513_v29  ;;  %v4334_v29 = vld [vmem:[#allocation14 + $0xe4] ss:$8 sps:$4 sm:$0xff]  }
0x12b1   : > { %v2518_v30 = vpop.permute.xlu0 %2517 }
0x12b2   : > { %4053 = vmatpush3.msra.mxu1 %v2518_v30  ;;  %v4332_v30 = vld [vmem:[#allocation14 + $0xe0] ss:$8 sps:$4 sm:$0xff]  }
0x12b3   : > { %4057 = vmatprep.subr.mxu1 %v4845_v1 }
0x12bb   : > { %v4396_v31 = vpop.eup %4395 }
0x12bc   : > { %v2515_v33 = vmul.f32 %v4396_v31, %v4394_v27 }
0x12be   : > { %4055 = vmatmul.mubr.msk.f32.vlgmr.msra.gmra.mxu1 %vm926_vm3, %v2515_v33 }
0x12bf   : > { %4058 = vmatpush3.xpose.msk.msra.mxu1 %vm848_vm1, %v2601_v32  ;;  %4059 = vmatprep.mubr.msk.f32.mxu1 %vm4846_vm0, %v4845_v1 }
0x12c0   : > { %4062 = vmatprep.subr.mxu1 %v4845_v1 }
0x12c2   : > { %4060 = vmatmul.mubr.msk.f32.vlgmr.msra.gmra.mxu1 %vm848_vm1, %v2599_v34 }
0x12c3   : > { %4064 = vmatprep.mubr.msk.f32.mxu1 %vm4846_vm0, %v4845_v1 }
0x137e   : > { %v2589_v35 = vpop.f32.mrf.mxu1 }
0x1380   : > { %v4056_v37 = vpop.f32.mrf.mxu1 }
0x1381   : > { %v4335_v37 = vld [vmem:[#allocation14 + $0xd0] ss:$8 sps:$4 sm:$0xff]  }
0x1382   : > { %v2672_v38 = vpop.f32.mrf.mxu1 }
0x1383   : > { %v2676_v39 = vsel %vm5216_vm2, %v2672_v38, -1000000.0  ;;  %v4340_v38 = vld [vmem:[#allocation14 + $0xc4] ss:$8 sps:$4 sm:$0xff]  }
0x1384   : > { %v4061_v41 = vpop.f32.mrf.mxu1  ;;  %v2677_v42 = vsel %vm926_vm3, %v2676_v39, -inf }
0x1385   : > { %2678 = vmax.xlane.f32.xlu1 %v2677_v42  ;;  %v4341_v41 = vld [vmem:[#allocation14 + $0xb0] ss:$8 sps:$4 sm:$0xff]   ;;  %v4346_v42 = vld [vmem:[#allocation14 + $0xa4] ss:$8 sps:$4 sm:$0xff]  }
0x1396   : > { %2771 = vrot.lane.b32.xlu1 %v5341_v60, %s4849_s30 }
0x139a   : > { %2769 = vrot.lane.b32.xlu1 %v5345_v62, %s4849_s30 }
0x140e   : > { %v2679_v44 = vpop.xlane.xlu1 %2678 }
0x140f   : > { %v2680_v45 = vsub.f32 %v2676_v39, %v2679_v44  ;;  %v4343_v39 = vld [vmem:[#allocation14 + $0xb4] ss:$8 sps:$4 sm:$0xff]   ;;  %v4344_v44 = vld [vmem:[#allocation14 + $0xa0] ss:$8 sps:$4 sm:$0xff]  }
0x1411   : > { %v2681_v46 = vmul.f32 1.442695, %v2680_v45  ;;  %v4349_v45 = vld [vmem:[#allocation14 + $0x94] ss:$8 sps:$4 sm:$0xff]  }
0x1412   : > { %v2772_v51 = vpop.permute.xlu1 %2771 }
0x1413   : > { %4397 = vpow2.f32 %v2681_v46  ;;  %v4347_v46 = vld [vmem:[#allocation14 + $0x90] ss:$8 sps:$4 sm:$0xff]  }
0x1416   : > { %v2770_v56 = vpop.permute.xlu1 %2769 }
0x1420   : > { %v4398_v36 = vpop.eup %4397 }
0x1421   : > { %v2683_v47 = vsel %vm926_vm3, %v4398_v36, 0.0 }
0x1422   : > { %2684 = vadd.xlane.f32.xlu0 %v2683_v47  ;;  %v4350_v47 = vld [vmem:[#allocation14 + $0x80] ss:$8 sps:$4 sm:$0xff]  }
0x1438   : > { %2688 = vrot.lane.b32.xlu0 %v5339_v59, %s4848_s1 }
0x14ab   : > { %v2685_v48 = vpop.xlane.xlu0 %2684 }
0x14ac   : > { %4399 = vrcp.f32 %v2685_v48  ;;  %v4353_v48 = vld [vmem:[#allocation16 + $0xf8] sm:$0xff]  }
0x14af   : > { %v2689_v49 = vpop.permute.xlu0 %2688 }
0x14b0   : > { %4063 = vmatpush3.msra.mxu1 %v2689_v49  ;;  %v4354_v49 = vld [vmem:[#allocation16 + $0xb8] sm:$0xff]  }
0x14b1   : > { %4067 = vmatprep.subr.mxu1 %v4845_v1 }
0x14b9   : > { %v4400_v50 = vpop.eup %4399 }
0x14ba   : > { %v2687_v52 = vmul.f32 %v4400_v50, %v4398_v36  ;;  %v4352_v36 = vld [vmem:[#allocation14 + $0x84] ss:$8 sps:$4 sm:$0xff]   ;;  %v4355_v50 = vld [vmem:[#allocation16 + $0xf0] sm:$0xff]  }
0x14bc   : > { %4065 = vmatmul.mubr.msk.f32.vlgmr.msra.gmra.mxu1 %vm926_vm3, %v2687_v52  ;;  %v4357_v52 = vld [vmem:[#allocation16 + $0xe8] sm:$0xff]  }
0x14bd   : > { %4068 = vmatpush3.xpose.msk.msra.mxu1 %vm848_vm1, %v2772_v51  ;;  %4069 = vmatprep.mubr.msk.f32.mxu1 %vm4846_vm0, %v4845_v1  ;;  %v4356_v51 = vld [vmem:[#allocation16 + $0xb0] sm:$0xff]  }
0x14be   : > { %4072 = vmatprep.subr.mxu1 %v4845_v1 }
0x14c0   : > { %4070 = vmatmul.mubr.msk.f32.vlgmr.msra.gmra.mxu1 %vm848_vm1, %v2770_v56  ;;  %v4358_v56 = vld [vmem:[#allocation16 + $0xa8] sm:$0xff]  }
0x14c1   : > { %4074 = vmatprep.mubr.msk.f32.mxu1 %vm4846_vm0, %v4845_v1 }
0x157c   : > { %v2760_v58 = vpop.f32.mrf.mxu1 }
0x157e   : > { %v4066_v60 = vpop.f32.mrf.mxu1 }
0x157f   : > { %v4360_v60 = vld [vmem:[#allocation16 + $0xa0] sm:$0xff]  }
0x1580   : > { %v2843_v61 = vpop.f32.mrf.mxu1 }
0x1581   : > { %v2847_v62 = vsel %vm5216_vm2, %v2843_v61, -1000000.0  ;;  %v4361_v61 = vld [vmem:[#allocation16 + $0xd8] sm:$0xff]  }
0x1582   : > { %v4071_v63 = vpop.f32.mrf.mxu1  ;;  %v2848_v40 = vsel %vm926_vm3, %v2847_v62, -inf }
0x1583   : > { %2849 = vmax.xlane.f32.xlu0 %v2848_v40  ;;  %v4363_v63 = vld [vmem:[#allocation16 + $0xd0] sm:$0xff]  }
0x1584   : > { %v4364_v40 = vld [vmem:[#allocation16 + $0x90] sm:$0xff]  }
0x1599   : > { %2859 = vrot.lane.b32.xlu0 %v5339_v59, %s4849_s30 }
0x159d   : > { %2765 = vrot.lane.b32.xlu0 %v2760_v58, %s4848_s1  ;;  %v4359_v58 = vld [vmem:[#allocation16 + $0xe0] sm:$0xff]  }
0x160c   : > { %v2850_v2 = vpop.xlane.xlu0 %2849 }
0x160d   : > { %v2851_v3 = vsub.f32 %v2847_v62, %v2850_v2  ;;  %v4362_v62 = vld [vmem:[#allocation16 + $0x98] sm:$0xff]  }
0x160f   : > { %v2852_v4 = vmul.f32 1.442695, %v2851_v3 }
0x1610   : > { %v2860_v5 = vpop.permute.xlu0 %2859 }
0x1611   : > { %4401 = vpow2.f32 %v2852_v4  ;;  %4073 = vmatpush3.msra.mxu1 %v2860_v5 }
0x1614   : > { %v2766_v9 = vpop.permute.xlu0 %2765 }
0x161e   : > { %v4402_v6 = vpop.eup %4401 }
0x161f   : > { %v2854_v7 = vsel %vm926_vm3, %v4402_v6, 0.0 }
0x1620   : > { %2855 = vadd.xlane.f32.xlu1 %v2854_v7 }
0x1631   : > { %2594 = vrot.lane.b32.xlu1 %v2589_v35, %s4849_s30  ;;  %v4337_v35 = vld [vmem:[#allocation14 + $0xd4] ss:$8 sps:$4 sm:$0xff]  }
0x16a9   : > { %v2856_v43 = vpop.xlane.xlu1 %2855 }
0x16aa   : > { %4403 = vrcp.f32 %v2856_v43  ;;  %v3773_v43 = vld [vmem:[%s5498_s7 + $0x1] ss:$0 sm:$0xff] }
0x16ad   : > { %v2595_v8 = vpop.permute.xlu1 %2594 }
0x16ae   : > { %2597 = vst.msk [vmem:[#allocation3] sm:$0xff] %vm1183_vm4, %v2595_v8 }
0x16af   : > { %2768 = vst.msk [vmem:[#allocation3] sm:$0xff] %vm1355_vm5, %v2766_v9 }
0x16b7   : > { %v4404_v59 = vpop.eup %4403 }
0x16b8   : > { %v2858_v10 = vmul.f32 %v4404_v59, %v4402_v6  ;;  %v3772_v6 = vld [vmem:[%s5497_s6 + $0x1] ss:$0 sm:$0xff] }
0x16ba   : > { %4075 = vmatmul.mubr.msk.f32.vlgmr.msra.gmra.mxu1 %vm926_vm3, %v2858_v10  ;;  %v4365_v10 = vld [vmem:[#allocation16 + $0xc8] sm:$0xff]  }
0x16bb   : > { %3219 = vmatprep.mubr.bf16.mxu1 %v4844_v0  ;;  %v4327_v0 = vld [vmem:[#allocation13 + $0x48] sm:$0xff]  }
0x16bc   : > { %4090 = vmatpush3.bf16.msra.mxu0 %v4327_v0 }
0x16bd   : > { %4091 = vmatprep.subr.bf16.mxu0 %v4845_v1  ;;  %v4331_v1 = vld [vmem:[#allocation14 + $0xf4] ss:$8 sps:$4 sm:$0xff]  }
0x16be   : > { %3187 = vmatprep.subr.bf16.mxu1 %v4331_v1 }
0x16bf   : > { %3188 = vmatpush1.bf16.msra.mxu1 %v4329_v28 }
0x16c0   : > { %4092 = vmatpush3.bf16.msra.mxu0 %v4328_v16  ;;  %3189 = vmatprep.subr.bf16.mxu1 %v4334_v29 }
0x16c1   : > { %3915 = vmatprep.subr.bf16.mxu0 %v4353_v48 }
0x16c3   : > { %3190 = vmatpush1.bf16.msra.mxu1 %v4332_v30 }
0x16c4   : > { %3191 = vmatprep.subr.bf16.mxu1 %v4337_v35 }
0x16c7   : > { %3192 = vmatpush1.bf16.msra.mxu1 %v4335_v37 }
0x16c8   : > { %3193 = vmatprep.subr.bf16.mxu1 %v4340_v38  ;;  %v3811_v38 = vld [vmem:[%s5503_s12 + $0x1] ss:$0 sm:$0xff] }
0x177a   : > { %v2931_v17 = vpop.f32.mrf.mxu1 }
0x177b   : > { %2936 = vrot.lane.b32.xlu1 %v2931_v17, %s4847_s8  ;;  %s4735_s8 = sshll.u32 %s4850_s15, 4  ;;  %s4736_s8 = int_to_ptr.vmem [resolvable:$false] %s4735_s8 }
0x177c   : > { %v4076_v18 = vpop.f32.mrf.mxu1  ;;  %s4737_s28 = scalar_lea.vmem %s4736_s8, 256  ;;  %p4738_p6 = scmp.lt.s32.totalorder %s3455_s18, %s4736_s8 }
0x177d   : > { %p4739_p2 = scmp.lt.s32.totalorder %s4737_s28, %s4731_s17 }
0x177f   : > { %p4740_p4 = por %p4739_p2, %p4738_p6 }
0x1781   : > { %p4741_p7 = pnand %p4740_p4, %p4734_p12 }
0x17ed   : > { %v2937_v19 = vpop.permute.xlu1 %2936 }
0x17ee   : > { %2939 = vst.msk [vmem:[#allocation3] sm:$0xff] %vm1527_vm6, %v2937_v19 }
0x17f5   : > { %v2940_v20 = vld [vmem:[#allocation3] sm:$0xff] }
0x17f6   : > { %v2941_v21 = vpack.c.bf16 %v2940_v20, %v2940_v20 }
0x17f8   : > { %4094 = vmatmul.mubr.bf16.vlgmr.msra.gmra.mxu0 %v2941_v21 }
0x17f9   : > { %3916 = vmatpush3.bf16.msra.mxu0 %v4354_v49 }
0x17fa   : > { %3917 = vmatprep.subr.bf16.mxu0 %v4355_v50 }
0x17fd   : > { %3918 = vmatpush3.bf16.msra.mxu0 %v4356_v51 }
0x17fe   : > { %3919 = vmatprep.subr.bf16.mxu0 %v4357_v52 }
0x1801   : > { %3920 = vmatpush3.bf16.msra.mxu0 %v4358_v56 }
0x1802   : > { %3921 = vmatprep.subr.bf16.mxu0 %v4359_v58 }
0x1805   : > { %3922 = vmatpush3.bf16.msra.mxu0 %v4360_v60 }
0x1806   : > { %3923 = vmatprep.subr.bf16.mxu0 %v4361_v61 }
0x1809   : > { %3924 = vmatpush3.bf16.msra.mxu0 %v4362_v62 }
0x180a   : > { %3925 = vmatprep.subr.bf16.mxu0 %v4363_v63 }
0x180d   : > { %3926 = vmatpush3.bf16.msra.mxu0 %v4364_v40 }
0x180e   : > { %3927 = vmatprep.subr.bf16.mxu0 %v4365_v10 }
0x1811   : > { %3928 = vmatpush3.bf16.msra.mxu0 %v4366_v11 }
0x1812   : > { %3929 = vmatprep.subr.bf16.mxu0 %v4367_v12 }
0x1815   : > { %3930 = vmatpush3.bf16.msra.mxu0 %v4368_v13 }
0x18b8   : > { %v3041_v22 = vpop.f32.mrf.mxu0 }
0x18b9   : > { %v3042_v23 = vadd.f32 %v3041_v22, %v5331_v53  ;;  %v4338_v53 = vld [vmem:[#allocation14 + $0xc0] ss:$8 sps:$4 sm:$0xff]  }
0x18ba   : > { %v4095_v24 = vpop.f32.mrf.mxu0  ;;  %3194 = vmatpush1.bf16.msra.mxu1 %v4338_v53 }
0x18bb   : > { %3051 = vadd.xlane.f32.xlu0 %v3042_v23  ;;  %3195 = vmatprep.subr.bf16.mxu1 %v4343_v39 }
0x18bc   : > { %v3044_v25 = vpop.f32.mrf.mxu0 }
0x18be   : > { %v4096_v27 = vpop.f32.mrf.mxu0  ;;  %3196 = vmatpush1.bf16.msra.mxu1 %v4341_v41  ;;  %v3812_v41 = vld [vmem:[%s5504_s13 + $0x1] ss:$0 sm:$0xff] }
0x18bf   : > { %3197 = vmatprep.subr.bf16.mxu1 %v4346_v42 }
0x18c2   : > { %3198 = vmatpush1.bf16.msra.mxu1 %v4344_v44 }
0x18c3   : > { %3199 = vmatprep.subr.bf16.mxu1 %v4349_v45 }
0x18c6   : > { %3200 = vmatpush1.bf16.msra.mxu1 %v4347_v46 }
0x18c7   : > { %3201 = vmatprep.subr.bf16.mxu1 %v4352_v36 }
0x18ca   : > { %3202 = vmatpush1.bf16.msra.mxu1 %v4350_v47 }
0x1944   : > { %v3052_v31 = vpop.xlane.xlu0 %3051 }
0x1945   : > { %v3053_v32 = vmul.f32 0.0078125, %v3052_v31 }
0x1947   : > { %v3054_v33 = vsub.f32 %v3042_v23, %v3053_v32 }
0x1949   : > { %v3055_v34 = vmul.f32 %v3054_v33, %v3054_v33 }
0x194b   : > { %3056 = vadd.xlane.f32.xlu1 %v3055_v34 }
0x19d4   : > { %v3057_v2 = vpop.xlane.xlu1 %3056 }
0x19d5   : > { %v3058_v3 = vmul.f32 0.0078125, %v3057_v2 }
0x19d7   : > { %v3059_v4 = vadd.f32 1e-05, %v3058_v3 }
0x19d9   : > { %4405 = vrsqrt.f32 %v3059_v4 }
0x19e6   : > { %v4406_v5 = vpop.eup %4405 }
0x19e7   : > { %v3061_v7 = vmul.f32 %v4406_v5, %v3054_v33 }
0x19e9   : > { %v3068_v8 = vmul.f32 %v3772_v6, %v3061_v7 }
0x19eb   : > { %v3075_v9 = vadd.f32 %v3773_v43, %v3068_v8 }
0x19ed   : > { %v3076_v59 = vpack.c.bf16 %v3075_v9, %v3075_v9 }
0x19ef   : > { %3220 = vmatmul.mubr.bf16.vlgmr.msra.gmra.mxu1 %v3076_v59 }
0x1aaf   : > { %v3221_v0 = vpop.f32.mrf.mxu1 }
0x1ab0   : > { %v3222_v16 = vadd.f32 %v3221_v0, %v3100_v15 }
0x1ab1   : > { %v3223_v17 = vpop.f32.mrf.mxu1 }
0x1ab2   : > { %v3224_v18 = vadd.f32 %v3223_v17, %v3104_v26  ;;  %v3228_v19 = vmax.f32 %v3222_v16, 0.0 }
0x1ab3   : > { %v3225_v20 = vpop.f32.mrf.mxu1 }
0x1ab4   : > { %v3229_v21 = vmax.f32 %v3224_v18, 0.0  ;;  %v3230_v24 = vpack.c.bf16 %v3228_v19, %v3228_v19 }
0x1ab5   : > { %v3226_v22 = vpop.f32.mrf.mxu1 }
0x1ab6   : > { %v3231_v23 = vpack.c.bf16 %v3229_v21, %v3229_v21 }
0x1ab8   : > { %3401 = vmatprep.mubr.bf16.mxu0 %v3231_v23 }
0x1ab9   : > { %3402 = vmatmul.mubr.bf16.vlgmr.msra.gmra.mxu0 %v3230_v24 }
0x1b79   : > { %v3931_v25 = vpop.f32.mrf.mxu0 }
0x1b7b   : > { %v3932_v27 = vpop.f32.mrf.mxu0 }
0x1b7c   : > { %v3933_v54 = vadd.f32 %v3932_v27, %v3931_v25 }
0x1b7d   : > { %v3934_v57 = vpop.f32.mrf.mxu0 }
0x1b7e   : > { %v3404_v28 = vadd.f32 %v3933_v54, %v3792_v55 }
0x1b7f   : > { %v3935_v1 = vpop.f32.mrf.mxu0 }
0x1b80   : > { %v3409_v29 = vadd.f32 %v3404_v28, %v3075_v9 }
0x1b82   : > { %3414 = vadd.xlane.f32.xlu0 %v3409_v29 }
0x1c0b   : > { %v3415_v30 = vpop.xlane.xlu0 %3414 }
0x1c0c   : > { %v3416_v31 = vmul.f32 0.0078125, %v3415_v30 }
0x1c0e   : > { %v3417_v32 = vsub.f32 %v3409_v29, %v3416_v31 }
0x1c10   : > { %v3418_v33 = vmul.f32 %v3417_v32, %v3417_v32 }
0x1c12   : > { %3419 = vadd.xlane.f32.xlu0 %v3418_v33 }
0x1c9b   : > { %v3420_v34 = vpop.xlane.xlu0 %3419 }
0x1c9c   : > { %v3421_v35 = vmul.f32 0.0078125, %v3420_v34 }
0x1c9e   : > { %v3422_v37 = vadd.f32 1e-05, %v3421_v35 }
0x1ca0   : > { %4407 = vrsqrt.f32 %v3422_v37 }
0x1cad   : > { %v4408_v53 = vpop.eup %4407 }
0x1cae   : > { %v3424_v39 = vmul.f32 %v4408_v53, %v3417_v32 }
0x1cb0   : > { %v3431_v42 = vmul.f32 %v3811_v38, %v3424_v39 }
0x1cb2   : > { %v3438_v44 = vadd.f32 %v3812_v41, %v3431_v42 }
0x1cb4   : > { %3439 = vst [vmem:[%s444_s4] sm:$0xff] %v3438_v44 }
0x1cb5   : > { %4744 = shalt.err (!%p4741_p7)
}
0x1cb6   : > { %s4745_s16 = scalar_lea.hbm %s3452_s0, 128  ;;  %s4749_s1 = scalar_lea.hbm %s5550_s5, 256 }
0x1cb7   : > { %p4746_p8 = scmp.ne.s32.totalorder %s3452_s0, %s4745_s16  ;;  %p4750_p0 = scmp.lt.s32.totalorder %s3452_s0, %s5550_s5 }
0x1cb8   : > { %p4751_p1 = scmp.lt.s32.totalorder %s4749_s1, %s4745_s16 }
0x1cb9   : > { %p4747_p10 = pnand %p4746_p8, %p5552_p9 }
0x1cba   : > { %p4752_p13 = por %p4751_p1, %p4750_p0 }
0x1cbb   : > { %p4748_p11 = pneg %p4747_p10 }
0x1cbd   : > { %p4753_p3 = pnand %p4752_p13, %p4748_p11 }
0x1cbf   : > { %4756 = shalt.err (!%p4753_p3)
}
0x1cc0   : > { %4117 = dma.vmem_to_hbm [thread:$0]  (%p5552_p9), %s3455_s18, 128, %s3452_s0, %s3441_s24  }
0x1cc1 PF: > { %s5553_s25 = sld [smem:[#allocation51_spill]] }
0x1cc2   : > { %s5554_s3 = sld [smem:[#allocation49_spill]] }
0x1cc3   : > { %s5555_s14 = sld [smem:[#allocation54_spill]] }
0x1cc7   : > { %p4149_p5 = scmp.ge.s32.totalorder %s5553_s25, 2 }
0x1cc8   : > { %s3466_s23 = sand.u32 1, %s5554_s3  }
0x1cc9   : > { %p5556_p12 = scmp.ne.s32.totalorder %s5555_s14, 0  ;;  %s3467_s21 = scalar_lea.sflag [#allocation10], %s3466_s23 }
0x1ccb   : > { %p4136_p6 = pnand %p4149_p5, %p5556_p12 }
0x1ccd   : > { %p4137_p2 = pneg %p4136_p6 }
0x1ccf   : > { %4804 = dma.done.wait (%p4137_p2), %s3467_s21, 128  }
0x1cd0   : > { %4806 = vsyncadd (%p4137_p2), %s3467_s21, 4294967168  ;;  %s5557_s0 = sld [smem:[#allocation52_spill]]  ;;  %s5560_s19 = smov %s4813_s20 }
0x1cd1   : > { %s5558_s26 = sld [smem:[#allocation50_spill]] }
0x1cd2   : > { %s5559_s21 = sld [smem:[#allocation53_spill]] }
0x1cd6   : > { %p33_p4 = scmp.ge.s32.totalorder %s5557_s0, 4  }
0x1cd7   : > { %s5561_s20 = smov %s5558_s26 }
0x1cd8   :  { %35 = sbr.rel (!%p33_p4) target bundleno = 18 (0x12), region = 188 }
0x1cdd   :  { %3472 = vsyncpa [#allocation9], 1 }
0x1cde   :  { %3474 = vsyncpa [#allocation9 + $0x1], 1 }
0x1cdf   :  { %3475 = vsyncpa [#allocation12], 1 }
0x1ce0   :  { %3476 = vsyncpa [#allocation15], 1 }
0x1ce1   :  { %3477 = vsyncpa [#allocation10], 1 }
0x1ce2   :  { %3479 = vsyncpa [#allocation10 + $0x1], 1 }
0x1ce3   :  { %3480 = vsyncmov [#allocation4] }
0x1ce6   :  { %s3481_s27 = vpop.sfrf %3480 }
0x1ce7   :  { %p3817_p9 = scmp.ne.s32.totalorder %s3481_s27, 0 }
0x1ce9   :  { %3485 = shalt.err (%p3817_p9)  }
0x1cea   :  { %3487 = vsyncmov [#allocation4 + $0x1] }
0x1ced   :  { %s3488_s18 = vpop.sfrf %3487 }
0x1cee   :  { %p3818_p7 = scmp.ne.s32.totalorder %s3488_s18, 0 }
0x1cf0   :  { %3492 = shalt.err (%p3818_p7)  }
0x1cf1   :  { %3494 = vsyncmov [#allocation4 + $0x2] }
0x1cf4   :  { %s3495_s29 = vpop.sfrf %3494 }
0x1cf5   :  { %p3819_p8 = scmp.ne.s32.totalorder %s3495_s29, 0 }
0x1cf7   :  { %3499 = shalt.err (%p3819_p8)  }
0x1cf8   :  { %3501 = vsyncmov [#allocation4 + $0x3] }
0x1cfb   :  { %s3502_s0 = vpop.sfrf %3501 }
0x1cfc   :  { %p3820_p10 = scmp.ne.s32.totalorder %s3502_s0, 0 }
0x1cfe   :  { %3506 = shalt.err (%p3820_p10)  }
0x1cff   :  { %3508 = vsyncmov [#allocation4 + $0x4] }
0x1d02   :  { %s3509_s2 = vpop.sfrf %3508 }
0x1d03   :  { %p3821_p11 = scmp.ne.s32.totalorder %s3509_s2, 0 }
0x1d05   :  { %3513 = shalt.err (%p3821_p11)  }
0x1d06   :  { %3515 = vsyncmov [#allocation4 + $0x5] }
0x1d09   :  { %s3516_s6 = vpop.sfrf %3515 }
0x1d0a   :  { %p3822_p0 = scmp.ne.s32.totalorder %s3516_s6, 0 }
0x1d0c   :  { %3520 = shalt.err (%p3822_p0)  }
0x1d0d   :  { %3522 = vsyncmov [#allocation4 + $0x6] }
0x1d10   :  { %s3523_s7 = vpop.sfrf %3522 }
0x1d11   :  { %p3823_p1 = scmp.ne.s32.totalorder %s3523_s7, 0 }
0x1d13   :  { %3527 = shalt.err (%p3823_p1)  }
0x1d14   :  { %3529 = vsyncmov [#allocation4 + $0x7] }
0x1d17   :  { %s3530_s9 = vpop.sfrf %3529 }
0x1d18   :  { %p3824_p13 = scmp.ne.s32.totalorder %s3530_s9, 0 }
0x1d1a   :  { %3534 = shalt.err (%p3824_p13)  }

</bundles_post_ra>
